<compile_context>
chip_gen: v7x
topology: tpu7x:2x2x1
jax: 0.10.0
libtpu: 0.0.40
codegen_flags: <defaults>
</compile_context>

<pallas_src>
import functools
from collections import defaultdict

import jax
import jax.numpy as jnp
from jax.experimental import pallas as pl
from jax.experimental.pallas import tpu as pltpu

# ----------------------------------------------------------------------------- config
ANCHORS = "10,13, 16,30, 33,23, 30,61, 62,45, 59,119, 116,90, 156,198, 373,326"

MODULE_DEFS = [
    {"type": "net", "channels": "4", "height": "64"},
    {"type": "convolutional", "batch_normalize": "1", "filters": "8",  "size": "3", "stride": "2", "pad": "1", "activation": "leaky"},
    {"type": "convolutional", "batch_normalize": "1", "filters": "16", "size": "3", "stride": "2", "pad": "1", "activation": "leaky"},
    {"type": "convolutional", "batch_normalize": "1", "filters": "16", "size": "1", "stride": "1", "pad": "1", "activation": "leaky"},
    {"type": "shortcut", "from": "-2", "activation": "linear"},
    {"type": "convolutional", "batch_normalize": "1", "filters": "32", "size": "3", "stride": "2", "pad": "1", "activation": "leaky"},
    {"type": "convolutional", "batch_normalize": "1", "filters": "32", "size": "3", "stride": "2", "pad": "1", "activation": "leaky"},
    {"type": "convolutional", "batch_normalize": "0", "filters": "33", "size": "1", "stride": "1", "pad": "1", "activation": "linear"},
    {"type": "yolo", "mask": "3,4,5", "anchors": ANCHORS, "classes": "2"},
    {"type": "route", "layers": "-3"},
    {"type": "upsample", "stride": "2"},
    {"type": "route", "layers": "-1,-6"},
    {"type": "convolutional", "batch_normalize": "0", "filters": "33", "size": "1", "stride": "1", "pad": "1", "activation": "linear"},
    {"type": "yolo", "mask": "0,1,2", "anchors": ANCHORS, "classes": "2"},
]

LANE = 128                        # lane-dense output-channel padding (unmasked vector stores)
TM_FALLBACK = 512                 # row tile if the whole problem does not fit the VMEM budget
TILE_BUDGET = 12 * 1024 * 1024    # per-buffer budget (x2 double buffering) for the whole-M path
VMEM_LIMIT = 32 * 1024 * 1024     # explicit scoped-VMEM budget (safe on v5e/v6e/v7x)


def _round_up(v, m):
    return ((v + m - 1) // m) * m


# ----------------------------------------------------------------------------- Pallas kernels
def _conv_mm_kernel(leaky, has_res, *refs):
    # patches: (TM, K) bf16 ; w: (K, Cp) bf16 with BN scale folded in and Cout zero-padded to Cp=128
    # shift:   (1, Cp) f32  ; optional residual: (TM, Cp) stored dtype (fused shortcut)
    # out:     (TM, Cp) bf16 (intermediate layers) or f32 (YOLO-head convs)
    if has_res:
        p_ref, w_ref, b_ref, r_ref, o_ref = refs
    else:
        p_ref, w_ref, b_ref, o_ref = refs
    acc = jnp.dot(p_ref[...], w_ref[...], preferred_element_type=jnp.float32)
    y = acc + b_ref[...]
    if leaky:
        y = jnp.where(y > 0.0, y, 0.1 * y)           # LeakyReLU(0.1)
    if has_res:
        y = y + r_ref[...].astype(jnp.float32)       # fused shortcut add (after the activation)
    o_ref[...] = y.astype(o_ref.dtype)


def _add_kernel(a_ref, b_ref, o_ref):                # standalone shortcut fallback
    o_ref[...] = a_ref[...] + b_ref[...]


def _upsample2_kernel(x_ref, o_ref):
    # x: (N, H, W, C) NHWC.  Lane-duplicate along C handles the W repeat ((N,H,W,2C) is bit-identical
    # to (N,H,2W,C) in row-major order); the H repeat runs along an untiled leading dim.
    x = x_ref[...]
    xw = jnp.concatenate([x, x], axis=-1)            # (N, H, W, 2C)
    o_ref[...] = jnp.repeat(xw, 2, axis=1)           # (N, 2H, W, 2C)


def _yolo_kernel(stride, p_ref, g_ref, o_ref):
    # p, g: (A, R) — attributes on sublanes, cells lane-dense.  g holds gx/gy for attrs 0..7, 0 else.
    p = p_ref[...]
    attr = jax.lax.broadcasted_iota(jnp.int32, p.shape, 0)
    boxes = (p + g_ref[...]) * stride
    o_ref[...] = jnp.where(attr < 8, boxes,
                           jnp.where(attr == 8, jax.nn.sigmoid(p), p))


# ----------------------------------------------------------------------------- op wrappers
def conv_block(x, p, stride, pad, leaky, residual_raw=None):
    """x: (N,H,W,Cin) NHWC.  Returns (NHWC output, raw lane-dense (Mp, Cp) output)."""
    N, H, W, Cin = x.shape
    w, shift, cout = p["w"], p["shift"], p["cout"]
    k = w.shape[0]
    Cp = w.shape[-1]
    Hout = (H + 2 * pad - k) // stride + 1
    Wout = (W + 2 * pad - k) // stride + 1

    xb = x.astype(jnp.bfloat16)                      # no-op when the producer already wrote bf16
    xp = jnp.pad(xb, ((0, 0), (pad, pad), (pad, pad), (0, 0))) if pad else xb
    # im2col glue (bf16): column ordering (ky, kx, cin) matches w.reshape(K, Cp)
    cols = []
    for ky in range(k):
        for kx in range(k):
            cols.append(xp[:, ky:ky + stride * Hout:stride, kx:kx + stride * Wout:stride, :])
    patches = (cols[0] if k == 1 else jnp.concatenate(cols, axis=-1))
    patches = patches.reshape(N * Hout * Wout, k * k * Cin)

    M, K = patches.shape
    out_dtype = jnp.bfloat16 if leaky else jnp.float32   # keep f32 only for the YOLO-head convs
    out_b = jnp.dtype(out_dtype).itemsize
    res_b = residual_raw.dtype.itemsize if residual_raw is not None else 0

    # single grid step whenever the whole problem fits a conservative VMEM budget
    m_full = _round_up(M, 8)
    tile_bytes = m_full * (2 * K + (out_b + res_b) * Cp) + 2 * K * Cp + 4 * Cp
    TM = m_full if 2 * tile_bytes <= TILE_BUDGET else TM_FALLBACK
    Mp = _round_up(M, TM)
    if Mp != M:
        patches = jnp.pad(patches, ((0, Mp - M), (0, 0)))

    w2 = w.reshape(K, Cp)
    has_res = residual_raw is not None
    if has_res and residual_raw.shape[0] != Mp:          # rounding-only mismatch; rows > M are dead
        if residual_raw.shape[0] < Mp:
            residual_raw = jnp.pad(residual_raw, ((0, Mp - residual_raw.shape[0]), (0, 0)))
        else:
            residual_raw = residual_raw[:Mp]

    in_specs = [
        pl.BlockSpec((TM, K), lambda i: (i, 0)),
        pl.BlockSpec((K, Cp), lambda i: (0, 0)),
        pl.BlockSpec((1, Cp), lambda i: (0, 0)),
    ]
    args = [patches, w2, shift]
    if has_res:
        in_specs.append(pl.BlockSpec((TM, Cp), lambda i: (i, 0)))
        args.append(residual_raw)

    raw = pl.pallas_call(
        functools.partial(_conv_mm_kernel, leaky, has_res),
        out_shape=jax.ShapeDtypeStruct((Mp, Cp), out_dtype),
        grid=(Mp // TM,),
        in_specs=in_specs,
        out_specs=pl.BlockSpec((TM, Cp), lambda i: (i, 0)),
        compiler_params=pltpu.CompilerParams(
            dimension_semantics=("parallel",),
            vmem_limit_bytes=VMEM_LIMIT),
    )(*args)

    y = raw[:M, :cout].reshape(N, Hout, Wout, cout)
    return y, raw


def shortcut_add(a, b):
    b = b.astype(a.dtype)
    return pl.pallas_call(
        _add_kernel, out_shape=jax.ShapeDtypeStruct(a.shape, a.dtype)
    )(a, b)


def upsample2(x):
    N, H, W, C = x.shape
    y = pl.pallas_call(
        _upsample2_kernel,
        out_shape=jax.ShapeDtypeStruct((N, 2 * H, W, 2 * C), x.dtype),
    )(x)
    # (N, 2H, W, 2C) is the same contiguous buffer as the nearest-x2 NHWC output
    return y.reshape(N, 2 * H, 2 * W, C)


def yolo_layer(x_nhwc, mdef, img_size):
    nC = int(mdef["classes"])
    nA = len(mdef["mask"].split(","))
    A = 9 + nC
    bs, nG, _, _ = x_nhwc.shape
    stride = float(img_size) / float(nG)
    R = bs * nA * nG * nG

    # (bs,nG,nG,nA*A) -> (A, bs, nA, gy, gx) -> (A, R): same element mapping as torch's
    # view(bs, nA, A, nG, nG).permute(0, 1, 3, 4, 2), but with the cells on the lane axis.
    p = x_nhwc.astype(jnp.float32).reshape(bs, nG, nG, nA, A).transpose(4, 0, 3, 1, 2).reshape(A, R)

    gx = jnp.broadcast_to(jnp.arange(nG, dtype=jnp.float32)[None, :], (nG, nG))   # grid_x[i,j]=j
    gy = jnp.broadcast_to(jnp.arange(nG, dtype=jnp.float32)[:, None], (nG, nG))   # grid_y[i,j]=i
    gx_r = jnp.broadcast_to(gx[None, None], (bs, nA, nG, nG)).reshape(1, R)
    gy_r = jnp.broadcast_to(gy[None, None], (bs, nA, nG, nG)).reshape(1, R)
    attr = jnp.arange(A)[:, None]
    g = jnp.where(attr >= 8, 0.0, jnp.where(attr % 2 == 0, gx_r, gy_r))            # (A, R)

    out = pl.pallas_call(
        functools.partial(_yolo_kernel, stride),
        out_shape=jax.ShapeDtypeStruct((A, R), jnp.float32),
    )(p, g)

    return out.reshape(A, bs, nA * nG * nG).transpose(1, 2, 0)   # (bs, nA*nG*nG, 9+nC)


# ----------------------------------------------------------------------------- params + forward
def init_params(module_defs, key):
    output_filters = [int(module_defs[0]["channels"])]
    params = []
    for mdef in module_defs[1:]:
        filters = output_filters[-1]
        p = None
        if mdef["type"] == "convolutional":
            bn = int(mdef["batch_normalize"])
            f = int(mdef["filters"])
            k = int(mdef["size"])
            cin = output_filters[-1]
            key, k1, k2, k3, k4, k5 = jax.random.split(key, 6)
            w = jax.random.normal(k1, (k, k, cin, f), jnp.float32) * 0.1
            if bn:
                gamma = 1.0 + 0.1 * jax.random.normal(k2, (f,), jnp.float32)
                beta = 0.1 * jax.random.normal(k3, (f,), jnp.float32)
                mean = 0.1 * jax.random.normal(k4, (f,), jnp.float32)
                var = jax.random.uniform(k5, (f,), jnp.float32, 0.5, 1.5)
                scale = gamma / jnp.sqrt(var + 1e-5)             # eval-mode BN
                shift = beta - mean * scale
            else:
                bias = 0.1 * jax.random.normal(k2, (f,), jnp.float32)
                scale = jnp.ones((f,), jnp.float32)
                shift = bias
            # fold the BN scale into the weights and pad Cout to a lane-dense multiple of 128
            w = w * scale[None, None, None, :]
            cp = _round_up(f, LANE)
            w = jnp.pad(w, ((0, 0), (0, 0), (0, 0), (0, cp - f))).astype(jnp.bfloat16)
            shift = jnp.pad(shift, (0, cp - f)).reshape(1, cp).astype(jnp.float32)
            p = {"w": w, "shift": shift, "cout": f}
            filters = f
        elif mdef["type"] == "route":
            layers = [int(v) for v in mdef["layers"].split(",")]
            filters = sum(output_filters[l] for l in layers)
        elif mdef["type"] == "shortcut":
            filters = output_filters[int(mdef["from"])]
        params.append(p)
        output_filters.append(filters)
    return params


def _referenced_layers(mdefs):
    """abs layer index -> set of layer indices whose route/shortcut reads it."""
    refs = defaultdict(set)
    for li, m in enumerate(mdefs):
        if m["type"] == "route":
            for v in m["layers"].split(","):
                j = int(v)
                refs[li + j if j < 0 else j].add(li)
        elif m["type"] == "shortcut":
            j = int(m["from"])
            refs[li + j if j < 0 else j].add(li)
            refs[li - 1].add(li)                    # the implicit `layer_outputs[-1]` operand
    return refs


def darknet_forward(x_nchw, module_defs, params):
    img_size = int(module_defs[0]["height"])
    mdefs = module_defs[1:]
    refs = _referenced_layers(mdefs)

    x = jnp.transpose(x_nchw, (0, 2, 3, 1)).astype(jnp.float32)   # NCHW -> NHWC once
    layer_outputs, raw_outputs, yolo_outputs = [], [], []
    skip_next = False
    raw = None
    for li, (mdef, p) in enumerate(zip(mdefs, params)):
        if skip_next:                                  # shortcut already fused into previous conv
            skip_next = False
            layer_outputs.append(x)
            raw_outputs.append(raw)
            continue
        t = mdef["type"]
        raw = None
        if t == "convolutional":
            k = int(mdef["size"])
            stride = int(mdef["stride"])
            pad = (k - 1) // 2 if int(mdef["pad"]) else 0
            leaky = mdef["activation"] == "leaky"
            residual = None
            # fuse an immediately-following shortcut into this conv's epilogue when legal
            if li + 1 < len(mdefs) and mdefs[li + 1]["type"] == "shortcut":
                src = li + 1 + int(mdefs[li + 1]["from"])
                only_ref = refs.get(li, set()) <= {li + 1}   # nothing else reads this conv's output
                if only_ref and 0 <= src < len(layer_outputs) and raw_outputs[src] is not None:
                    n_, h_, w_, _ = x.shape
                    hout = (h_ + 2 * pad - k) // stride + 1
                    wout = (w_ + 2 * pad - k) // stride + 1
                    if layer_outputs[src].shape == (n_, hout, wout, p["cout"]):
                        residual = raw_outputs[src]
            x, raw = conv_block(x, p, stride, pad, leaky, residual_raw=residual)
            skip_next = residual is not None
        elif t == "upsample":
            assert int(mdef["stride"]) == 2
            x = upsample2(x)
        elif t == "route":
            idxs = [int(v) for v in mdef["layers"].split(",")]
            x = jnp.concatenate([layer_outputs[j] for j in idxs], axis=-1)  # channel concat (glue)
        elif t == "shortcut":
            x = shortcut_add(layer_outputs[-1], layer_outputs[int(mdef["from"])])
        elif t == "yolo":
            x = yolo_layer(x, mdef, img_size)
            yolo_outputs.append(x)
        layer_outputs.append(x)
        raw_outputs.append(raw)
    return jnp.concatenate(yolo_outputs, axis=1)       # torch.cat(output, 1)


# ----------------------------------------------------------------------------- main
if __name__ == "__main__":
    key = jax.random.PRNGKey(0)
    key, pkey, xkey = jax.random.split(key, 3)

    params = init_params(MODULE_DEFS, pkey)
    img_size = int(MODULE_DEFS[0]["height"])
    in_ch = int(MODULE_DEFS[0]["channels"])
    x = jax.random.normal(xkey, (2, in_ch, img_size, img_size), jnp.float32)  # NCHW like PyTorch

    fwd = jax.jit(lambda xx: darknet_forward(xx, MODULE_DEFS, params))
    out = jax.block_until_ready(fwd(x))

    # two YOLO heads: 3 anchors * (4*4 + 8*8) cells, 8 box coords + 1 conf + 2 classes
    assert out.shape == (2, 3 * 4 * 4 + 3 * 8 * 8, 11), out.shape
    assert bool(jnp.all(jnp.isfinite(out)))
    print("KERNEL_OK")
</pallas_src>

<mosaic_0001>
module attributes {stable_mosaic.version = 11 : i64} {
  func.func @_conv_mm_kernel(%arg0: i32, %arg1: memref<2048x36xbf16, #tpu.memory_space<vmem>>, %arg2: memref<36x128xbf16, #tpu.memory_space<vmem>>, %arg3: memref<1x128xf32, #tpu.memory_space<vmem>>, %arg4: memref<2048x128xbf16, #tpu.memory_space<vmem>>) attributes {dimension_semantics = [#tpu.dimension_semantics<parallel>], iteration_bounds = array<i64: 1>, scalar_prefetch = 0 : i64, scratch_operands = 0 : i64, tpu.core_type = #tpu.core_type<tc>, window_params = [{transform_indices = @transform_0, window_bounds = array<i64: 2048, 36>}, {pipeline_mode = #tpu.pipeline_mode<synchronous>, transform_indices = @transform_1, window_bounds = array<i64: 36, 128>}, {pipeline_mode = #tpu.pipeline_mode<synchronous>, transform_indices = @transform_2, window_bounds = array<i64: 1, 128>}, {transform_indices = @transform_3, window_bounds = array<i64: 2048, 128>}]} {
    %c0 = arith.constant 0 : index
    %c0_0 = arith.constant 0 : index
    %0 = vector.load %arg1[%c0, %c0_0] : memref<2048x36xbf16, #tpu.memory_space<vmem>>, vector<2048x36xbf16>
    %c0_1 = arith.constant 0 : index
    %c0_2 = arith.constant 0 : index
    %1 = vector.load %arg2[%c0_1, %c0_2] : memref<36x128xbf16, #tpu.memory_space<vmem>>, vector<36x128xbf16>
    %cst = arith.constant dense<0.000000e+00> : vector<2048x128xf32>
    %2 = tpu.matmul %0, %1, %cst {dimension_numbers = #tpu.dot_dimension_numbers<[1], [0], [0], [1], [0, 0, 1, 1], [], []>} : vector<2048x36xbf16>, vector<36x128xbf16>, vector<2048x128xf32> -> vector<2048x128xf32>
    %c0_3 = arith.constant 0 : index
    %c0_4 = arith.constant 0 : index
    %3 = vector.load %arg3[%c0_3, %c0_4] : memref<1x128xf32, #tpu.memory_space<vmem>>, vector<1x128xf32>
    %4 = vector.broadcast %3 : vector<1x128xf32> to vector<2048x128xf32>
    %5 = arith.addf %2, %4 : vector<2048x128xf32>
    %cst_5 = arith.constant 0.000000e+00 : f32
    %6 = vector.broadcast %cst_5 : f32 to vector<2048x128xf32>
    %7 = arith.cmpf ogt, %5, %6 : vector<2048x128xf32>
    %cst_6 = arith.constant 1.000000e-01 : f32
    %8 = vector.broadcast %cst_6 : f32 to vector<2048x128xf32>
    %9 = arith.mulf %8, %5 : vector<2048x128xf32>
    %10 = arith.select %7, %5, %9 : vector<2048x128xi1>, vector<2048x128xf32>
    %11 = arith.truncf %10 : vector<2048x128xf32> to vector<2048x128xbf16>
    %c0_7 = arith.constant 0 : index
    %c0_8 = arith.constant 0 : index
    %12 = vector.load %arg4[%c0_7, %c0_8] : memref<2048x128xbf16, #tpu.memory_space<vmem>>, vector<2048x128xbf16>
    tpu.vector_store %arg4[%c0_7, %c0_8], %11 {strides = array<i32>} : memref<2048x128xbf16, #tpu.memory_space<vmem>>, vector<2048x128xbf16>,
    return
  }
  func.func @transform_0(%arg0: i32) -> (i32, i32) {
    %c0_i32 = arith.constant 0 : i32
    %c0_i32_0 = arith.constant 0 : i32
    return %arg0, %c0_i32 : i32, i32
  }
  func.func @transform_1(%arg0: i32) -> (i32, i32) {
    %c0_i32 = arith.constant 0 : i32
    %c0_i32_0 = arith.constant 0 : i32
    %c0_i32_1 = arith.constant 0 : i32
    return %c0_i32, %c0_i32_0 : i32, i32
  }
  func.func @transform_2(%arg0: i32) -> (i32, i32) {
    %c0_i32 = arith.constant 0 : i32
    %c0_i32_0 = arith.constant 0 : i32
    %c0_i32_1 = arith.constant 0 : i32
    return %c0_i32, %c0_i32_0 : i32, i32
  }
  func.func @transform_3(%arg0: i32) -> (i32, i32) {
    %c0_i32 = arith.constant 0 : i32
    %c0_i32_0 = arith.constant 0 : i32
    return %arg0, %c0_i32 : i32, i32
  }
}

module attributes {stable_mosaic.version = 11 : i64} {
  func.func @_conv_mm_kernel(%arg0: i32, %arg1: memref<512x72xbf16, #tpu.memory_space<vmem>>, %arg2: memref<72x128xbf16, #tpu.memory_space<vmem>>, %arg3: memref<1x128xf32, #tpu.memory_space<vmem>>, %arg4: memref<512x128xbf16, #tpu.memory_space<vmem>>) attributes {dimension_semantics = [#tpu.dimension_semantics<parallel>], iteration_bounds = array<i64: 1>, scalar_prefetch = 0 : i64, scratch_operands = 0 : i64, tpu.core_type = #tpu.core_type<tc>, window_params = [{transform_indices = @transform_0, window_bounds = array<i64: 512, 72>}, {pipeline_mode = #tpu.pipeline_mode<synchronous>, transform_indices = @transform_1, window_bounds = array<i64: 72, 128>}, {pipeline_mode = #tpu.pipeline_mode<synchronous>, transform_indices = @transform_2, window_bounds = array<i64: 1, 128>}, {transform_indices = @transform_3, window_bounds = array<i64: 512, 128>}]} {
    %c0 = arith.constant 0 : index
    %c0_0 = arith.constant 0 : index
    %0 = vector.load %arg1[%c0, %c0_0] : memref<512x72xbf16, #tpu.memory_space<vmem>>, vector<512x72xbf16>
    %c0_1 = arith.constant 0 : index
    %c0_2 = arith.constant 0 : index
    %1 = vector.load %arg2[%c0_1, %c0_2] : memref<72x128xbf16, #tpu.memory_space<vmem>>, vector<72x128xbf16>
    %cst = arith.constant dense<0.000000e+00> : vector<512x128xf32>
    %2 = tpu.matmul %0, %1, %cst {dimension_numbers = #tpu.dot_dimension_numbers<[1], [0], [0], [1], [0, 0, 1, 1], [], []>} : vector<512x72xbf16>, vector<72x128xbf16>, vector<512x128xf32> -> vector<512x128xf32>
    %c0_3 = arith.constant 0 : index
    %c0_4 = arith.constant 0 : index
    %3 = vector.load %arg3[%c0_3, %c0_4] : memref<1x128xf32, #tpu.memory_space<vmem>>, vector<1x128xf32>
    %4 = vector.broadcast %3 : vector<1x128xf32> to vector<512x128xf32>
    %5 = arith.addf %2, %4 : vector<512x128xf32>
    %cst_5 = arith.constant 0.000000e+00 : f32
    %6 = vector.broadcast %cst_5 : f32 to vector<512x128xf32>
    %7 = arith.cmpf ogt, %5, %6 : vector<512x128xf32>
    %cst_6 = arith.constant 1.000000e-01 : f32
    %8 = vector.broadcast %cst_6 : f32 to vector<512x128xf32>
    %9 = arith.mulf %8, %5 : vector<512x128xf32>
    %10 = arith.select %7, %5, %9 : vector<512x128xi1>, vector<512x128xf32>
    %11 = arith.truncf %10 : vector<512x128xf32> to vector<512x128xbf16>
    %c0_7 = arith.constant 0 : index
    %c0_8 = arith.constant 0 : index
    %12 = vector.load %arg4[%c0_7, %c0_8] : memref<512x128xbf16, #tpu.memory_space<vmem>>, vector<512x128xbf16>
    tpu.vector_store %arg4[%c0_7, %c0_8], %11 {strides = array<i32>} : memref<512x128xbf16, #tpu.memory_space<vmem>>, vector<512x128xbf16>,
    return
  }
  func.func @transform_0(%arg0: i32) -> (i32, i32) {
    %c0_i32 = arith.constant 0 : i32
    %c0_i32_0 = arith.constant 0 : i32
    return %arg0, %c0_i32 : i32, i32
  }
  func.func @transform_1(%arg0: i32) -> (i32, i32) {
    %c0_i32 = arith.constant 0 : i32
    %c0_i32_0 = arith.constant 0 : i32
    %c0_i32_1 = arith.constant 0 : i32
    return %c0_i32, %c0_i32_0 : i32, i32
  }
  func.func @transform_2(%arg0: i32) -> (i32, i32) {
    %c0_i32 = arith.constant 0 : i32
    %c0_i32_0 = arith.constant 0 : i32
    %c0_i32_1 = arith.constant 0 : i32
    return %c0_i32, %c0_i32_0 : i32, i32
  }
  func.func @transform_3(%arg0: i32) -> (i32, i32) {
    %c0_i32 = arith.constant 0 : i32
    %c0_i32_0 = arith.constant 0 : i32
    return %arg0, %c0_i32 : i32, i32
  }
}

module attributes {stable_mosaic.version = 11 : i64} {
  func.func @_conv_mm_kernel(%arg0: i32, %arg1: memref<512x16xbf16, #tpu.memory_space<vmem>>, %arg2: memref<16x128xbf16, #tpu.memory_space<vmem>>, %arg3: memref<1x128xf32, #tpu.memory_space<vmem>>, %arg4: memref<512x128xbf16, #tpu.memory_space<vmem>>, %arg5: memref<512x128xbf16, #tpu.memory_space<vmem>>) attributes {dimension_semantics = [#tpu.dimension_semantics<parallel>], iteration_bounds = array<i64: 1>, scalar_prefetch = 0 : i64, scratch_operands = 0 : i64, tpu.core_type = #tpu.core_type<tc>, window_params = [{transform_indices = @transform_0, window_bounds = array<i64: 512, 16>}, {pipeline_mode = #tpu.pipeline_mode<synchronous>, transform_indices = @transform_1, window_bounds = array<i64: 16, 128>}, {pipeline_mode = #tpu.pipeline_mode<synchronous>, transform_indices = @transform_2, window_bounds = array<i64: 1, 128>}, {transform_indices = @transform_3, window_bounds = array<i64: 512, 128>}, {transform_indices = @transform_4, window_bounds = array<i64: 512, 128>}]} {
    %c0 = arith.constant 0 : index
    %c0_0 = arith.constant 0 : index
    %0 = vector.load %arg1[%c0, %c0_0] : memref<512x16xbf16, #tpu.memory_space<vmem>>, vector<512x16xbf16>
    %c0_1 = arith.constant 0 : index
    %c0_2 = arith.constant 0 : index
    %1 = vector.load %arg2[%c0_1, %c0_2] : memref<16x128xbf16, #tpu.memory_space<vmem>>, vector<16x128xbf16>
    %cst = arith.constant dense<0.000000e+00> : vector<512x128xf32>
    %2 = tpu.matmul %0, %1, %cst {dimension_numbers = #tpu.dot_dimension_numbers<[1], [0], [0], [1], [0, 0, 1, 1], [], []>} : vector<512x16xbf16>, vector<16x128xbf16>, vector<512x128xf32> -> vector<512x128xf32>
    %c0_3 = arith.constant 0 : index
    %c0_4 = arith.constant 0 : index
    %3 = vector.load %arg3[%c0_3, %c0_4] : memref<1x128xf32, #tpu.memory_space<vmem>>, vector<1x128xf32>
    %4 = vector.broadcast %3 : vector<1x128xf32> to vector<512x128xf32>
    %5 = arith.addf %2, %4 : vector<512x128xf32>
    %cst_5 = arith.constant 0.000000e+00 : f32
    %6 = vector.broadcast %cst_5 : f32 to vector<512x128xf32>
    %7 = arith.cmpf ogt, %5, %6 : vector<512x128xf32>
    %cst_6 = arith.constant 1.000000e-01 : f32
    %8 = vector.broadcast %cst_6 : f32 to vector<512x128xf32>
    %9 = arith.mulf %8, %5 : vector<512x128xf32>
    %10 = arith.select %7, %5, %9 : vector<512x128xi1>, vector<512x128xf32>
    %c0_7 = arith.constant 0 : index
    %c0_8 = arith.constant 0 : index
    %11 = vector.load %arg4[%c0_7, %c0_8] : memref<512x128xbf16, #tpu.memory_space<vmem>>, vector<512x128xbf16>
    %12 = arith.extf %11 : vector<512x128xbf16> to vector<512x128xf32>
    %13 = arith.addf %10, %12 : vector<512x128xf32>
    %14 = arith.truncf %13 : vector<512x128xf32> to vector<512x128xbf16>
    %c0_9 = arith.constant 0 : index
    %c0_10 = arith.constant 0 : index
    %15 = vector.load %arg5[%c0_9, %c0_10] : memref<512x128xbf16, #tpu.memory_space<vmem>>, vector<512x128xbf16>
    tpu.vector_store %arg5[%c0_9, %c0_10], %14 {strides = array<i32>} : memref<512x128xbf16, #tpu.memory_space<vmem>>, vector<512x128xbf16>,
    return
  }
  func.func @transform_0(%arg0: i32) -> (i32, i32) {
    %c0_i32 = arith.constant 0 : i32
    %c0_i32_0 = arith.constant 0 : i32
    return %arg0, %c0_i32 : i32, i32
  }
  func.func @transform_1(%arg0: i32) -> (i32, i32) {
    %c0_i32 = arith.constant 0 : i32
    %c0_i32_0 = arith.constant 0 : i32
    %c0_i32_1 = arith.constant 0 : i32
    return %c0_i32, %c0_i32_0 : i32, i32
  }
  func.func @transform_2(%arg0: i32) -> (i32, i32) {
    %c0_i32 = arith.constant 0 : i32
    %c0_i32_0 = arith.constant 0 : i32
    %c0_i32_1 = arith.constant 0 : i32
    return %c0_i32, %c0_i32_0 : i32, i32
  }
  func.func @transform_3(%arg0: i32) -> (i32, i32) {
    %c0_i32 = arith.constant 0 : i32
    %c0_i32_0 = arith.constant 0 : i32
    return %arg0, %c0_i32 : i32, i32
  }
  func.func @transform_4(%arg0: i32) -> (i32, i32) {
    %c0_i32 = arith.constant 0 : i32
    %c0_i32_0 = arith.constant 0 : i32
    return %arg0, %c0_i32 : i32, i32
  }
}

module attributes {stable_mosaic.version = 11 : i64} {
  func.func @_conv_mm_kernel(%arg0: i32, %arg1: memref<128x144xbf16, #tpu.memory_space<vmem>>, %arg2: memref<144x128xbf16, #tpu.memory_space<vmem>>, %arg3: memref<1x128xf32, #tpu.memory_space<vmem>>, %arg4: memref<128x128xbf16, #tpu.memory_space<vmem>>) attributes {dimension_semantics = [#tpu.dimension_semantics<parallel>], iteration_bounds = array<i64: 1>, scalar_prefetch = 0 : i64, scratch_operands = 0 : i64, tpu.core_type = #tpu.core_type<tc>, window_params = [{transform_indices = @transform_0, window_bounds = array<i64: 128, 144>}, {pipeline_mode = #tpu.pipeline_mode<synchronous>, transform_indices = @transform_1, window_bounds = array<i64: 144, 128>}, {pipeline_mode = #tpu.pipeline_mode<synchronous>, transform_indices = @transform_2, window_bounds = array<i64: 1, 128>}, {transform_indices = @transform_3, window_bounds = array<i64: 128, 128>}]} {
    %c0 = arith.constant 0 : index
    %c0_0 = arith.constant 0 : index
    %0 = vector.load %arg1[%c0, %c0_0] : memref<128x144xbf16, #tpu.memory_space<vmem>>, vector<128x144xbf16>
    %c0_1 = arith.constant 0 : index
    %c0_2 = arith.constant 0 : index
    %1 = vector.load %arg2[%c0_1, %c0_2] : memref<144x128xbf16, #tpu.memory_space<vmem>>, vector<144x128xbf16>
    %cst = arith.constant dense<0.000000e+00> : vector<128x128xf32>
    %2 = tpu.matmul %0, %1, %cst {dimension_numbers = #tpu.dot_dimension_numbers<[1], [0], [0], [1], [0, 0, 1, 1], [], []>} : vector<128x144xbf16>, vector<144x128xbf16>, vector<128x128xf32> -> vector<128x128xf32>
    %c0_3 = arith.constant 0 : index
    %c0_4 = arith.constant 0 : index
    %3 = vector.load %arg3[%c0_3, %c0_4] : memref<1x128xf32, #tpu.memory_space<vmem>>, vector<1x128xf32>
    %4 = vector.broadcast %3 : vector<1x128xf32> to vector<128x128xf32>
    %5 = arith.addf %2, %4 : vector<128x128xf32>
    %cst_5 = arith.constant 0.000000e+00 : f32
    %6 = vector.broadcast %cst_5 : f32 to vector<128x128xf32>
    %7 = arith.cmpf ogt, %5, %6 : vector<128x128xf32>
    %cst_6 = arith.constant 1.000000e-01 : f32
    %8 = vector.broadcast %cst_6 : f32 to vector<128x128xf32>
    %9 = arith.mulf %8, %5 : vector<128x128xf32>
    %10 = arith.select %7, %5, %9 : vector<128x128xi1>, vector<128x128xf32>
    %11 = arith.truncf %10 : vector<128x128xf32> to vector<128x128xbf16>
    %c0_7 = arith.constant 0 : index
    %c0_8 = arith.constant 0 : index
    %12 = vector.load %arg4[%c0_7, %c0_8] : memref<128x128xbf16, #tpu.memory_space<vmem>>, vector<128x128xbf16>
    tpu.vector_store %arg4[%c0_7, %c0_8], %11 {strides = array<i32>} : memref<128x128xbf16, #tpu.memory_space<vmem>>, vector<128x128xbf16>,
    return
  }
  func.func @transform_0(%arg0: i32) -> (i32, i32) {
    %c0_i32 = arith.constant 0 : i32
    %c0_i32_0 = arith.constant 0 : i32
    return %arg0, %c0_i32 : i32, i32
  }
  func.func @transform_1(%arg0: i32) -> (i32, i32) {
    %c0_i32 = arith.constant 0 : i32
    %c0_i32_0 = arith.constant 0 : i32
    %c0_i32_1 = arith.constant 0 : i32
    return %c0_i32, %c0_i32_0 : i32, i32
  }
  func.func @transform_2(%arg0: i32) -> (i32, i32) {
    %c0_i32 = arith.constant 0 : i32
    %c0_i32_0 = arith.constant 0 : i32
    %c0_i32_1 = arith.constant 0 : i32
    return %c0_i32, %c0_i32_0 : i32, i32
  }
  func.func @transform_3(%arg0: i32) -> (i32, i32) {
    %c0_i32 = arith.constant 0 : i32
    %c0_i32_0 = arith.constant 0 : i32
    return %arg0, %c0_i32 : i32, i32
  }
}

module attributes {stable_mosaic.version = 11 : i64} {
  func.func @_conv_mm_kernel(%arg0: i32, %arg1: memref<32x288xbf16, #tpu.memory_space<vmem>>, %arg2: memref<288x128xbf16, #tpu.memory_space<vmem>>, %arg3: memref<1x128xf32, #tpu.memory_space<vmem>>, %arg4: memref<32x128xbf16, #tpu.memory_space<vmem>>) attributes {dimension_semantics = [#tpu.dimension_semantics<parallel>], iteration_bounds = array<i64: 1>, scalar_prefetch = 0 : i64, scratch_operands = 0 : i64, tpu.core_type = #tpu.core_type<tc>, window_params = [{transform_indices = @transform_0, window_bounds = array<i64: 32, 288>}, {pipeline_mode = #tpu.pipeline_mode<synchronous>, transform_indices = @transform_1, window_bounds = array<i64: 288, 128>}, {pipeline_mode = #tpu.pipeline_mode<synchronous>, transform_indices = @transform_2, window_bounds = array<i64: 1, 128>}, {transform_indices = @transform_3, window_bounds = array<i64: 32, 128>}]} {
    %c0 = arith.constant 0 : index
    %c0_0 = arith.constant 0 : index
    %0 = vector.load %arg1[%c0, %c0_0] : memref<32x288xbf16, #tpu.memory_space<vmem>>, vector<32x288xbf16>
    %c0_1 = arith.constant 0 : index
    %c0_2 = arith.constant 0 : index
    %1 = vector.load %arg2[%c0_1, %c0_2] : memref<288x128xbf16, #tpu.memory_space<vmem>>, vector<288x128xbf16>
    %cst = arith.constant dense<0.000000e+00> : vector<32x128xf32>
    %2 = tpu.matmul %0, %1, %cst {dimension_numbers = #tpu.dot_dimension_numbers<[1], [0], [0], [1], [0, 0, 1, 1], [], []>} : vector<32x288xbf16>, vector<288x128xbf16>, vector<32x128xf32> -> vector<32x128xf32>
    %c0_3 = arith.constant 0 : index
    %c0_4 = arith.constant 0 : index
    %3 = vector.load %arg3[%c0_3, %c0_4] : memref<1x128xf32, #tpu.memory_space<vmem>>, vector<1x128xf32>
    %4 = vector.broadcast %3 : vector<1x128xf32> to vector<32x128xf32>
    %5 = arith.addf %2, %4 : vector<32x128xf32>
    %cst_5 = arith.constant 0.000000e+00 : f32
    %6 = vector.broadcast %cst_5 : f32 to vector<32x128xf32>
    %7 = arith.cmpf ogt, %5, %6 : vector<32x128xf32>
    %cst_6 = arith.constant 1.000000e-01 : f32
    %8 = vector.broadcast %cst_6 : f32 to vector<32x128xf32>
    %9 = arith.mulf %8, %5 : vector<32x128xf32>
    %10 = arith.select %7, %5, %9 : vector<32x128xi1>, vector<32x128xf32>
    %11 = arith.truncf %10 : vector<32x128xf32> to vector<32x128xbf16>
    %c0_7 = arith.constant 0 : index
    %c0_8 = arith.constant 0 : index
    %12 = vector.load %arg4[%c0_7, %c0_8] : memref<32x128xbf16, #tpu.memory_space<vmem>>, vector<32x128xbf16>
    tpu.vector_store %arg4[%c0_7, %c0_8], %11 {strides = array<i32>} : memref<32x128xbf16, #tpu.memory_space<vmem>>, vector<32x128xbf16>,
    return
  }
  func.func @transform_0(%arg0: i32) -> (i32, i32) {
    %c0_i32 = arith.constant 0 : i32
    %c0_i32_0 = arith.constant 0 : i32
    return %arg0, %c0_i32 : i32, i32
  }
  func.func @transform_1(%arg0: i32) -> (i32, i32) {
    %c0_i32 = arith.constant 0 : i32
    %c0_i32_0 = arith.constant 0 : i32
    %c0_i32_1 = arith.constant 0 : i32
    return %c0_i32, %c0_i32_0 : i32, i32
  }
  func.func @transform_2(%arg0: i32) -> (i32, i32) {
    %c0_i32 = arith.constant 0 : i32
    %c0_i32_0 = arith.constant 0 : i32
    %c0_i32_1 = arith.constant 0 : i32
    return %c0_i32, %c0_i32_0 : i32, i32
  }
  func.func @transform_3(%arg0: i32) -> (i32, i32) {
    %c0_i32 = arith.constant 0 : i32
    %c0_i32_0 = arith.constant 0 : i32
    return %arg0, %c0_i32 : i32, i32
  }
}

module attributes {stable_mosaic.version = 11 : i64} {
  func.func @_upsample2_kernel(%arg0: memref<2x4x4x32xbf16, #tpu.memory_space<vmem>>, %arg1: memref<2x8x4x64xbf16, #tpu.memory_space<vmem>>) attributes {dimension_semantics = [], scalar_prefetch = 0 : i64, scratch_operands = 0 : i64, tpu.core_type = #tpu.core_type<tc>} {
    %c0 = arith.constant 0 : index
    %c0_0 = arith.constant 0 : index
    %c0_1 = arith.constant 0 : index
    %c0_2 = arith.constant 0 : index
    %0 = vector.load %arg0[%c0, %c0_0, %c0_1, %c0_2] : memref<2x4x4x32xbf16, #tpu.memory_space<vmem>>, vector<2x4x4x32xbf16>
    %1 = tpu.concatenate %0, %0 in 3 : vector<2x4x4x32xbf16>, vector<2x4x4x32xbf16> -> vector<2x4x4x64xbf16>
    %2 = vector.shape_cast %1 : vector<2x4x4x64xbf16> to vector<2x4x1x4x64xbf16>
    %3 = vector.broadcast %2 : vector<2x4x1x4x64xbf16> to vector<2x4x2x4x64xbf16>
    %4 = vector.shape_cast %3 : vector<2x4x2x4x64xbf16> to vector<2x8x4x64xbf16>
    %c0_3 = arith.constant 0 : index
    %c0_4 = arith.constant 0 : index
    %c0_5 = arith.constant 0 : index
    %c0_6 = arith.constant 0 : index
    %5 = vector.load %arg1[%c0_3, %c0_4, %c0_5, %c0_6] : memref<2x8x4x64xbf16, #tpu.memory_space<vmem>>, vector<2x8x4x64xbf16>
    tpu.vector_store %arg1[%c0_3, %c0_4, %c0_5, %c0_6], %4 {strides = array<i32>} : memref<2x8x4x64xbf16, #tpu.memory_space<vmem>>, vector<2x8x4x64xbf16>,
    return
  }
}

module attributes {stable_mosaic.version = 11 : i64} {
  func.func @_conv_mm_kernel(%arg0: i32, %arg1: memref<128x64xbf16, #tpu.memory_space<vmem>>, %arg2: memref<64x128xbf16, #tpu.memory_space<vmem>>, %arg3: memref<1x128xf32, #tpu.memory_space<vmem>>, %arg4: memref<128x128xf32, #tpu.memory_space<vmem>>) attributes {dimension_semantics = [#tpu.dimension_semantics<parallel>], iteration_bounds = array<i64: 1>, scalar_prefetch = 0 : i64, scratch_operands = 0 : i64, tpu.core_type = #tpu.core_type<tc>, window_params = [{transform_indices = @transform_0, window_bounds = array<i64: 128, 64>}, {pipeline_mode = #tpu.pipeline_mode<synchronous>, transform_indices = @transform_1, window_bounds = array<i64: 64, 128>}, {pipeline_mode = #tpu.pipeline_mode<synchronous>, transform_indices = @transform_2, window_bounds = array<i64: 1, 128>}, {transform_indices = @transform_3, window_bounds = array<i64: 128, 128>}]} {
    %c0 = arith.constant 0 : index
    %c0_0 = arith.constant 0 : index
    %0 = vector.load %arg1[%c0, %c0_0] : memref<128x64xbf16, #tpu.memory_space<vmem>>, vector<128x64xbf16>
    %c0_1 = arith.constant 0 : index
    %c0_2 = arith.constant 0 : index
    %1 = vector.load %arg2[%c0_1, %c0_2] : memref<64x128xbf16, #tpu.memory_space<vmem>>, vector<64x128xbf16>
    %cst = arith.constant dense<0.000000e+00> : vector<128x128xf32>
    %2 = tpu.matmul %0, %1, %cst {dimension_numbers = #tpu.dot_dimension_numbers<[1], [0], [0], [1], [0, 0, 1, 1], [], []>} : vector<128x64xbf16>, vector<64x128xbf16>, vector<128x128xf32> -> vector<128x128xf32>
    %c0_3 = arith.constant 0 : index
    %c0_4 = arith.constant 0 : index
    %3 = vector.load %arg3[%c0_3, %c0_4] : memref<1x128xf32, #tpu.memory_space<vmem>>, vector<1x128xf32>
    %4 = vector.broadcast %3 : vector<1x128xf32> to vector<128x128xf32>
    %5 = arith.addf %2, %4 : vector<128x128xf32>
    %c0_5 = arith.constant 0 : index
    %c0_6 = arith.constant 0 : index
    %6 = vector.load %arg4[%c0_5, %c0_6] : memref<128x128xf32, #tpu.memory_space<vmem>>, vector<128x128xf32>
    tpu.vector_store %arg4[%c0_5, %c0_6], %5 {strides = array<i32>} : memref<128x128xf32, #tpu.memory_space<vmem>>, vector<128x128xf32>,
    return
  }
  func.func @transform_0(%arg0: i32) -> (i32, i32) {
    %c0_i32 = arith.constant 0 : i32
    %c0_i32_0 = arith.constant 0 : i32
    return %arg0, %c0_i32 : i32, i32
  }
  func.func @transform_1(%arg0: i32) -> (i32, i32) {
    %c0_i32 = arith.constant 0 : i32
    %c0_i32_0 = arith.constant 0 : i32
    %c0_i32_1 = arith.constant 0 : i32
    return %c0_i32, %c0_i32_0 : i32, i32
  }
  func.func @transform_2(%arg0: i32) -> (i32, i32) {
    %c0_i32 = arith.constant 0 : i32
    %c0_i32_0 = arith.constant 0 : i32
    %c0_i32_1 = arith.constant 0 : i32
    return %c0_i32, %c0_i32_0 : i32, i32
  }
  func.func @transform_3(%arg0: i32) -> (i32, i32) {
    %c0_i32 = arith.constant 0 : i32
    %c0_i32_0 = arith.constant 0 : i32
    return %arg0, %c0_i32 : i32, i32
  }
}

module attributes {stable_mosaic.version = 11 : i64} {
  func.func @_yolo_kernel(%arg0: memref<11x384xf32, #tpu.memory_space<vmem>>, %arg1: memref<11x384xf32, #tpu.memory_space<vmem>>, %arg2: memref<11x384xf32, #tpu.memory_space<vmem>>) attributes {dimension_semantics = [], scalar_prefetch = 0 : i64, scratch_operands = 0 : i64, tpu.core_type = #tpu.core_type<tc>} {
    %c0 = arith.constant 0 : index
    %c0_0 = arith.constant 0 : index
    %0 = vector.load %arg0[%c0, %c0_0] : memref<11x384xf32, #tpu.memory_space<vmem>>, vector<11x384xf32>
    %1 = tpu.iota {dimensions = array<i32: 0>} : vector<11x384xi32>
    %c0_1 = arith.constant 0 : index
    %c0_2 = arith.constant 0 : index
    %2 = vector.load %arg1[%c0_1, %c0_2] : memref<11x384xf32, #tpu.memory_space<vmem>>, vector<11x384xf32>
    %3 = arith.addf %0, %2 : vector<11x384xf32>
    %cst = arith.constant 8.000000e+00 : f32
    %4 = vector.broadcast %cst : f32 to vector<11x384xf32>
    %5 = arith.mulf %3, %4 : vector<11x384xf32>
    %c8_i32 = arith.constant 8 : i32
    %6 = vector.broadcast %c8_i32 : i32 to vector<11x384xi32>
    %7 = arith.cmpi slt, %1, %6 : vector<11x384xi32>
    %c8_i32_3 = arith.constant 8 : i32
    %8 = vector.broadcast %c8_i32_3 : i32 to vector<11x384xi32>
    %9 = arith.cmpi eq, %1, %8 : vector<11x384xi32>
    %10 = arith.negf %0 : vector<11x384xf32>
    %11 = math.exp %10 : vector<11x384xf32>
    %cst_4 = arith.constant 1.000000e+00 : f32
    %12 = vector.broadcast %cst_4 : f32 to vector<11x384xf32>
    %13 = arith.addf %12, %11 : vector<11x384xf32>
    %14 = arith.divf %12, %13 : vector<11x384xf32>
    %15 = arith.select %9, %14, %0 : vector<11x384xi1>, vector<11x384xf32>
    %16 = arith.select %7, %5, %15 : vector<11x384xi1>, vector<11x384xf32>
    %c0_5 = arith.constant 0 : index
    %c0_6 = arith.constant 0 : index
    %17 = vector.load %arg2[%c0_5, %c0_6] : memref<11x384xf32, #tpu.memory_space<vmem>>, vector<11x384xf32>
    tpu.vector_store %arg2[%c0_5, %c0_6], %16 {strides = array<i32>} : memref<11x384xf32, #tpu.memory_space<vmem>>, vector<11x384xf32>,
    return
  }
}

module attributes {stable_mosaic.version = 11 : i64} {
  func.func @_conv_mm_kernel(%arg0: i32, %arg1: memref<32x32xbf16, #tpu.memory_space<vmem>>, %arg2: memref<32x128xbf16, #tpu.memory_space<vmem>>, %arg3: memref<1x128xf32, #tpu.memory_space<vmem>>, %arg4: memref<32x128xf32, #tpu.memory_space<vmem>>) attributes {dimension_semantics = [#tpu.dimension_semantics<parallel>], iteration_bounds = array<i64: 1>, scalar_prefetch = 0 : i64, scratch_operands = 0 : i64, tpu.core_type = #tpu.core_type<tc>, window_params = [{transform_indices = @transform_0, window_bounds = array<i64: 32, 32>}, {pipeline_mode = #tpu.pipeline_mode<synchronous>, transform_indices = @transform_1, window_bounds = array<i64: 32, 128>}, {pipeline_mode = #tpu.pipeline_mode<synchronous>, transform_indices = @transform_2, window_bounds = array<i64: 1, 128>}, {transform_indices = @transform_3, window_bounds = array<i64: 32, 128>}]} {
    %c0 = arith.constant 0 : index
    %c0_0 = arith.constant 0 : index
    %0 = vector.load %arg1[%c0, %c0_0] : memref<32x32xbf16, #tpu.memory_space<vmem>>, vector<32x32xbf16>
    %c0_1 = arith.constant 0 : index
    %c0_2 = arith.constant 0 : index
    %1 = vector.load %arg2[%c0_1, %c0_2] : memref<32x128xbf16, #tpu.memory_space<vmem>>, vector<32x128xbf16>
    %cst = arith.constant dense<0.000000e+00> : vector<32x128xf32>
    %2 = tpu.matmul %0, %1, %cst {dimension_numbers = #tpu.dot_dimension_numbers<[1], [0], [0], [1], [0, 0, 1, 1], [], []>} : vector<32x32xbf16>, vector<32x128xbf16>, vector<32x128xf32> -> vector<32x128xf32>
    %c0_3 = arith.constant 0 : index
    %c0_4 = arith.constant 0 : index
    %3 = vector.load %arg3[%c0_3, %c0_4] : memref<1x128xf32, #tpu.memory_space<vmem>>, vector<1x128xf32>
    %4 = vector.broadcast %3 : vector<1x128xf32> to vector<32x128xf32>
    %5 = arith.addf %2, %4 : vector<32x128xf32>
    %c0_5 = arith.constant 0 : index
    %c0_6 = arith.constant 0 : index
    %6 = vector.load %arg4[%c0_5, %c0_6] : memref<32x128xf32, #tpu.memory_space<vmem>>, vector<32x128xf32>
    tpu.vector_store %arg4[%c0_5, %c0_6], %5 {strides = array<i32>} : memref<32x128xf32, #tpu.memory_space<vmem>>, vector<32x128xf32>,
    return
  }
  func.func @transform_0(%arg0: i32) -> (i32, i32) {
    %c0_i32 = arith.constant 0 : i32
    %c0_i32_0 = arith.constant 0 : i32
    return %arg0, %c0_i32 : i32, i32
  }
  func.func @transform_1(%arg0: i32) -> (i32, i32) {
    %c0_i32 = arith.constant 0 : i32
    %c0_i32_0 = arith.constant 0 : i32
    %c0_i32_1 = arith.constant 0 : i32
    return %c0_i32, %c0_i32_0 : i32, i32
  }
  func.func @transform_2(%arg0: i32) -> (i32, i32) {
    %c0_i32 = arith.constant 0 : i32
    %c0_i32_0 = arith.constant 0 : i32
    %c0_i32_1 = arith.constant 0 : i32
    return %c0_i32, %c0_i32_0 : i32, i32
  }
  func.func @transform_3(%arg0: i32) -> (i32, i32) {
    %c0_i32 = arith.constant 0 : i32
    %c0_i32_0 = arith.constant 0 : i32
    return %arg0, %c0_i32 : i32, i32
  }
}

module attributes {stable_mosaic.version = 11 : i64} {
  func.func @_yolo_kernel(%arg0: memref<11x96xf32, #tpu.memory_space<vmem>>, %arg1: memref<11x96xf32, #tpu.memory_space<vmem>>, %arg2: memref<11x96xf32, #tpu.memory_space<vmem>>) attributes {dimension_semantics = [], scalar_prefetch = 0 : i64, scratch_operands = 0 : i64, tpu.core_type = #tpu.core_type<tc>} {
    %c0 = arith.constant 0 : index
    %c0_0 = arith.constant 0 : index
    %0 = vector.load %arg0[%c0, %c0_0] : memref<11x96xf32, #tpu.memory_space<vmem>>, vector<11x96xf32>
    %1 = tpu.iota {dimensions = array<i32: 0>} : vector<11x96xi32>
    %c0_1 = arith.constant 0 : index
    %c0_2 = arith.constant 0 : index
    %2 = vector.load %arg1[%c0_1, %c0_2] : memref<11x96xf32, #tpu.memory_space<vmem>>, vector<11x96xf32>
    %3 = arith.addf %0, %2 : vector<11x96xf32>
    %cst = arith.constant 1.600000e+01 : f32
    %4 = vector.broadcast %cst : f32 to vector<11x96xf32>
    %5 = arith.mulf %3, %4 : vector<11x96xf32>
    %c8_i32 = arith.constant 8 : i32
    %6 = vector.broadcast %c8_i32 : i32 to vector<11x96xi32>
    %7 = arith.cmpi slt, %1, %6 : vector<11x96xi32>
    %c8_i32_3 = arith.constant 8 : i32
    %8 = vector.broadcast %c8_i32_3 : i32 to vector<11x96xi32>
    %9 = arith.cmpi eq, %1, %8 : vector<11x96xi32>
    %10 = arith.negf %0 : vector<11x96xf32>
    %11 = math.exp %10 : vector<11x96xf32>
    %cst_4 = arith.constant 1.000000e+00 : f32
    %12 = vector.broadcast %cst_4 : f32 to vector<11x96xf32>
    %13 = arith.addf %12, %11 : vector<11x96xf32>
    %14 = arith.divf %12, %13 : vector<11x96xf32>
    %15 = arith.select %9, %14, %0 : vector<11x96xi1>, vector<11x96xf32>
    %16 = arith.select %7, %5, %15 : vector<11x96xi1>, vector<11x96xf32>
    %c0_5 = arith.constant 0 : index
    %c0_6 = arith.constant 0 : index
    %17 = vector.load %arg2[%c0_5, %c0_6] : memref<11x96xf32, #tpu.memory_space<vmem>>, vector<11x96xf32>
    tpu.vector_store %arg2[%c0_5, %c0_6], %16 {strides = array<i32>} : memref<11x96xf32, #tpu.memory_space<vmem>>, vector<11x96xf32>,
    return
  }
}

</mosaic_0001>

<bundles_post_ra>
// kernel: _lambda_.10
= control target key start
LH: loop header
LB: loop body
LE: loop exit
PB: predicated region body
PF: predicated region fallthrough
CT: control target
= control target key end

     0   :  { %vm938_vm0 = vcmask 293888   ;;  %vm1323_vm1 = vcmask 1041408   ;;  %s8237_s1 = inlined_call_operand.vmem [shape: bf16[36,128], index: 1, kind: input, shape index: {}]   ;;  %s8238_s0 = inlined_call_operand.vmem [shape: bf16[2048,36], index: 0, kind: input, shape index: {}]   ;;  %s8239_s2 = inlined_call_operand.vmem [shape: f32[1,128], index: 2, kind: input, shape index: {}]   ;;  %s8240_s3 = inlined_call_operand.vmem [shape: bf16[2048,128], index: 3, kind: output, shape index: {}]  }
   0x1   :  { %v6376_v0 = vld [vmem:[%s8237_s1] sm:$0xff]   ;;  %v6377_v1 = vld [vmem:[%s8237_s1 + $0x8] sm:$0xff]   ;;  %v6378_v2 = vld [vmem:[%s8237_s1 + $0x10] ss:$0 sps:$4 sm:$0x33]  }
   0x2   :  { %6106 = vmatprep.subr.bf16.mxu0 %v6376_v0  ;;  %6368 = vmatprep.subr.bf16.mxu1 %v6376_v0  ;;  %v6379_v3 = vld [vmem:[%s8238_s0] sm:$0xff]   ;;  %v1325_v5 = vsel %vm1323_vm1, %v6378_v2, 0  ;;  %v6381_v6 = vld [vmem:[%s8238_s0 + $0x8] sm:$0xff]   ;;  %v6383_v8 = vld [vmem:[%s8238_s0 + $0x10] sm:$0xff]  }
   0x3   :  { %6107 = vmatpush3.bf16.msra.mxu0 %v6376_v0  ;;  %6371 = vmatpush3.bf16.msra.mxu1 %v6376_v0  ;;  %v6380_v4 = vld [vmem:[%s8238_s0 + $0x200] sm:$0xff]   ;;  %v6382_v7 = vld [vmem:[%s8238_s0 + $0x208] sm:$0xff]   ;;  %v6384_v9 = vld [vmem:[%s8238_s0 + $0x210] sm:$0xff]  }
   0x4   :  { %6108 = vmatprep.subr.bf16.mxu0 %v6377_v1  ;;  %6369 = vmatprep.subr.bf16.mxu1 %v6377_v1  ;;  %v6385_v10 = vld [vmem:[%s8238_s0 + $0x18] sm:$0xff]   ;;  %v6387_v12 = vld [vmem:[%s8238_s0 + $0x20] sm:$0xff]   ;;  %v6389_v14 = vld [vmem:[%s8238_s0 + $0x28] sm:$0xff]  }
   0x5   :  { %6112 = vmatprep.mubr.msk.bf16.mxu0 %vm938_vm0, %v6379_v3  ;;  %6240 = vmatprep.mubr.msk.bf16.mxu1 %vm938_vm0, %v6380_v4  ;;  %v6386_v11 = vld [vmem:[%s8238_s0 + $0x218] sm:$0xff]   ;;  %v6388_v13 = vld [vmem:[%s8238_s0 + $0x220] sm:$0xff]   ;;  %v6390_v15 = vld [vmem:[%s8238_s0 + $0x228] sm:$0xff]  }
   0x6   :  { %v6391_v16 = vld [vmem:[%s8238_s0 + $0x30] sm:$0xff]   ;;  %v6393_v18 = vld [vmem:[%s8238_s0 + $0x38] sm:$0xff]   ;;  %v6395_v20 = vld [vmem:[%s8238_s0 + $0x40] sm:$0xff]  }
   0x7   :  { %6109 = vmatpush3.bf16.msra.mxu0 %v6377_v1  ;;  %6372 = vmatpush3.bf16.msra.mxu1 %v6377_v1  ;;  %v6392_v17 = vld [vmem:[%s8238_s0 + $0x230] sm:$0xff]   ;;  %v6394_v19 = vld [vmem:[%s8238_s0 + $0x238] sm:$0xff]   ;;  %v6396_v21 = vld [vmem:[%s8238_s0 + $0x240] sm:$0xff]  }
   0x8   :  { %6374 = vmatprep.subr.msk.bf16.mxu0 %vm1323_vm1, %v6378_v2  ;;  %6375 = vmatprep.subr.msk.bf16.mxu1 %vm1323_vm1, %v6378_v2  ;;  %v6397_v22 = vld [vmem:[%s8238_s0 + $0x48] sm:$0xff]   ;;  %v6399_v24 = vld [vmem:[%s8238_s0 + $0x50] sm:$0xff]   ;;  %v6401_v26 = vld [vmem:[%s8238_s0 + $0x58] sm:$0xff]  }
   0x9   :  { %v6398_v23 = vld [vmem:[%s8238_s0 + $0x248] sm:$0xff]   ;;  %v6400_v25 = vld [vmem:[%s8238_s0 + $0x250] sm:$0xff]   ;;  %v6402_v27 = vld [vmem:[%s8238_s0 + $0x258] sm:$0xff]  }
   0xa   :  { %v6403_v28 = vld [vmem:[%s8238_s0 + $0x60] sm:$0xff]   ;;  %v6405_v30 = vld [vmem:[%s8238_s0 + $0x68] sm:$0xff]   ;;  %v6407_v32 = vld [vmem:[%s8238_s0 + $0x70] sm:$0xff]  }
   0xb   :  { %6111 = vmatpush3.bf16.msra.mxu0 %v1325_v5  ;;  %6373 = vmatpush3.bf16.msra.mxu1 %v1325_v5  ;;  %v6404_v29 = vld [vmem:[%s8238_s0 + $0x260] sm:$0xff]   ;;  %v6406_v31 = vld [vmem:[%s8238_s0 + $0x268] sm:$0xff]   ;;  %v6408_v33 = vld [vmem:[%s8238_s0 + $0x270] sm:$0xff]  }
   0xc   :  { %v6409_v34 = vld [vmem:[%s8238_s0 + $0x78] sm:$0xff]   ;;  %v6411_v36 = vld [vmem:[%s8238_s0 + $0x80] sm:$0xff]   ;;  %v6413_v38 = vld [vmem:[%s8238_s0 + $0x88] sm:$0xff]  }
   0xd   :  { %v6410_v35 = vld [vmem:[%s8238_s0 + $0x278] sm:$0xff]   ;;  %v6412_v37 = vld [vmem:[%s8238_s0 + $0x280] sm:$0xff]   ;;  %v6414_v39 = vld [vmem:[%s8238_s0 + $0x288] sm:$0xff]  }
   0xe   :  { %6113 = vmatmul.mubr.msk.bf16.vlgmr.msra.gmra.mrb[0].mxu0 %vm938_vm0, %v6381_v6  ;;  %6241 = vmatmul.mubr.msk.bf16.vlgmr.msra.gmra.mrb[0].mxu1 %vm938_vm0, %v6382_v7  ;;  %v6415_v40 = vld [vmem:[%s8238_s0 + $0x90] sm:$0xff]   ;;  %v6417_v42 = vld [vmem:[%s8238_s0 + $0x98] sm:$0xff]   ;;  %v6419_v44 = vld [vmem:[%s8238_s0 + $0xa0] sm:$0xff]  }
   0xf   :  { %6116 = vmatprep.mubr.msk.bf16.mxu0 %vm938_vm0, %v6383_v8  ;;  %6244 = vmatprep.mubr.msk.bf16.mxu1 %vm938_vm0, %v6384_v9  ;;  %v6416_v41 = vld [vmem:[%s8238_s0 + $0x290] sm:$0xff]   ;;  %v6418_v43 = vld [vmem:[%s8238_s0 + $0x298] sm:$0xff]   ;;  %v6420_v45 = vld [vmem:[%s8238_s0 + $0x2a0] sm:$0xff]  }
  0x10   :  { %v6421_v46 = vld [vmem:[%s8238_s0 + $0xa8] sm:$0xff]   ;;  %v6423_v48 = vld [vmem:[%s8238_s0 + $0xb0] sm:$0xff]   ;;  %v6425_v50 = vld [vmem:[%s8238_s0 + $0xb8] sm:$0xff]  }
  0x11   :  { %v6422_v47 = vld [vmem:[%s8238_s0 + $0x2a8] sm:$0xff]   ;;  %v6424_v49 = vld [vmem:[%s8238_s0 + $0x2b0] sm:$0xff]   ;;  %v6426_v51 = vld [vmem:[%s8238_s0 + $0x2b8] sm:$0xff]  }
  0x12   :  { %v6427_v52 = vld [vmem:[%s8238_s0 + $0xc0] sm:$0xff]   ;;  %v6429_v54 = vld [vmem:[%s8238_s0 + $0xc8] sm:$0xff]   ;;  %v6431_v56 = vld [vmem:[%s8238_s0 + $0xd0] sm:$0xff]  }
  0x13   :  { %v6428_v53 = vld [vmem:[%s8238_s0 + $0x2c0] sm:$0xff]   ;;  %v6430_v55 = vld [vmem:[%s8238_s0 + $0x2c8] sm:$0xff]   ;;  %v6432_v57 = vld [vmem:[%s8238_s0 + $0x2d0] sm:$0xff]  }
  0x14   :  { %v6433_v58 = vld [vmem:[%s8238_s0 + $0xd8] sm:$0xff]   ;;  %v6435_v60 = vld [vmem:[%s8238_s0 + $0xe0] sm:$0xff]   ;;  %v6437_v62 = vld [vmem:[%s8238_s0 + $0xe8] sm:$0xff]  }
  0x15   :  { %v6434_v59 = vld [vmem:[%s8238_s0 + $0x2d8] sm:$0xff]   ;;  %v6436_v61 = vld [vmem:[%s8238_s0 + $0x2e0] sm:$0xff]   ;;  %v6438_v63 = vld [vmem:[%s8238_s0 + $0x2e8] sm:$0xff]  }
  0x16   :  { %6117 = vmatmul.mubr.msk.bf16.gmra.mrb[4].mxu0 %vm938_vm0, %v6385_v10  ;;  %6245 = vmatmul.mubr.msk.bf16.gmra.mrb[4].mxu1 %vm938_vm0, %v6386_v11  ;;  %v6439_v0 = vld [vmem:[%s8238_s0 + $0xf0] sm:$0xff]   ;;  %v6441_v2 = vld [vmem:[%s8238_s0 + $0xf8] sm:$0xff]   ;;  %v6443_v4 = vld [vmem:[%s8238_s0 + $0x100] sm:$0xff]  }
  0x17   :  { %6120 = vmatprep.mubr.msk.bf16.mxu0 %vm938_vm0, %v6387_v12  ;;  %6248 = vmatprep.mubr.msk.bf16.mxu1 %vm938_vm0, %v6388_v13  ;;  %v6440_v1 = vld [vmem:[%s8238_s0 + $0x2f0] sm:$0xff]   ;;  %v6442_v3 = vld [vmem:[%s8238_s0 + $0x2f8] sm:$0xff]   ;;  %v6444_v5 = vld [vmem:[%s8238_s0 + $0x300] sm:$0xff]  }
  0x18   :  { %v6445_v6 = vld [vmem:[%s8238_s0 + $0x108] sm:$0xff]   ;;  %v6447_v8 = vld [vmem:[%s8238_s0 + $0x110] sm:$0xff]   ;;  %v6449_v10 = vld [vmem:[%s8238_s0 + $0x118] sm:$0xff]  }
  0x19   :  { %v6446_v7 = vld [vmem:[%s8238_s0 + $0x308] sm:$0xff]   ;;  %v6448_v9 = vld [vmem:[%s8238_s0 + $0x310] sm:$0xff]   ;;  %v6450_v11 = vld [vmem:[%s8238_s0 + $0x318] sm:$0xff]  }
  0x1a   :  { %v6451_v12 = vld [vmem:[%s8238_s0 + $0x120] sm:$0xff]  }
  0x1b   :  { %v6452_v13 = vld [vmem:[%s8238_s0 + $0x320] sm:$0xff]  }
  0x1e   :  { %6121 = vmatmul.mubr.msk.bf16.gmra.mrb[8].mxu0 %vm938_vm0, %v6389_v14  ;;  %6249 = vmatmul.mubr.msk.bf16.gmra.mrb[8].mxu1 %vm938_vm0, %v6390_v15  ;;  %v6453_v14 = vld [vmem:[%s8238_s0 + $0x128] sm:$0xff]  }
  0x1f   :  { %6124 = vmatprep.mubr.msk.bf16.mxu0 %vm938_vm0, %v6391_v16  ;;  %6252 = vmatprep.mubr.msk.bf16.mxu1 %vm938_vm0, %v6392_v17  ;;  %v6454_v15 = vld [vmem:[%s8238_s0 + $0x328] sm:$0xff]   ;;  %v6455_v16 = vld [vmem:[%s8238_s0 + $0x130] sm:$0xff]  }
  0x20   :  { %v6456_v17 = vld [vmem:[%s8238_s0 + $0x330] sm:$0xff]  }
  0x26   :  { %6125 = vmatmul.mubr.msk.bf16.gmra.mrb[12].mxu0 %vm938_vm0, %v6393_v18  ;;  %6253 = vmatmul.mubr.msk.bf16.gmra.mrb[12].mxu1 %vm938_vm0, %v6394_v19  ;;  %v6457_v18 = vld [vmem:[%s8238_s0 + $0x138] sm:$0xff]  }
  0x27   :  { %6128 = vmatprep.mubr.msk.bf16.mxu0 %vm938_vm0, %v6395_v20  ;;  %6256 = vmatprep.mubr.msk.bf16.mxu1 %vm938_vm0, %v6396_v21  ;;  %v6458_v19 = vld [vmem:[%s8238_s0 + $0x338] sm:$0xff]   ;;  %v6459_v20 = vld [vmem:[%s8238_s0 + $0x140] sm:$0xff]  }
  0x28   :  { %v6460_v21 = vld [vmem:[%s8238_s0 + $0x340] sm:$0xff]  }
  0x2e   :  { %6129 = vmatmul.mubr.msk.bf16.gmra.mrb[16].mxu0 %vm938_vm0, %v6397_v22  ;;  %6257 = vmatmul.mubr.msk.bf16.gmra.mrb[16].mxu1 %vm938_vm0, %v6398_v23  ;;  %v6461_v22 = vld [vmem:[%s8238_s0 + $0x148] sm:$0xff]  }
  0x2f   :  { %6132 = vmatprep.mubr.msk.bf16.mxu0 %vm938_vm0, %v6399_v24  ;;  %6260 = vmatprep.mubr.msk.bf16.mxu1 %vm938_vm0, %v6400_v25  ;;  %v6462_v23 = vld [vmem:[%s8238_s0 + $0x348] sm:$0xff]   ;;  %v6463_v24 = vld [vmem:[%s8238_s0 + $0x150] sm:$0xff]  }
  0x30   :  { %v6464_v25 = vld [vmem:[%s8238_s0 + $0x350] sm:$0xff]  }
  0x36   :  { %6133 = vmatmul.mubr.msk.bf16.gmra.mrb[20].mxu0 %vm938_vm0, %v6401_v26  ;;  %6261 = vmatmul.mubr.msk.bf16.gmra.mrb[20].mxu1 %vm938_vm0, %v6402_v27  ;;  %v6465_v26 = vld [vmem:[%s8238_s0 + $0x158] sm:$0xff]  }
  0x37   :  { %6136 = vmatprep.mubr.msk.bf16.mxu0 %vm938_vm0, %v6403_v28  ;;  %6264 = vmatprep.mubr.msk.bf16.mxu1 %vm938_vm0, %v6404_v29  ;;  %v6466_v27 = vld [vmem:[%s8238_s0 + $0x358] sm:$0xff]   ;;  %v6467_v28 = vld [vmem:[%s8238_s0 + $0x160] sm:$0xff]  }
  0x38   :  { %v6468_v29 = vld [vmem:[%s8238_s0 + $0x360] sm:$0xff]  }
  0x3e   :  { %6137 = vmatmul.mubr.msk.bf16.gmra.mrb[24].mxu0 %vm938_vm0, %v6405_v30  ;;  %6265 = vmatmul.mubr.msk.bf16.gmra.mrb[24].mxu1 %vm938_vm0, %v6406_v31  ;;  %v6469_v30 = vld [vmem:[%s8238_s0 + $0x168] sm:$0xff]  }
  0x3f   :  { %6140 = vmatprep.mubr.msk.bf16.mxu0 %vm938_vm0, %v6407_v32  ;;  %6268 = vmatprep.mubr.msk.bf16.mxu1 %vm938_vm0, %v6408_v33  ;;  %v6470_v31 = vld [vmem:[%s8238_s0 + $0x368] sm:$0xff]   ;;  %v6471_v32 = vld [vmem:[%s8238_s0 + $0x170] sm:$0xff]  }
  0x40   :  { %v6472_v33 = vld [vmem:[%s8238_s0 + $0x370] sm:$0xff]  }
  0x46   :  { %6141 = vmatmul.mubr.msk.bf16.gmra.mrb[28].mxu0 %vm938_vm0, %v6409_v34  ;;  %6269 = vmatmul.mubr.msk.bf16.gmra.mrb[28].mxu1 %vm938_vm0, %v6410_v35  ;;  %v6473_v34 = vld [vmem:[%s8238_s0 + $0x178] sm:$0xff]  }
  0x47   :  { %6144 = vmatprep.mubr.msk.bf16.mxu0 %vm938_vm0, %v6411_v36  ;;  %6272 = vmatprep.mubr.msk.bf16.mxu1 %vm938_vm0, %v6412_v37  ;;  %v6474_v35 = vld [vmem:[%s8238_s0 + $0x378] sm:$0xff]   ;;  %v6475_v36 = vld [vmem:[%s8238_s0 + $0x180] sm:$0xff]  }
  0x48   :  { %v6476_v37 = vld [vmem:[%s8238_s0 + $0x380] sm:$0xff]  }
  0x4e   :  { %6145 = vmatmul.mubr.msk.bf16.gmra.mrb[32].mxu0 %vm938_vm0, %v6413_v38  ;;  %6273 = vmatmul.mubr.msk.bf16.gmra.mrb[32].mxu1 %vm938_vm0, %v6414_v39  ;;  %v6477_v38 = vld [vmem:[%s8238_s0 + $0x188] sm:$0xff]  }
  0x4f   :  { %6148 = vmatprep.mubr.msk.bf16.mxu0 %vm938_vm0, %v6415_v40  ;;  %6276 = vmatprep.mubr.msk.bf16.mxu1 %vm938_vm0, %v6416_v41  ;;  %v6478_v39 = vld [vmem:[%s8238_s0 + $0x388] sm:$0xff]   ;;  %v6479_v40 = vld [vmem:[%s8238_s0 + $0x190] sm:$0xff]  }
  0x50   :  { %v6480_v41 = vld [vmem:[%s8238_s0 + $0x390] sm:$0xff]  }
  0x56   :  { %6149 = vmatmul.mubr.msk.bf16.gmra.mrb[36].mxu0 %vm938_vm0, %v6417_v42  ;;  %6277 = vmatmul.mubr.msk.bf16.gmra.mrb[36].mxu1 %vm938_vm0, %v6418_v43  ;;  %v6481_v42 = vld [vmem:[%s8238_s0 + $0x198] sm:$0xff]  }
  0x57   :  { %6152 = vmatprep.mubr.msk.bf16.mxu0 %vm938_vm0, %v6419_v44  ;;  %6280 = vmatprep.mubr.msk.bf16.mxu1 %vm938_vm0, %v6420_v45  ;;  %v6482_v43 = vld [vmem:[%s8238_s0 + $0x398] sm:$0xff]   ;;  %v6483_v44 = vld [vmem:[%s8238_s0 + $0x1a0] sm:$0xff]  }
  0x58   :  { %v6484_v45 = vld [vmem:[%s8238_s0 + $0x3a0] sm:$0xff]  }
  0x5e   :  { %6153 = vmatmul.mubr.msk.bf16.gmra.mrb[40].mxu0 %vm938_vm0, %v6421_v46  ;;  %6281 = vmatmul.mubr.msk.bf16.gmra.mrb[40].mxu1 %vm938_vm0, %v6422_v47  ;;  %v6485_v46 = vld [vmem:[%s8238_s0 + $0x1a8] sm:$0xff]  }
  0x5f   :  { %6156 = vmatprep.mubr.msk.bf16.mxu0 %vm938_vm0, %v6423_v48  ;;  %6284 = vmatprep.mubr.msk.bf16.mxu1 %vm938_vm0, %v6424_v49  ;;  %v6486_v47 = vld [vmem:[%s8238_s0 + $0x3a8] sm:$0xff]   ;;  %v6487_v48 = vld [vmem:[%s8238_s0 + $0x1b0] sm:$0xff]  }
  0x60   :  { %v6488_v49 = vld [vmem:[%s8238_s0 + $0x3b0] sm:$0xff]  }
  0x66   :  { %6157 = vmatmul.mubr.msk.bf16.gmra.mrb[44].mxu0 %vm938_vm0, %v6425_v50  ;;  %6285 = vmatmul.mubr.msk.bf16.gmra.mrb[44].mxu1 %vm938_vm0, %v6426_v51  ;;  %v6979_v50 = vld [vmem:[%s8239_s2] ss:$0 sm:$0xff] }
  0x67   :  { %6160 = vmatprep.mubr.msk.bf16.mxu0 %vm938_vm0, %v6427_v52  ;;  %6288 = vmatprep.mubr.msk.bf16.mxu1 %vm938_vm0, %v6428_v53 }
  0x6e   :  { %6161 = vmatmul.mubr.msk.bf16.gmra.mrb[48].mxu0 %vm938_vm0, %v6429_v54  ;;  %6289 = vmatmul.mubr.msk.bf16.gmra.mrb[48].mxu1 %vm938_vm0, %v6430_v55 }
  0x6f   :  { %6164 = vmatprep.mubr.msk.bf16.mxu0 %vm938_vm0, %v6431_v56  ;;  %6292 = vmatprep.mubr.msk.bf16.mxu1 %vm938_vm0, %v6432_v57  ;;  %v6489_v57 = vld [vmem:[%s8238_s0 + $0x1b8] sm:$0xff]  }
  0x76   :  { %6165 = vmatmul.mubr.msk.bf16.gmra.mrb[52].mxu0 %vm938_vm0, %v6433_v58  ;;  %6293 = vmatmul.mubr.msk.bf16.gmra.mrb[52].mxu1 %vm938_vm0, %v6434_v59 }
  0x77   :  { %6168 = vmatprep.mubr.msk.bf16.mxu0 %vm938_vm0, %v6435_v60  ;;  %6296 = vmatprep.mubr.msk.bf16.mxu1 %vm938_vm0, %v6436_v61 }
  0x7e   :  { %6169 = vmatmul.mubr.msk.bf16.gmra.mrb[56].mxu0 %vm938_vm0, %v6437_v62  ;;  %6297 = vmatmul.mubr.msk.bf16.gmra.mrb[56].mxu1 %vm938_vm0, %v6438_v63  ;;  %v6490_v62 = vld [vmem:[%s8238_s0 + $0x3b8] sm:$0xff]   ;;  %v6491_v63 = vld [vmem:[%s8238_s0 + $0x1c0] sm:$0xff]  }
  0x7f   :  { %6172 = vmatprep.mubr.msk.bf16.mxu0 %vm938_vm0, %v6439_v0  ;;  %6300 = vmatprep.mubr.msk.bf16.mxu1 %vm938_vm0, %v6440_v1  ;;  %v6492_v0 = vld [vmem:[%s8238_s0 + $0x3c0] sm:$0xff]  }
  0x86   :  { %6173 = vmatmul.mubr.msk.bf16.gmra.mrb[60].mxu0 %vm938_vm0, %v6441_v2  ;;  %6301 = vmatmul.mubr.msk.bf16.gmra.mrb[60].mxu1 %vm938_vm0, %v6442_v3 }
  0x87   :  { %6176 = vmatprep.mubr.msk.bf16.mxu0 %vm938_vm0, %v6443_v4  ;;  %6304 = vmatprep.mubr.msk.bf16.mxu1 %vm938_vm0, %v6444_v5 }
  0x8e   :  { %6177 = vmatmul.mubr.msk.bf16.gmra.mrb[64].mxu0 %vm938_vm0, %v6445_v6  ;;  %6305 = vmatmul.mubr.msk.bf16.gmra.mrb[64].mxu1 %vm938_vm0, %v6446_v7 }
  0x8f   :  { %6180 = vmatprep.mubr.msk.bf16.mxu0 %vm938_vm0, %v6447_v8  ;;  %6308 = vmatprep.mubr.msk.bf16.mxu1 %vm938_vm0, %v6448_v9 }
  0x96   :  { %6181 = vmatmul.mubr.msk.bf16.gmra.mrb[68].mxu0 %vm938_vm0, %v6449_v10  ;;  %6309 = vmatmul.mubr.msk.bf16.gmra.mrb[68].mxu1 %vm938_vm0, %v6450_v11 }
  0x97   :  { %6184 = vmatprep.mubr.msk.bf16.mxu0 %vm938_vm0, %v6451_v12  ;;  %6312 = vmatprep.mubr.msk.bf16.mxu1 %vm938_vm0, %v6452_v13 }
  0x9e   :  { %6185 = vmatmul.mubr.msk.bf16.gmra.mrb[72].mxu0 %vm938_vm0, %v6453_v14  ;;  %6313 = vmatmul.mubr.msk.bf16.gmra.mrb[72].mxu1 %vm938_vm0, %v6454_v15 }
  0x9f   :  { %6188 = vmatprep.mubr.msk.bf16.mxu0 %vm938_vm0, %v6455_v16  ;;  %6316 = vmatprep.mubr.msk.bf16.mxu1 %vm938_vm0, %v6456_v17 }
  0xa6   :  { %6189 = vmatmul.mubr.msk.bf16.gmra.mrb[76].mxu0 %vm938_vm0, %v6457_v18  ;;  %6317 = vmatmul.mubr.msk.bf16.gmra.mrb[76].mxu1 %vm938_vm0, %v6458_v19 }
  0xa7   :  { %6192 = vmatprep.mubr.msk.bf16.mxu0 %vm938_vm0, %v6459_v20  ;;  %6320 = vmatprep.mubr.msk.bf16.mxu1 %vm938_vm0, %v6460_v21 }
  0xae   :  { %6193 = vmatmul.mubr.msk.bf16.gmra.mrb[80].mxu0 %vm938_vm0, %v6461_v22  ;;  %6321 = vmatmul.mubr.msk.bf16.gmra.mrb[80].mxu1 %vm938_vm0, %v6462_v23  ;;  %v6493_v23 = vld [vmem:[%s8238_s0 + $0x1c8] sm:$0xff]  }
  0xaf   :  { %6196 = vmatprep.mubr.msk.bf16.mxu0 %vm938_vm0, %v6463_v24  ;;  %6324 = vmatprep.mubr.msk.bf16.mxu1 %vm938_vm0, %v6464_v25 }
  0xb6   :  { %6197 = vmatmul.mubr.msk.bf16.gmra.mrb[84].mxu0 %vm938_vm0, %v6465_v26  ;;  %6325 = vmatmul.mubr.msk.bf16.gmra.mrb[84].mxu1 %vm938_vm0, %v6466_v27 }
  0xb7   :  { %6200 = vmatprep.mubr.msk.bf16.mxu0 %vm938_vm0, %v6467_v28  ;;  %6328 = vmatprep.mubr.msk.bf16.mxu1 %vm938_vm0, %v6468_v29 }
  0xbe   :  { %6201 = vmatmul.mubr.msk.bf16.gmra.mrb[88].mxu0 %vm938_vm0, %v6469_v30  ;;  %6329 = vmatmul.mubr.msk.bf16.gmra.mrb[88].mxu1 %vm938_vm0, %v6470_v31  ;;  %v6494_v30 = vld [vmem:[%s8238_s0 + $0x3c8] sm:$0xff]   ;;  %v6495_v31 = vld [vmem:[%s8238_s0 + $0x1d0] sm:$0xff]  }
  0xbf   :  { %6204 = vmatprep.mubr.msk.bf16.mxu0 %vm938_vm0, %v6471_v32  ;;  %6332 = vmatprep.mubr.msk.bf16.mxu1 %vm938_vm0, %v6472_v33 }
  0xc6   :  { %6205 = vmatmul.mubr.msk.bf16.gmra.mrb[92].mxu0 %vm938_vm0, %v6473_v34  ;;  %6333 = vmatmul.mubr.msk.bf16.gmra.mrb[92].mxu1 %vm938_vm0, %v6474_v35 }
  0xc7   :  { %6208 = vmatprep.mubr.msk.bf16.mxu0 %vm938_vm0, %v6475_v36  ;;  %6336 = vmatprep.mubr.msk.bf16.mxu1 %vm938_vm0, %v6476_v37 }
  0xce   :  { %6209 = vmatmul.mubr.msk.bf16.gmra.mrb[96].mxu0 %vm938_vm0, %v6477_v38  ;;  %6337 = vmatmul.mubr.msk.bf16.gmra.mrb[96].mxu1 %vm938_vm0, %v6478_v39  ;;  %v6496_v38 = vld [vmem:[%s8238_s0 + $0x3d0] sm:$0xff]  }
  0xcf   :  { %6212 = vmatprep.mubr.msk.bf16.mxu0 %vm938_vm0, %v6479_v40  ;;  %6340 = vmatprep.mubr.msk.bf16.mxu1 %vm938_vm0, %v6480_v41 }
  0xd6   :  { %6213 = vmatmul.mubr.msk.bf16.gmra.mrb[100].mxu0 %vm938_vm0, %v6481_v42  ;;  %6341 = vmatmul.mubr.msk.bf16.gmra.mrb[100].mxu1 %vm938_vm0, %v6482_v43 }
  0xd7   :  { %6216 = vmatprep.mubr.msk.bf16.mxu0 %vm938_vm0, %v6483_v44  ;;  %6344 = vmatprep.mubr.msk.bf16.mxu1 %vm938_vm0, %v6484_v45 }
  0xde   :  { %6217 = vmatmul.mubr.msk.bf16.gmra.mrb[104].mxu0 %vm938_vm0, %v6485_v46  ;;  %6345 = vmatmul.mubr.msk.bf16.gmra.mrb[104].mxu1 %vm938_vm0, %v6486_v47 }
  0xdf   :  { %6220 = vmatprep.mubr.msk.bf16.mxu0 %vm938_vm0, %v6487_v48  ;;  %6348 = vmatprep.mubr.msk.bf16.mxu1 %vm938_vm0, %v6488_v49 }
  0xe1   :  { %v6114_v51 = vpop.f32.mrb[0].mxu0  ;;  %v6242_v52 = vpop.f32.mrb[0].mxu1 }
  0xe2   :  { %v1370_v53 = vadd.f32 %v6114_v51, %v6979_v50  ;;  %v1882_v54 = vadd.f32 %v6242_v52, %v6979_v50  ;;  %v1361_v55 = vpop.f32.mrb[1].mxu0  ;;  %v1873_v56 = vpop.f32.mrb[1].mxu1 }
  0xe3   :  { %v1362_v58 = vadd.f32 %v6979_v50, %v1361_v55  ;;  %v1874_v59 = vadd.f32 %v6979_v50, %v1873_v56  ;;  %v6115_v60 = vpop.f32.mrb[2].mxu0  ;;  %v6243_v61 = vpop.f32.mrb[2].mxu1 }
  0xe4   :  { %vm2386_vm2 = vcmp.gt.f32.partialorder %v1370_v53, 0.0  ;;  %v2642_v1 = vmul.f32 0.1, %v1370_v53  ;;  %vm2514_vm3 = vcmp.gt.f32.partialorder %v1882_v54, 0.0  ;;  %v2770_v2 = vmul.f32 0.1, %v1882_v54 }
  0xe5   :  { %vm2384_vm4 = vcmp.gt.f32.partialorder %v1362_v58, 0.0  ;;  %v2640_v3 = vmul.f32 0.1, %v1362_v58  ;;  %vm2512_vm5 = vcmp.gt.f32.partialorder %v1874_v59, 0.0  ;;  %v2768_v4 = vmul.f32 0.1, %v1874_v59 }
  0xe6   :  { %v1373_v5 = vadd.f32 %v6115_v60, %v6979_v50  ;;  %v1885_v6 = vadd.f32 %v6243_v61, %v6979_v50  ;;  %v1364_v7 = vpop.f32.mrb[3].mxu0  ;;  %v1876_v8 = vpop.f32.mrb[3].mxu1  ;;  %6221 = vmatmul.mubr.msk.bf16.gmra.mrb[108].mxu0 %vm938_vm0, %v6489_v57  ;;  %v2898_v9 = vsel %vm2386_vm2, %v1370_v53, %v2642_v1  ;;  %v3026_v10 = vsel %vm2514_vm3, %v1882_v54, %v2770_v2 }
  0xe7   :  { %v1365_v11 = vadd.f32 %v6979_v50, %v1364_v7  ;;  %v1877_v12 = vadd.f32 %v6979_v50, %v1876_v8  ;;  %6349 = vmatmul.mubr.msk.bf16.gmra.mrb[108].mxu1 %vm938_vm0, %v6490_v62  ;;  %6224 = vmatprep.mubr.msk.bf16.mxu0 %vm938_vm0, %v6491_v63  ;;  %v2896_v17 = vsel %vm2384_vm4, %v1362_v58, %v2640_v3  ;;  %v6498_v7 = vld [vmem:[%s8238_s0 + $0x3d8] sm:$0xff]   ;;  %v6499_v8 = vld [vmem:[%s8238_s0 + $0x1e0] sm:$0xff]  }
  0xe8   :  { %vm2387_vm6 = vcmp.gt.f32.partialorder %v1373_v5, 0.0  ;;  %v2643_v13 = vmul.f32 0.1, %v1373_v5  ;;  %vm2515_vm7 = vcmp.gt.f32.partialorder %v1885_v6, 0.0  ;;  %v2771_v14 = vmul.f32 0.1, %v1885_v6  ;;  %6352 = vmatprep.mubr.msk.bf16.mxu1 %vm938_vm0, %v6492_v0 }
  0xe9   :  { %vm2385_vm8 = vcmp.gt.f32.partialorder %v1365_v11, 0.0  ;;  %v2641_v15 = vmul.f32 0.1, %v1365_v11  ;;  %vm2513_vm9 = vcmp.gt.f32.partialorder %v1877_v12, 0.0  ;;  %v2769_v16 = vmul.f32 0.1, %v1877_v12 }
  0xea   :  { %v3024_v18 = vsel %vm2512_vm5, %v1874_v59, %v2768_v4  ;;  %v2899_v19 = vsel %vm2387_vm6, %v1373_v5, %v2643_v13  ;;  %v3027_v20 = vsel %vm2515_vm7, %v1885_v6, %v2771_v14  ;;  %v6118_v21 = vpop.f32.mrb[4].mxu0  ;;  %v6246_v22 = vpop.f32.mrb[4].mxu1  ;;  %v6497_v0 = vld [vmem:[%s8238_s0 + $0x1d8] sm:$0xff]  }
  0xeb   :  { %v5216_v24 = vpack.c.bf16 %v2899_v19, %v2898_v9  ;;  %v5536_v25 = vpack.c.bf16 %v3027_v20, %v3026_v10  ;;  %v2897_v26 = vsel %vm2385_vm8, %v1365_v11, %v2641_v15  ;;  %v3025_v27 = vsel %vm2513_vm9, %v1877_v12, %v2769_v16  ;;  %v1377_v28 = vpop.f32.mrb[5].mxu0  ;;  %v1889_v29 = vpop.f32.mrb[5].mxu1  ;;  %v6500_v9 = vld [vmem:[%s8238_s0 + $0x3e0] sm:$0xff]  }
  0xec   :  { %v5211_v32 = vpack.c.bf16 %v2897_v26, %v2896_v17  ;;  %v5531_v33 = vpack.c.bf16 %v3025_v27, %v3024_v18  ;;  %v1386_v34 = vadd.f32 %v6118_v21, %v6979_v50  ;;  %v1898_v35 = vadd.f32 %v6246_v22, %v6979_v50  ;;  %v6119_v36 = vpop.f32.mrb[6].mxu0  ;;  %v6247_v37 = vpop.f32.mrb[6].mxu1  ;;  %v6501_v27 = vld [vmem:[%s8238_s0 + $0x1e8] sm:$0xff]  }
  0xed   :  { %5848 = vst [vmem:[%s8240_s3 + $0x8] sm:$0xff] %v5216_v24   ;;  %5912 = vst [vmem:[%s8240_s3 + $0x208] sm:$0xff] %v5536_v25   ;;  %v1378_v39 = vadd.f32 %v6979_v50, %v1377_v28  ;;  %v1890_v40 = vadd.f32 %v6979_v50, %v1889_v29  ;;  %v1389_v41 = vadd.f32 %v6119_v36, %v6979_v50  ;;  %v1380_v43 = vpop.f32.mrb[7].mxu0  ;;  %v1892_v44 = vpop.f32.mrb[7].mxu1 }
  0xee   :  { %v1901_v42 = vadd.f32 %v6247_v37, %v6979_v50  ;;  %5212 = vst [vmem:[%s8240_s3] sm:$0xff] %v5211_v32   ;;  %5911 = vst [vmem:[%s8240_s3 + $0x200] sm:$0xff] %v5531_v33   ;;  %vm2390_vm10 = vcmp.gt.f32.partialorder %v1386_v34, 0.0  ;;  %v2646_v45 = vmul.f32 0.1, %v1386_v34  ;;  %vm2518_vm11 = vcmp.gt.f32.partialorder %v1898_v35, 0.0  ;;  %6225 = vmatmul.mubr.msk.bf16.gmra.mrb[112].mxu0 %vm938_vm0, %v6493_v23  ;;  %v6502_v33 = vld [vmem:[%s8238_s0 + $0x3e8] sm:$0xff]  }
  0xef   :  { %v2774_v46 = vmul.f32 0.1, %v1898_v35  ;;  %vm2388_vm12 = vcmp.gt.f32.partialorder %v1378_v39, 0.0  ;;  %v2644_v47 = vmul.f32 0.1, %v1378_v39  ;;  %vm2516_vm13 = vcmp.gt.f32.partialorder %v1890_v40, 0.0  ;;  %6353 = vmatmul.mubr.msk.bf16.gmra.mrb[112].mxu1 %vm938_vm0, %v6494_v30  ;;  %6228 = vmatprep.mubr.msk.bf16.mxu0 %vm938_vm0, %v6495_v31 }
  0xf0   :  { %v2772_v48 = vmul.f32 0.1, %v1890_v40  ;;  %v2902_v49 = vsel %vm2390_vm10, %v1386_v34, %v2646_v45  ;;  %vm2391_vm14 = vcmp.gt.f32.partialorder %v1389_v41, 0.0  ;;  %v2647_v52 = vmul.f32 0.1, %v1389_v41  ;;  %6356 = vmatprep.mubr.msk.bf16.mxu1 %vm938_vm0, %v6496_v38 }
  0xf1   :  { %v3030_v51 = vsel %vm2518_vm11, %v1898_v35, %v2774_v46  ;;  %v2900_v53 = vsel %vm2388_vm12, %v1378_v39, %v2644_v47  ;;  %vm2519_vm15 = vcmp.gt.f32.partialorder %v1901_v42, 0.0  ;;  %v2775_v55 = vmul.f32 0.1, %v1901_v42  ;;  %v6122_v56 = vpop.f32.mrb[8].mxu0  ;;  %v6250_v57 = vpop.f32.mrb[8].mxu1  ;;  %v6503_v39 = vld [vmem:[%s8238_s0 + $0x1f0] sm:$0xff]  }
  0xf2   :  { %v3028_v54 = vsel %vm2516_vm13, %v1890_v40, %v2772_v48  ;;  %v2903_v58 = vsel %vm2391_vm14, %v1389_v41, %v2647_v52  ;;  %v1381_v59 = vadd.f32 %v6979_v50, %v1380_v43  ;;  %v1893_v60 = vadd.f32 %v6979_v50, %v1892_v44  ;;  %v1393_v62 = vpop.f32.mrb[9].mxu0  ;;  %v1905_v63 = vpop.f32.mrb[9].mxu1  ;;  %v6504_v40 = vld [vmem:[%s8238_s0 + $0x3f0] sm:$0xff]  }
  0xf3   :  { %v1402_v61 = vadd.f32 %v6122_v56, %v6979_v50  ;;  %v5226_v1 = vpack.c.bf16 %v2903_v58, %v2902_v49  ;;  %v3031_v2 = vsel %vm2519_vm15, %v1901_v42, %v2775_v55  ;;  %v1914_v3 = vadd.f32 %v6250_v57, %v6979_v50  ;;  %v6123_v5 = vpop.f32.mrb[10].mxu0  ;;  %v6251_v6 = vpop.f32.mrb[10].mxu1 }
  0xf4   :  { %v1394_v4 = vadd.f32 %v6979_v50, %v1393_v62  ;;  %v5546_v10 = vpack.c.bf16 %v3031_v2, %v3030_v51  ;;  %vm2389_vm1 = vcmp.gt.f32.partialorder %v1381_v59, 0.0  ;;  %v2645_v11 = vmul.f32 0.1, %v1381_v59  ;;  %v1396_v12 = vpop.f32.mrb[11].mxu0  ;;  %v1908_v13 = vpop.f32.mrb[11].mxu1 }
  0xf5   :  { %vm2517_vm2 = vcmp.gt.f32.partialorder %v1893_v60, 0.0  ;;  %5850 = vst [vmem:[%s8240_s3 + $0x18] sm:$0xff] %v5226_v1   ;;  %v2773_v14 = vmul.f32 0.1, %v1893_v60  ;;  %vm2394_vm3 = vcmp.gt.f32.partialorder %v1402_v61, 0.0  ;;  %vm2522_vm4 = vcmp.gt.f32.partialorder %v1914_v3, 0.0 }
  0xf6   :  { %v2650_v15 = vmul.f32 0.1, %v1402_v61  ;;  %5914 = vst [vmem:[%s8240_s3 + $0x218] sm:$0xff] %v5546_v10   ;;  %v2901_v16 = vsel %vm2389_vm1, %v1381_v59, %v2645_v11  ;;  %v2778_v17 = vmul.f32 0.1, %v1914_v3  ;;  %vm2392_vm5 = vcmp.gt.f32.partialorder %v1394_v4, 0.0  ;;  %6229 = vmatmul.mubr.msk.bf16.gmra.mrb[116].mxu0 %vm938_vm0, %v6497_v0 }
  0xf7   :  { %v2648_v18 = vmul.f32 0.1, %v1394_v4  ;;  %v5221_v19 = vpack.c.bf16 %v2901_v16, %v2900_v53  ;;  %v3029_v20 = vsel %vm2517_vm2, %v1893_v60, %v2773_v14  ;;  %v1906_v22 = vadd.f32 %v6979_v50, %v1905_v63  ;;  %6357 = vmatmul.mubr.msk.bf16.gmra.mrb[116].mxu1 %vm938_vm0, %v6498_v7  ;;  %6232 = vmatprep.mubr.msk.bf16.mxu0 %vm938_vm0, %v6499_v8  ;;  %v6505_v1 = vld [vmem:[%s8238_s0 + $0x1f8] sm:$0xff]  }
  0xf8   :  { %v2906_v21 = vsel %vm2394_vm3, %v1402_v61, %v2650_v15  ;;  %v5541_v23 = vpack.c.bf16 %v3029_v20, %v3028_v54  ;;  %v3034_v24 = vsel %vm2522_vm4, %v1914_v3, %v2778_v17  ;;  %v1405_v26 = vadd.f32 %v6123_v5, %v6979_v50  ;;  %6360 = vmatprep.mubr.msk.bf16.mxu1 %vm938_vm0, %v6500_v9  ;;  %v6506_v7 = vld [vmem:[%s8238_s0 + $0x3f8] sm:$0xff]  }
  0xf9   :  { %v2904_v25 = vsel %vm2392_vm5, %v1394_v4, %v2648_v18  ;;  %5849 = vst [vmem:[%s8240_s3 + $0x10] sm:$0xff] %v5221_v19   ;;  %vm2520_vm6 = vcmp.gt.f32.partialorder %v1906_v22, 0.0  ;;  %v2776_v28 = vmul.f32 0.1, %v1906_v22  ;;  %v1917_v29 = vadd.f32 %v6251_v6, %v6979_v50  ;;  %v6126_v31 = vpop.f32.mrb[12].mxu0  ;;  %v6254_v32 = vpop.f32.mrb[12].mxu1 }
  0xfa   :  { %v1397_v30 = vadd.f32 %v6979_v50, %v1396_v12  ;;  %5913 = vst [vmem:[%s8240_s3 + $0x210] sm:$0xff] %v5541_v23   ;;  %vm2395_vm7 = vcmp.gt.f32.partialorder %v1405_v26, 0.0  ;;  %v2651_v34 = vmul.f32 0.1, %v1405_v26  ;;  %v1909_v35 = vadd.f32 %v6979_v50, %v1908_v13  ;;  %v1409_v37 = vpop.f32.mrb[13].mxu0  ;;  %v1921_v38 = vpop.f32.mrb[13].mxu1 }
  0xfb   :  { %v1418_v36 = vadd.f32 %v6126_v31, %v6979_v50  ;;  %v3032_v41 = vsel %vm2520_vm6, %v1906_v22, %v2776_v28  ;;  %vm2523_vm8 = vcmp.gt.f32.partialorder %v1917_v29, 0.0  ;;  %v2779_v42 = vmul.f32 0.1, %v1917_v29  ;;  %v6127_v43 = vpop.f32.mrb[14].mxu0  ;;  %v6255_v44 = vpop.f32.mrb[14].mxu1 }
  0xfc   :  { %vm2393_vm9 = vcmp.gt.f32.partialorder %v1397_v30, 0.0  ;;  %v2907_v45 = vsel %vm2395_vm7, %v1405_v26, %v2651_v34  ;;  %v2649_v46 = vmul.f32 0.1, %v1397_v30  ;;  %vm2521_vm10 = vcmp.gt.f32.partialorder %v1909_v35, 0.0  ;;  %v1412_v48 = vpop.f32.mrb[15].mxu0  ;;  %v1924_v53 = vpop.f32.mrb[15].mxu1 }
  0xfd   :  { %v2777_v47 = vmul.f32 0.1, %v1909_v35  ;;  %v5236_v49 = vpack.c.bf16 %v2907_v45, %v2906_v21  ;;  %v3035_v51 = vsel %vm2523_vm8, %v1917_v29, %v2779_v42  ;;  %vm2398_vm11 = vcmp.gt.f32.partialorder %v1418_v36, 0.0 }
  0xfe   :  { %v2654_v52 = vmul.f32 0.1, %v1418_v36  ;;  %v5556_v54 = vpack.c.bf16 %v3035_v51, %v3034_v24  ;;  %v2905_v55 = vsel %vm2393_vm9, %v1397_v30, %v2649_v46  ;;  %v1930_v57 = vadd.f32 %v6254_v32, %v6979_v50  ;;  %6233 = vmatmul.mubr.msk.bf16.gmra.mrb[120].mxu0 %vm938_vm0, %v6501_v27 }
  0xff   :  { %v3033_v56 = vsel %vm2521_vm10, %v1909_v35, %v2777_v47  ;;  %5852 = vst [vmem:[%s8240_s3 + $0x28] sm:$0xff] %v5236_v49   ;;  %v5231_v58 = vpack.c.bf16 %v2905_v55, %v2904_v25  ;;  %v1410_v61 = vadd.f32 %v6979_v50, %v1409_v37  ;;  %6361 = vmatmul.mubr.msk.bf16.gmra.mrb[120].mxu1 %vm938_vm0, %v6502_v33 }
 0x100   :  { %v5551_v59 = vpack.c.bf16 %v3033_v56, %v3032_v41  ;;  %v2910_v60 = vsel %vm2398_vm11, %v1418_v36, %v2654_v52  ;;  %5916 = vst [vmem:[%s8240_s3 + $0x228] sm:$0xff] %v5556_v54   ;;  %vm2526_vm12 = vcmp.gt.f32.partialorder %v1930_v57, 0.0  ;;  %v2782_v62 = vmul.f32 0.1, %v1930_v57  ;;  %6236 = vmatprep.mubr.msk.bf16.mxu0 %vm938_vm0, %v6503_v39  ;;  %6364 = vmatprep.mubr.msk.bf16.mxu1 %vm938_vm0, %v6504_v40 }
 0x101   :  { %v1922_v63 = vadd.f32 %v6979_v50, %v1921_v38  ;;  %v1421_v0 = vadd.f32 %v6127_v43, %v6979_v50  ;;  %5851 = vst [vmem:[%s8240_s3 + $0x20] sm:$0xff] %v5231_v58   ;;  %vm2396_vm13 = vcmp.gt.f32.partialorder %v1410_v61, 0.0  ;;  %v2652_v2 = vmul.f32 0.1, %v1410_v61  ;;  %v6130_v5 = vpop.f32.mrb[16].mxu0  ;;  %v6258_v6 = vpop.f32.mrb[16].mxu1 }
 0x102   :  { %5915 = vst [vmem:[%s8240_s3 + $0x220] sm:$0xff] %v5551_v59   ;;  %v1933_v3 = vadd.f32 %v6255_v44, %v6979_v50  ;;  %v1413_v4 = vadd.f32 %v6979_v50, %v1412_v48  ;;  %v3038_v8 = vsel %vm2526_vm12, %v1930_v57, %v2782_v62  ;;  %v1425_v10 = vpop.f32.mrb[17].mxu0  ;;  %v1937_v11 = vpop.f32.mrb[17].mxu1  ;;  %v1925_v18 = vadd.f32 %v6979_v50, %v1924_v53 }
 0x103   :  { %vm2524_vm14 = vcmp.gt.f32.partialorder %v1922_v63, 0.0  ;;  %v2780_v9 = vmul.f32 0.1, %v1922_v63  ;;  %vm2399_vm15 = vcmp.gt.f32.partialorder %v1421_v0, 0.0  ;;  %v2908_v12 = vsel %vm2396_vm13, %v1410_v61, %v2652_v2  ;;  %v6131_v15 = vpop.f32.mrb[18].mxu0  ;;  %v6259_v19 = vpop.f32.mrb[18].mxu1 }
 0x104   :  { %v2655_v13 = vmul.f32 0.1, %v1421_v0  ;;  %vm2527_vm1 = vcmp.gt.f32.partialorder %v1933_v3, 0.0  ;;  %v2783_v14 = vmul.f32 0.1, %v1933_v3  ;;  %vm2397_vm2 = vcmp.gt.f32.partialorder %v1413_v4, 0.0 }
 0x105   :  { %v3036_v16 = vsel %vm2524_vm14, %v1922_v63, %v2780_v9  ;;  %v2653_v17 = vmul.f32 0.1, %v1413_v4  ;;  %v1428_v20 = vpop.f32.mrb[19].mxu0  ;;  %v1434_v23 = vadd.f32 %v6130_v5, %v6979_v50  ;;  %v1946_v24 = vadd.f32 %v6258_v6, %v6979_v50  ;;  %v1940_v25 = vpop.f32.mrb[19].mxu1 }
 0x106   :  { %v2911_v21 = vsel %vm2399_vm15, %v1421_v0, %v2655_v13  ;;  %v3039_v22 = vsel %vm2527_vm1, %v1933_v3, %v2783_v14  ;;  %vm2525_vm3 = vcmp.gt.f32.partialorder %v1925_v18, 0.0  ;;  %6237 = vmatmul.mubr.msk.bf16.gmra.mrb[124].mxu0 %vm938_vm0, %v6505_v1  ;;  %v2781_v30 = vmul.f32 0.1, %v1925_v18 }
 0x107   :  { %v5246_v26 = vpack.c.bf16 %v2911_v21, %v2910_v60  ;;  %v5566_v27 = vpack.c.bf16 %v3039_v22, %v3038_v8  ;;  %v2909_v28 = vsel %vm2397_vm2, %v1413_v4, %v2653_v17  ;;  %vm2402_vm4 = vcmp.gt.f32.partialorder %v1434_v23, 0.0  ;;  %6365 = vmatmul.mubr.msk.bf16.gmra.mrb[124].mxu1 %vm938_vm0, %v6506_v7 }
 0x108   :  { %v5241_v29 = vpack.c.bf16 %v2909_v28, %v2908_v12  ;;  %v2658_v31 = vmul.f32 0.1, %v1434_v23  ;;  %vm2530_vm5 = vcmp.gt.f32.partialorder %v1946_v24, 0.0  ;;  %v2786_v32 = vmul.f32 0.1, %v1946_v24 }
 0x109   :  { %5854 = vst [vmem:[%s8240_s3 + $0x38] sm:$0xff] %v5246_v26   ;;  %5918 = vst [vmem:[%s8240_s3 + $0x238] sm:$0xff] %v5566_v27   ;;  %v1426_v33 = vadd.f32 %v6979_v50, %v1425_v10  ;;  %v1938_v34 = vadd.f32 %v6979_v50, %v1937_v11  ;;  %v3037_v35 = vsel %vm2525_vm3, %v1925_v18, %v2781_v30  ;;  %v6134_v39 = vpop.f32.mrb[20].mxu0  ;;  %v6262_v40 = vpop.f32.mrb[20].mxu1 }
 0x10a   :  { %5853 = vst [vmem:[%s8240_s3 + $0x30] sm:$0xff] %v5241_v29   ;;  %v2914_v36 = vsel %vm2402_vm4, %v1434_v23, %v2658_v31  ;;  %v1437_v37 = vadd.f32 %v6131_v15, %v6979_v50  ;;  %v1949_v38 = vadd.f32 %v6259_v19, %v6979_v50  ;;  %v5561_v41 = vpack.c.bf16 %v3037_v35, %v3036_v16  ;;  %v1441_v44 = vpop.f32.mrb[21].mxu0  ;;  %v1953_v45 = vpop.f32.mrb[21].mxu1 }
 0x10b   :  { %v3042_v42 = vsel %vm2530_vm5, %v1946_v24, %v2786_v32  ;;  %vm2400_vm0 = vcmp.gt.f32.partialorder %v1426_v33, 0.0  ;;  %v2656_v43 = vmul.f32 0.1, %v1426_v33  ;;  %vm2528_vm6 = vcmp.gt.f32.partialorder %v1938_v34, 0.0  ;;  %v6135_v52 = vpop.f32.mrb[22].mxu0  ;;  %v6263_v53 = vpop.f32.mrb[22].mxu1 }
 0x10c   :  { %v2784_v46 = vmul.f32 0.1, %v1938_v34  ;;  %vm2403_vm7 = vcmp.gt.f32.partialorder %v1437_v37, 0.0  ;;  %v2659_v47 = vmul.f32 0.1, %v1437_v37  ;;  %5917 = vst [vmem:[%s8240_s3 + $0x230] sm:$0xff] %v5561_v41   ;;  %v1429_v51 = vadd.f32 %v6979_v50, %v1428_v20 }
 0x10d   :  { %v2912_v48 = vsel %vm2400_vm0, %v1426_v33, %v2656_v43  ;;  %vm2531_vm8 = vcmp.gt.f32.partialorder %v1949_v38, 0.0  ;;  %v2787_v49 = vmul.f32 0.1, %v1949_v38  ;;  %v1941_v56 = vadd.f32 %v6979_v50, %v1940_v25  ;;  %v1444_v58 = vpop.f32.mrb[23].mxu0  ;;  %v1956_v59 = vpop.f32.mrb[23].mxu1 }
 0x10e   :  { %v3040_v54 = vsel %vm2528_vm6, %v1938_v34, %v2784_v46  ;;  %v2915_v55 = vsel %vm2403_vm7, %v1437_v37, %v2659_v47  ;;  %v1450_v57 = vadd.f32 %v6134_v39, %v6979_v50  ;;  %vm2401_vm9 = vcmp.gt.f32.partialorder %v1429_v51, 0.0 }
 0x10f   :  { %v5256_v60 = vpack.c.bf16 %v2915_v55, %v2914_v36  ;;  %v3043_v61 = vsel %vm2531_vm8, %v1949_v38, %v2787_v49  ;;  %v2657_v62 = vmul.f32 0.1, %v1429_v51  ;;  %vm2529_vm10 = vcmp.gt.f32.partialorder %v1941_v56, 0.0 }
 0x110   :  { %v5576_v63 = vpack.c.bf16 %v3043_v61, %v3042_v42  ;;  %v2785_v0 = vmul.f32 0.1, %v1941_v56  ;;  %vm2406_vm11 = vcmp.gt.f32.partialorder %v1450_v57, 0.0  ;;  %v2662_v2 = vmul.f32 0.1, %v1450_v57 }
 0x111   :  { %5856 = vst [vmem:[%s8240_s3 + $0x48] sm:$0xff] %v5256_v60   ;;  %v2913_v1 = vsel %vm2401_vm9, %v1429_v51, %v2657_v62  ;;  %v1962_v3 = vadd.f32 %v6262_v40, %v6979_v50  ;;  %v1442_v4 = vadd.f32 %v6979_v50, %v1441_v44  ;;  %v1954_v7 = vadd.f32 %v6979_v50, %v1953_v45  ;;  %v6138_v9 = vpop.f32.mrb[24].mxu0  ;;  %v6266_v10 = vpop.f32.mrb[24].mxu1 }
 0x112   :  { %5920 = vst [vmem:[%s8240_s3 + $0x248] sm:$0xff] %v5576_v63   ;;  %v5251_v5 = vpack.c.bf16 %v2913_v1, %v2912_v48  ;;  %v3041_v6 = vsel %vm2529_vm10, %v1941_v56, %v2785_v0  ;;  %v1453_v8 = vadd.f32 %v6135_v52, %v6979_v50  ;;  %v2918_v12 = vsel %vm2406_vm11, %v1450_v57, %v2662_v2  ;;  %v1457_v14 = vpop.f32.mrb[25].mxu0  ;;  %v1969_v15 = vpop.f32.mrb[25].mxu1 }
 0x113   :  { %v5571_v11 = vpack.c.bf16 %v3041_v6, %v3040_v54  ;;  %vm2534_vm12 = vcmp.gt.f32.partialorder %v1962_v3, 0.0  ;;  %v2790_v13 = vmul.f32 0.1, %v1962_v3  ;;  %vm2404_vm13 = vcmp.gt.f32.partialorder %v1442_v4, 0.0  ;;  %v6139_v21 = vpop.f32.mrb[26].mxu0  ;;  %v6267_v22 = vpop.f32.mrb[26].mxu1 }
 0x114   :  { %5855 = vst [vmem:[%s8240_s3 + $0x40] sm:$0xff] %v5251_v5   ;;  %v2660_v16 = vmul.f32 0.1, %v1442_v4  ;;  %vm2532_vm14 = vcmp.gt.f32.partialorder %v1954_v7, 0.0  ;;  %v2788_v17 = vmul.f32 0.1, %v1954_v7  ;;  %v1965_v20 = vadd.f32 %v6263_v53, %v6979_v50 }
 0x115   :  { %5919 = vst [vmem:[%s8240_s3 + $0x240] sm:$0xff] %v5571_v11   ;;  %v3046_v18 = vsel %vm2534_vm12, %v1962_v3, %v2790_v13  ;;  %vm2407_vm15 = vcmp.gt.f32.partialorder %v1453_v8, 0.0  ;;  %v2663_v19 = vmul.f32 0.1, %v1453_v8  ;;  %v1445_v25 = vadd.f32 %v6979_v50, %v1444_v58  ;;  %v1460_v27 = vpop.f32.mrb[27].mxu0  ;;  %v1972_v28 = vpop.f32.mrb[27].mxu1 }
 0x116   :  { %v2916_v23 = vsel %vm2404_vm13, %v1442_v4, %v2660_v16  ;;  %v3044_v24 = vsel %vm2532_vm14, %v1954_v7, %v2788_v17  ;;  %v1957_v26 = vadd.f32 %v6979_v50, %v1956_v59  ;;  %vm2535_vm1 = vcmp.gt.f32.partialorder %v1965_v20, 0.0 }
 0x117   :  { %v2919_v29 = vsel %vm2407_vm15, %v1453_v8, %v2663_v19  ;;  %v2791_v30 = vmul.f32 0.1, %v1965_v20  ;;  %v1466_v31 = vadd.f32 %v6138_v9, %v6979_v50  ;;  %vm2405_vm2 = vcmp.gt.f32.partialorder %v1445_v25, 0.0 }
 0x118   :  { %v5266_v32 = vpack.c.bf16 %v2919_v29, %v2918_v12  ;;  %v2661_v33 = vmul.f32 0.1, %v1445_v25  ;;  %vm2533_vm3 = vcmp.gt.f32.partialorder %v1957_v26, 0.0  ;;  %v2789_v35 = vmul.f32 0.1, %v1957_v26 }
 0x119   :  { %v3047_v34 = vsel %vm2535_vm1, %v1965_v20, %v2791_v30  ;;  %vm2410_vm4 = vcmp.gt.f32.partialorder %v1466_v31, 0.0  ;;  %v2666_v36 = vmul.f32 0.1, %v1466_v31  ;;  %v1978_v39 = vadd.f32 %v6266_v10, %v6979_v50  ;;  %v6142_v41 = vpop.f32.mrb[28].mxu0  ;;  %v6270_v42 = vpop.f32.mrb[28].mxu1 }
 0x11a   :  { %5858 = vst [vmem:[%s8240_s3 + $0x58] sm:$0xff] %v5266_v32   ;;  %v5586_v37 = vpack.c.bf16 %v3047_v34, %v3046_v18  ;;  %v2917_v38 = vsel %vm2405_vm2, %v1445_v25, %v2661_v33  ;;  %v1458_v40 = vadd.f32 %v6979_v50, %v1457_v14  ;;  %v3045_v44 = vsel %vm2533_vm3, %v1957_v26, %v2789_v35  ;;  %v1473_v47 = vpop.f32.mrb[29].mxu0  ;;  %v1985_v48 = vpop.f32.mrb[29].mxu1 }
 0x11b   :  { %v5261_v43 = vpack.c.bf16 %v2917_v38, %v2916_v23  ;;  %v2922_v45 = vsel %vm2410_vm4, %v1466_v31, %v2666_v36  ;;  %v1970_v46 = vadd.f32 %v6979_v50, %v1969_v15  ;;  %v5581_v49 = vpack.c.bf16 %v3045_v44, %v3044_v24  ;;  %v6143_v52 = vpop.f32.mrb[30].mxu0  ;;  %v6271_v53 = vpop.f32.mrb[30].mxu1 }
 0x11c   :  { %5922 = vst [vmem:[%s8240_s3 + $0x258] sm:$0xff] %v5586_v37   ;;  %vm2538_vm5 = vcmp.gt.f32.partialorder %v1978_v39, 0.0  ;;  %v2794_v51 = vmul.f32 0.1, %v1978_v39  ;;  %vm2408_vm0 = vcmp.gt.f32.partialorder %v1458_v40, 0.0  ;;  %v1469_v56 = vadd.f32 %v6139_v21, %v6979_v50  ;;  %v1476_v57 = vpop.f32.mrb[31].mxu0 }
 0x11d   :  { %5857 = vst [vmem:[%s8240_s3 + $0x50] sm:$0xff] %v5261_v43   ;;  %v2664_v54 = vmul.f32 0.1, %v1458_v40  ;;  %vm2536_vm6 = vcmp.gt.f32.partialorder %v1970_v46, 0.0  ;;  %v2792_v55 = vmul.f32 0.1, %v1970_v46  ;;  %v1981_v59 = vadd.f32 %v6267_v22, %v6979_v50 }
 0x11e   :  { %5921 = vst [vmem:[%s8240_s3 + $0x250] sm:$0xff] %v5581_v49   ;;  %v3050_v58 = vsel %vm2538_vm5, %v1978_v39, %v2794_v51  ;;  %v1461_v60 = vadd.f32 %v6979_v50, %v1460_v27  ;;  %v1973_v61 = vadd.f32 %v6979_v50, %v1972_v28  ;;  %v1988_v62 = vpop.f32.mrb[31].mxu1  ;;  %vm2411_vm7 = vcmp.gt.f32.partialorder %v1469_v56, 0.0 }
 0x11f   :  { %v2920_v63 = vsel %vm2408_vm0, %v1458_v40, %v2664_v54  ;;  %v3048_v0 = vsel %vm2536_vm6, %v1970_v46, %v2792_v55  ;;  %v2667_v1 = vmul.f32 0.1, %v1469_v56  ;;  %vm2539_vm8 = vcmp.gt.f32.partialorder %v1981_v59, 0.0 }
 0x120   :  { %v2795_v2 = vmul.f32 0.1, %v1981_v59  ;;  %vm2409_vm9 = vcmp.gt.f32.partialorder %v1461_v60, 0.0  ;;  %v2665_v3 = vmul.f32 0.1, %v1461_v60  ;;  %vm2537_vm10 = vcmp.gt.f32.partialorder %v1973_v61, 0.0 }
 0x121   :  { %v2923_v4 = vsel %vm2411_vm7, %v1469_v56, %v2667_v1  ;;  %v2793_v5 = vmul.f32 0.1, %v1973_v61  ;;  %v1482_v6 = vadd.f32 %v6142_v41, %v6979_v50  ;;  %v1994_v10 = vadd.f32 %v6270_v42, %v6979_v50  ;;  %v6146_v11 = vpop.f32.mrb[32].mxu0  ;;  %v6274_v12 = vpop.f32.mrb[32].mxu1 }
 0x122   :  { %v5276_v7 = vpack.c.bf16 %v2923_v4, %v2922_v45  ;;  %v3051_v8 = vsel %vm2539_vm8, %v1981_v59, %v2795_v2  ;;  %v2921_v9 = vsel %vm2409_vm9, %v1461_v60, %v2665_v3  ;;  %v1489_v16 = vpop.f32.mrb[33].mxu0  ;;  %v2001_v17 = vpop.f32.mrb[33].mxu1  ;;  %v1474_v22 = vadd.f32 %v6979_v50, %v1473_v47 }
 0x123   :  { %v5596_v13 = vpack.c.bf16 %v3051_v8, %v3050_v58  ;;  %v5271_v14 = vpack.c.bf16 %v2921_v9, %v2920_v63  ;;  %v3049_v15 = vsel %vm2537_vm10, %v1973_v61, %v2793_v5  ;;  %vm2414_vm11 = vcmp.gt.f32.partialorder %v1482_v6, 0.0  ;;  %v6147_v21 = vpop.f32.mrb[34].mxu0  ;;  %v6275_v26 = vpop.f32.mrb[34].mxu1 }
 0x124   :  { %5860 = vst [vmem:[%s8240_s3 + $0x68] sm:$0xff] %v5276_v7   ;;  %v5591_v18 = vpack.c.bf16 %v3049_v15, %v3048_v0  ;;  %v2670_v19 = vmul.f32 0.1, %v1482_v6  ;;  %vm2542_vm12 = vcmp.gt.f32.partialorder %v1994_v10, 0.0  ;;  %v2798_v20 = vmul.f32 0.1, %v1994_v10 }
 0x125   :  { %5924 = vst [vmem:[%s8240_s3 + $0x268] sm:$0xff] %v5596_v13   ;;  %5859 = vst [vmem:[%s8240_s3 + $0x60] sm:$0xff] %v5271_v14   ;;  %v1986_v23 = vadd.f32 %v6979_v50, %v1985_v48  ;;  %v1485_v24 = vadd.f32 %v6143_v52, %v6979_v50  ;;  %v1997_v25 = vadd.f32 %v6271_v53, %v6979_v50  ;;  %v1492_v27 = vpop.f32.mrb[35].mxu0  ;;  %v2004_v32 = vpop.f32.mrb[35].mxu1  ;;  %vm2412_vm13 = vcmp.gt.f32.partialorder %v1474_v22, 0.0 }
 0x126   :  { %5923 = vst [vmem:[%s8240_s3 + $0x260] sm:$0xff] %v5591_v18   ;;  %v2926_v28 = vsel %vm2414_vm11, %v1482_v6, %v2670_v19  ;;  %v3054_v29 = vsel %vm2542_vm12, %v1994_v10, %v2798_v20  ;;  %v1477_v30 = vadd.f32 %v6979_v50, %v1476_v57  ;;  %v1989_v31 = vadd.f32 %v6979_v50, %v1988_v62 }
 0x127   :  { %v2668_v33 = vmul.f32 0.1, %v1474_v22  ;;  %vm2540_vm14 = vcmp.gt.f32.partialorder %v1986_v23, 0.0  ;;  %v2796_v34 = vmul.f32 0.1, %v1986_v23  ;;  %vm2415_vm15 = vcmp.gt.f32.partialorder %v1485_v24, 0.0 }
 0x128   :  { %v2671_v35 = vmul.f32 0.1, %v1485_v24  ;;  %vm2543_vm1 = vcmp.gt.f32.partialorder %v1997_v25, 0.0  ;;  %v2799_v36 = vmul.f32 0.1, %v1997_v25  ;;  %vm2413_vm2 = vcmp.gt.f32.partialorder %v1477_v30, 0.0 }
 0x129   :  { %v2924_v37 = vsel %vm2412_vm13, %v1474_v22, %v2668_v33  ;;  %v3052_v38 = vsel %vm2540_vm14, %v1986_v23, %v2796_v34  ;;  %v2669_v39 = vmul.f32 0.1, %v1477_v30  ;;  %vm2541_vm3 = vcmp.gt.f32.partialorder %v1989_v31, 0.0  ;;  %v6150_v43 = vpop.f32.mrb[36].mxu0  ;;  %v6278_v44 = vpop.f32.mrb[36].mxu1 }
 0x12a   :  { %v2927_v40 = vsel %vm2415_vm15, %v1485_v24, %v2671_v35  ;;  %v3055_v41 = vsel %vm2543_vm1, %v1997_v25, %v2799_v36  ;;  %v2797_v42 = vmul.f32 0.1, %v1989_v31  ;;  %v1498_v48 = vadd.f32 %v6146_v11, %v6979_v50  ;;  %v7209_v49 = vpop.f32.mrb[37].mxu0  ;;  %v7211_v51 = vpop.f32.mrb[37].mxu1 }
 0x12b   :  { %v5286_v45 = vpack.c.bf16 %v2927_v40, %v2926_v28  ;;  %v5606_v46 = vpack.c.bf16 %v3055_v41, %v3054_v29  ;;  %v2925_v47 = vsel %vm2413_vm2, %v1477_v30, %v2669_v39  ;;  %v2010_v54 = vadd.f32 %v6274_v12, %v6979_v50  ;;  %v6151_v56 = vpop.f32.mrb[38].mxu0  ;;  %v6279_v57 = vpop.f32.mrb[38].mxu1 }
 0x12c   :  { %v5281_v52 = vpack.c.bf16 %v2925_v47, %v2924_v37  ;;  %v3053_v53 = vsel %vm2541_vm3, %v1989_v31, %v2797_v42  ;;  %v1490_v55 = vadd.f32 %v6979_v50, %v1489_v16  ;;  %vm2418_vm4 = vcmp.gt.f32.partialorder %v1498_v48, 0.0  ;;  %v1508_v61 = vpop.f32.mrb[39].mxu0  ;;  %v2020_v62 = vpop.f32.mrb[39].mxu1 }
 0x12d   :  { %5862 = vst [vmem:[%s8240_s3 + $0x78] sm:$0xff] %v5286_v45   ;;  %5926 = vst [vmem:[%s8240_s3 + $0x278] sm:$0xff] %v5606_v46   ;;  %v5601_v58 = vpack.c.bf16 %v3053_v53, %v3052_v38  ;;  %v2674_v59 = vmul.f32 0.1, %v1498_v48  ;;  %v2002_v60 = vadd.f32 %v6979_v50, %v2001_v17  ;;  %vm2546_vm5 = vcmp.gt.f32.partialorder %v2010_v54, 0.0 }
 0x12e   :  { %5861 = vst [vmem:[%s8240_s3 + $0x70] sm:$0xff] %v5281_v52   ;;  %v2802_v63 = vmul.f32 0.1, %v2010_v54  ;;  %vm2416_vm0 = vcmp.gt.f32.partialorder %v1490_v55, 0.0  ;;  %v2672_v0 = vmul.f32 0.1, %v1490_v55  ;;  %v1501_v3 = vadd.f32 %v6147_v21, %v6979_v50 }
 0x12f   :  { %5925 = vst [vmem:[%s8240_s3 + $0x270] sm:$0xff] %v5601_v58   ;;  %v2930_v1 = vsel %vm2418_vm4, %v1498_v48, %v2674_v59  ;;  %vm2544_vm6 = vcmp.gt.f32.partialorder %v2002_v60, 0.0  ;;  %v2800_v2 = vmul.f32 0.1, %v2002_v60  ;;  %v2013_v6 = vadd.f32 %v6275_v26, %v6979_v50  ;;  %v7272_v59 = vld [vmem:[%s8239_s2] ss:$0 sm:$0xff] }
 0x130   :  { %v3058_v4 = vsel %vm2546_vm5, %v2010_v54, %v2802_v63  ;;  %v2928_v5 = vsel %vm2416_vm0, %v1490_v55, %v2672_v0  ;;  %v1493_v7 = vadd.f32 %v6979_v50, %v1492_v27  ;;  %vm2419_vm7 = vcmp.gt.f32.partialorder %v1501_v3, 0.0 }
 0x131   :  { %v3056_v8 = vsel %vm2544_vm6, %v2002_v60, %v2800_v2  ;;  %v2675_v9 = vmul.f32 0.1, %v1501_v3  ;;  %v2005_v10 = vadd.f32 %v6979_v50, %v2004_v32  ;;  %vm2547_vm8 = vcmp.gt.f32.partialorder %v2013_v6, 0.0  ;;  %v6154_v16 = vpop.f32.mrb[40].mxu0  ;;  %v6282_v17 = vpop.f32.mrb[40].mxu1 }
 0x132   :  { %v2803_v11 = vmul.f32 0.1, %v2013_v6  ;;  %vm2417_vm9 = vcmp.gt.f32.partialorder %v1493_v7, 0.0  ;;  %v2673_v12 = vmul.f32 0.1, %v1493_v7  ;;  %v1514_v15 = vadd.f32 %v6150_v43, %v6979_v50  ;;  %v1521_v22 = vpop.f32.mrb[41].mxu0 }
 0x133   :  { %v2931_v13 = vsel %vm2419_vm7, %v1501_v3, %v2675_v9  ;;  %vm2545_vm10 = vcmp.gt.f32.partialorder %v2005_v10, 0.0  ;;  %v2801_v14 = vmul.f32 0.1, %v2005_v10  ;;  %v2026_v21 = vadd.f32 %v6278_v44, %v6979_v50  ;;  %v7234_v23 = vpop.f32.mrb[41].mxu1  ;;  %v7236_v27 = vpop.f32.mrb[42].mxu0 }
 0x134   :  { %v5296_v18 = vpack.c.bf16 %v2931_v13, %v2930_v1  ;;  %v3059_v19 = vsel %vm2547_vm8, %v2013_v6, %v2803_v11  ;;  %v2929_v20 = vsel %vm2417_vm9, %v1493_v7, %v2673_v12  ;;  %vm2422_vm11 = vcmp.gt.f32.partialorder %v1514_v15, 0.0  ;;  %v7238_v28 = vpop.f32.mrb[42].mxu1  ;;  %v7243_v32 = vpop.f32.mrb[43].mxu0 }
 0x135   :  { %v5616_v24 = vpack.c.bf16 %v3059_v19, %v3058_v4  ;;  %v5291_v25 = vpack.c.bf16 %v2929_v20, %v2928_v5  ;;  %v3057_v26 = vsel %vm2545_vm10, %v2005_v10, %v2801_v14  ;;  %v2678_v30 = vmul.f32 0.1, %v1514_v15  ;;  %v7257_v37 = vpop.f32.mrb[43].mxu1 }
 0x136   :  { %5864 = vst [vmem:[%s8240_s3 + $0x88] sm:$0xff] %v5296_v18   ;;  %v5611_v29 = vpack.c.bf16 %v3057_v26, %v3056_v8  ;;  %vm2550_vm12 = vcmp.gt.f32.partialorder %v2026_v21, 0.0  ;;  %v2806_v31 = vmul.f32 0.1, %v2026_v21  ;;  %v1506_v33 = vadd.f32 %v6979_v50, %v7209_v49 }
 0x137   :  { %5928 = vst [vmem:[%s8240_s3 + $0x288] sm:$0xff] %v5616_v24   ;;  %5863 = vst [vmem:[%s8240_s3 + $0x80] sm:$0xff] %v5291_v25   ;;  %v2018_v34 = vadd.f32 %v6979_v50, %v7211_v51  ;;  %v1517_v35 = vadd.f32 %v6151_v56, %v6979_v50  ;;  %v2029_v36 = vadd.f32 %v6279_v57, %v6979_v50 }
 0x138   :  { %5927 = vst [vmem:[%s8240_s3 + $0x280] sm:$0xff] %v5611_v29   ;;  %v2934_v38 = vsel %vm2422_vm11, %v1514_v15, %v2678_v30  ;;  %v3062_v39 = vsel %vm2550_vm12, %v2026_v21, %v2806_v31  ;;  %v1509_v40 = vadd.f32 %v6979_v50, %v1508_v61  ;;  %v2021_v41 = vadd.f32 %v6979_v50, %v2020_v62 }
 0x139   :  { %vm2420_vm13 = vcmp.gt.f32.partialorder %v1506_v33, 0.0  ;;  %v2676_v42 = vmul.f32 0.1, %v1506_v33  ;;  %vm2548_vm14 = vcmp.gt.f32.partialorder %v2018_v34, 0.0  ;;  %v2804_v43 = vmul.f32 0.1, %v2018_v34 }
 0x13a   :  { %vm2423_vm15 = vcmp.gt.f32.partialorder %v1517_v35, 0.0  ;;  %v2679_v44 = vmul.f32 0.1, %v1517_v35  ;;  %vm2551_vm1 = vcmp.gt.f32.partialorder %v2029_v36, 0.0  ;;  %v2807_v45 = vmul.f32 0.1, %v2029_v36 }
 0x13b   :  { %v2932_v46 = vsel %vm2420_vm13, %v1506_v33, %v2676_v42  ;;  %v3060_v47 = vsel %vm2548_vm14, %v2018_v34, %v2804_v43  ;;  %vm2421_vm2 = vcmp.gt.f32.partialorder %v1509_v40, 0.0  ;;  %v2677_v48 = vmul.f32 0.1, %v1509_v40  ;;  %v6158_v49 = vpop.f32.mrb[44].mxu0  ;;  %v6286_v51 = vpop.f32.mrb[44].mxu1 }
 0x13c   :  { %v2935_v52 = vsel %vm2423_vm15, %v1517_v35, %v2679_v44  ;;  %v3063_v53 = vsel %vm2551_vm1, %v2029_v36, %v2807_v45  ;;  %vm2549_vm3 = vcmp.gt.f32.partialorder %v2021_v41, 0.0  ;;  %v2805_v54 = vmul.f32 0.1, %v2021_v41  ;;  %v7265_v55 = vpop.f32.mrb[45].mxu0  ;;  %v7267_v50 = vpop.f32.mrb[45].mxu1 }
 0x13d   :  { %v5306_v56 = vpack.c.bf16 %v2935_v52, %v2934_v38  ;;  %v5626_v57 = vpack.c.bf16 %v3063_v53, %v3062_v39  ;;  %v2933_v58 = vsel %vm2421_vm2, %v1509_v40, %v2677_v48  ;;  %v1530_v60 = vadd.f32 %v7272_v59, %v6154_v16  ;;  %v7275_v61 = vpop.f32.mrb[46].mxu0  ;;  %v7277_v62 = vpop.f32.mrb[46].mxu1 }
 0x13e   :  { %v5301_v63 = vpack.c.bf16 %v2933_v58, %v2932_v46  ;;  %v3061_v0 = vsel %vm2549_vm3, %v2021_v41, %v2805_v54  ;;  %v2042_v1 = vadd.f32 %v7272_v59, %v6282_v17  ;;  %v1522_v2 = vadd.f32 %v7272_v59, %v1521_v22  ;;  %v7281_v3 = vpop.f32.mrb[47].mxu0  ;;  %v7283_v4 = vpop.f32.mrb[47].mxu1 }
 0x13f   :  { %5866 = vst [vmem:[%s8240_s3 + $0x98] sm:$0xff] %v5306_v56   ;;  %5930 = vst [vmem:[%s8240_s3 + $0x298] sm:$0xff] %v5626_v57   ;;  %v5621_v5 = vpack.c.bf16 %v3061_v0, %v3060_v47  ;;  %vm2426_vm4 = vcmp.gt.f32.partialorder %v1530_v60, 0.0  ;;  %v2682_v6 = vmul.f32 0.1, %v1530_v60  ;;  %v2034_v7 = vadd.f32 %v7272_v59, %v7234_v23 }
 0x140   :  { %5865 = vst [vmem:[%s8240_s3 + $0x90] sm:$0xff] %v5301_v63   ;;  %vm2554_vm5 = vcmp.gt.f32.partialorder %v2042_v1, 0.0  ;;  %v2810_v8 = vmul.f32 0.1, %v2042_v1  ;;  %vm2424_vm0 = vcmp.gt.f32.partialorder %v1522_v2, 0.0  ;;  %v1533_v12 = vadd.f32 %v7272_v59, %v7236_v27 }
 0x141   :  { %v2680_v9 = vmul.f32 0.1, %v1522_v2  ;;  %5929 = vst [vmem:[%s8240_s3 + $0x290] sm:$0xff] %v5621_v5   ;;  %v2938_v10 = vsel %vm2426_vm4, %v1530_v60, %v2682_v6  ;;  %vm2552_vm6 = vcmp.gt.f32.partialorder %v2034_v7, 0.0  ;;  %v2808_v11 = vmul.f32 0.1, %v2034_v7 }
 0x142   :  { %v3066_v13 = vsel %vm2554_vm5, %v2042_v1, %v2810_v8  ;;  %v2045_v15 = vadd.f32 %v7272_v59, %v7238_v28  ;;  %v1525_v16 = vadd.f32 %v7272_v59, %v7243_v32  ;;  %v7305_v17 = vpop.f32.mrb[48].mxu0  ;;  %v7307_v18 = vpop.f32.mrb[48].mxu1  ;;  %vm2427_vm7 = vcmp.gt.f32.partialorder %v1533_v12, 0.0 }
 0x143   :  { %v2936_v14 = vsel %vm2424_vm0, %v1522_v2, %v2680_v9  ;;  %v3064_v19 = vsel %vm2552_vm6, %v2034_v7, %v2808_v11  ;;  %v2683_v20 = vmul.f32 0.1, %v1533_v12  ;;  %v2037_v21 = vadd.f32 %v7272_v59, %v7257_v37  ;;  %v7311_v22 = vpop.f32.mrb[49].mxu0  ;;  %v7313_v23 = vpop.f32.mrb[49].mxu1 }
 0x144   :  { %vm2555_vm8 = vcmp.gt.f32.partialorder %v2045_v15, 0.0  ;;  %v2811_v24 = vmul.f32 0.1, %v2045_v15  ;;  %vm2425_vm9 = vcmp.gt.f32.partialorder %v1525_v16, 0.0  ;;  %v2681_v25 = vmul.f32 0.1, %v1525_v16 }
 0x145   :  { %v2939_v26 = vsel %vm2427_vm7, %v1533_v12, %v2683_v20  ;;  %vm2553_vm10 = vcmp.gt.f32.partialorder %v2037_v21, 0.0  ;;  %v2809_v27 = vmul.f32 0.1, %v2037_v21  ;;  %v1546_v28 = vadd.f32 %v7272_v59, %v6158_v49  ;;  %v7316_v29 = vpop.f32.mrb[50].mxu0  ;;  %v7318_v30 = vpop.f32.mrb[50].mxu1 }
 0x146   :  { %v5316_v31 = vpack.c.bf16 %v2939_v26, %v2938_v10  ;;  %v3067_v32 = vsel %vm2555_vm8, %v2045_v15, %v2811_v24  ;;  %v2937_v33 = vsel %vm2425_vm9, %v1525_v16, %v2681_v25  ;;  %v2058_v34 = vadd.f32 %v7272_v59, %v6286_v51  ;;  %v7321_v35 = vpop.f32.mrb[51].mxu0  ;;  %v7323_v36 = vpop.f32.mrb[51].mxu1 }
 0x147   :  { %v5636_v37 = vpack.c.bf16 %v3067_v32, %v3066_v13  ;;  %v5311_v38 = vpack.c.bf16 %v2937_v33, %v2936_v14  ;;  %v3065_v39 = vsel %vm2553_vm10, %v2037_v21, %v2809_v27  ;;  %vm2430_vm11 = vcmp.gt.f32.partialorder %v1546_v28, 0.0 }
 0x148   :  { %5868 = vst [vmem:[%s8240_s3 + $0xa8] sm:$0xff] %v5316_v31   ;;  %v5631_v40 = vpack.c.bf16 %v3065_v39, %v3064_v19  ;;  %v2686_v41 = vmul.f32 0.1, %v1546_v28  ;;  %vm2558_vm12 = vcmp.gt.f32.partialorder %v2058_v34, 0.0  ;;  %v2814_v42 = vmul.f32 0.1, %v2058_v34 }
 0x149   :  { %5932 = vst [vmem:[%s8240_s3 + $0x2a8] sm:$0xff] %v5636_v37   ;;  %5867 = vst [vmem:[%s8240_s3 + $0xa0] sm:$0xff] %v5311_v38   ;;  %v1538_v43 = vadd.f32 %v7272_v59, %v7265_v55  ;;  %v2050_v44 = vadd.f32 %v7272_v59, %v7267_v50  ;;  %v1549_v45 = vadd.f32 %v7272_v59, %v7275_v61  ;;  %v7349_v52 = vpop.f32.mrb[52].mxu0  ;;  %v7351_v53 = vpop.f32.mrb[52].mxu1 }
 0x14a   :  { %v2061_v46 = vadd.f32 %v7272_v59, %v7277_v62  ;;  %5931 = vst [vmem:[%s8240_s3 + $0x2a0] sm:$0xff] %v5631_v40   ;;  %v2942_v47 = vsel %vm2430_vm11, %v1546_v28, %v2686_v41  ;;  %v3070_v48 = vsel %vm2558_vm12, %v2058_v34, %v2814_v42  ;;  %v1541_v49 = vadd.f32 %v7272_v59, %v7281_v3  ;;  %v7353_v61 = vpop.f32.mrb[53].mxu0  ;;  %v7355_v62 = vpop.f32.mrb[53].mxu1 }
 0x14b   :  { %v2053_v51 = vadd.f32 %v7272_v59, %v7283_v4  ;;  %vm2428_vm13 = vcmp.gt.f32.partialorder %v1538_v43, 0.0  ;;  %v2684_v54 = vmul.f32 0.1, %v1538_v43  ;;  %vm2556_vm14 = vcmp.gt.f32.partialorder %v2050_v44, 0.0  ;;  %v7357_v2 = vpop.f32.mrb[54].mxu0  ;;  %v7359_v3 = vpop.f32.mrb[54].mxu1 }
 0x14c   :  { %v2812_v55 = vmul.f32 0.1, %v2050_v44  ;;  %vm2431_vm15 = vcmp.gt.f32.partialorder %v1549_v45, 0.0  ;;  %v2687_v50 = vmul.f32 0.1, %v1549_v45  ;;  %vm2559_vm1 = vcmp.gt.f32.partialorder %v2061_v46, 0.0 }
 0x14d   :  { %v2815_v56 = vmul.f32 0.1, %v2061_v46  ;;  %v2940_v57 = vsel %vm2428_vm13, %v1538_v43, %v2684_v54  ;;  %vm2429_vm2 = vcmp.gt.f32.partialorder %v1541_v49, 0.0  ;;  %v2685_v60 = vmul.f32 0.1, %v1541_v49  ;;  %v7363_v8 = vpop.f32.mrb[55].mxu0 }
 0x14e   :  { %v3068_v58 = vsel %vm2556_vm14, %v2050_v44, %v2812_v55  ;;  %v2943_v63 = vsel %vm2431_vm15, %v1549_v45, %v2687_v50  ;;  %vm2557_vm3 = vcmp.gt.f32.partialorder %v2053_v51, 0.0  ;;  %v2813_v1 = vmul.f32 0.1, %v2053_v51  ;;  %v7365_v9 = vpop.f32.mrb[55].mxu1 }
 0x14f   :  { %v3071_v0 = vsel %vm2559_vm1, %v2061_v46, %v2815_v56  ;;  %v5326_v4 = vpack.c.bf16 %v2943_v63, %v2942_v47  ;;  %v2941_v6 = vsel %vm2429_vm2, %v1541_v49, %v2685_v60  ;;  %v1562_v7 = vadd.f32 %v7272_v59, %v7305_v17 }
 0x150   :  { %v5646_v5 = vpack.c.bf16 %v3071_v0, %v3070_v48  ;;  %v5321_v10 = vpack.c.bf16 %v2941_v6, %v2940_v57  ;;  %v3069_v11 = vsel %vm2557_vm3, %v2053_v51, %v2813_v1  ;;  %v2074_v12 = vadd.f32 %v7272_v59, %v7307_v18 }
 0x151   :  { %v1554_v13 = vadd.f32 %v7272_v59, %v7311_v22  ;;  %5870 = vst [vmem:[%s8240_s3 + $0xb8] sm:$0xff] %v5326_v4   ;;  %v5641_v14 = vpack.c.bf16 %v3069_v11, %v3068_v58  ;;  %vm2434_vm4 = vcmp.gt.f32.partialorder %v1562_v7, 0.0  ;;  %v2690_v15 = vmul.f32 0.1, %v1562_v7  ;;  %v7387_v22 = vpop.f32.mrb[56].mxu0 }
 0x152   :  { %5934 = vst [vmem:[%s8240_s3 + $0x2b8] sm:$0xff] %v5646_v5   ;;  %v2066_v16 = vadd.f32 %v7272_v59, %v7313_v23  ;;  %5869 = vst [vmem:[%s8240_s3 + $0xb0] sm:$0xff] %v5321_v10   ;;  %vm2562_vm5 = vcmp.gt.f32.partialorder %v2074_v12, 0.0  ;;  %v2818_v17 = vmul.f32 0.1, %v2074_v12  ;;  %v1565_v21 = vadd.f32 %v7272_v59, %v7316_v29  ;;  %v7389_v23 = vpop.f32.mrb[56].mxu1 }
 0x153   :  { %vm2432_vm0 = vcmp.gt.f32.partialorder %v1554_v13, 0.0  ;;  %v2688_v18 = vmul.f32 0.1, %v1554_v13  ;;  %5933 = vst [vmem:[%s8240_s3 + $0x2b0] sm:$0xff] %v5641_v14   ;;  %v2946_v19 = vsel %vm2434_vm4, %v1562_v7, %v2690_v15  ;;  %v2077_v26 = vadd.f32 %v7272_v59, %v7318_v30  ;;  %v7395_v28 = vpop.f32.mrb[57].mxu0  ;;  %v7397_v31 = vpop.f32.mrb[57].mxu1 }
 0x154   :  { %vm2560_vm6 = vcmp.gt.f32.partialorder %v2066_v16, 0.0  ;;  %v2816_v20 = vmul.f32 0.1, %v2066_v16  ;;  %v3074_v24 = vsel %vm2562_vm5, %v2074_v12, %v2818_v17  ;;  %v1557_v27 = vadd.f32 %v7272_v59, %v7321_v35  ;;  %v7401_v34 = vpop.f32.mrb[58].mxu0  ;;  %v7403_v37 = vpop.f32.mrb[58].mxu1 }
 0x155   :  { %v2944_v25 = vsel %vm2432_vm0, %v1554_v13, %v2688_v18  ;;  %vm2435_vm7 = vcmp.gt.f32.partialorder %v1565_v21, 0.0  ;;  %v2691_v33 = vmul.f32 0.1, %v1565_v21  ;;  %v2069_v29 = vadd.f32 %v7272_v59, %v7323_v36  ;;  %v7407_v41 = vpop.f32.mrb[59].mxu0  ;;  %v7409_v42 = vpop.f32.mrb[59].mxu1 }
 0x156   :  { %v3072_v32 = vsel %vm2560_vm6, %v2066_v16, %v2816_v20  ;;  %vm2563_vm8 = vcmp.gt.f32.partialorder %v2077_v26, 0.0  ;;  %v2819_v38 = vmul.f32 0.1, %v2077_v26  ;;  %vm2433_vm9 = vcmp.gt.f32.partialorder %v1557_v27, 0.0 }
 0x157   :  { %v2689_v30 = vmul.f32 0.1, %v1557_v27  ;;  %v2947_v39 = vsel %vm2435_vm7, %v1565_v21, %v2691_v33  ;;  %vm2561_vm10 = vcmp.gt.f32.partialorder %v2069_v29, 0.0  ;;  %v2817_v35 = vmul.f32 0.1, %v2069_v29 }
 0x158   :  { %v1578_v40 = vadd.f32 %v7272_v59, %v7349_v52  ;;  %v5336_v43 = vpack.c.bf16 %v2947_v39, %v2946_v19  ;;  %v3075_v36 = vsel %vm2563_vm8, %v2077_v26, %v2819_v38  ;;  %v2090_v45 = vadd.f32 %v7272_v59, %v7351_v53 }
 0x159   :  { %v2945_v44 = vsel %vm2433_vm9, %v1557_v27, %v2689_v30  ;;  %v5656_v46 = vpack.c.bf16 %v3075_v36, %v3074_v24  ;;  %v3073_v48 = vsel %vm2561_vm10, %v2069_v29, %v2817_v35  ;;  %v7416_v54 = vpop.f32.mrb[60].mxu0  ;;  %v1570_v53 = vadd.f32 %v7272_v59, %v7353_v61  ;;  %v7432_v57 = vpop.f32.mrb[60].mxu1 }
 0x15a   :  { %v5331_v47 = vpack.c.bf16 %v2945_v44, %v2944_v25  ;;  %vm2438_vm11 = vcmp.gt.f32.partialorder %v1578_v40, 0.0  ;;  %5872 = vst [vmem:[%s8240_s3 + $0xc8] sm:$0xff] %v5336_v43   ;;  %v5651_v49 = vpack.c.bf16 %v3073_v48, %v3072_v32  ;;  %v2694_v51 = vmul.f32 0.1, %v1578_v40  ;;  %v7434_v58 = vpop.f32.mrb[61].mxu0  ;;  %v7444_v0 = vpop.f32.mrb[61].mxu1 }
 0x15b   :  { %vm2566_vm12 = vcmp.gt.f32.partialorder %v2090_v45, 0.0  ;;  %v2822_v52 = vmul.f32 0.1, %v2090_v45  ;;  %5936 = vst [vmem:[%s8240_s3 + $0x2c8] sm:$0xff] %v5656_v46   ;;  %v2082_v55 = vadd.f32 %v7272_v59, %v7355_v62  ;;  %v1581_v50 = vadd.f32 %v7272_v59, %v7357_v2  ;;  %v7446_v1 = vpop.f32.mrb[62].mxu0 }
 0x15c   :  { %5871 = vst [vmem:[%s8240_s3 + $0xc0] sm:$0xff] %v5331_v47   ;;  %v2093_v56 = vadd.f32 %v7272_v59, %v7359_v3  ;;  %5935 = vst [vmem:[%s8240_s3 + $0x2c0] sm:$0xff] %v5651_v49   ;;  %v2950_v60 = vsel %vm2438_vm11, %v1578_v40, %v2694_v51  ;;  %v1573_v62 = vadd.f32 %v7272_v59, %v7363_v8  ;;  %vm2436_vm13 = vcmp.gt.f32.partialorder %v1570_v53, 0.0  ;;  %v7448_v8 = vpop.f32.mrb[62].mxu1  ;;  %v7450_v11 = vpop.f32.mrb[63].mxu0 }
 0x15d   :  { %v3078_v61 = vsel %vm2566_vm12, %v2090_v45, %v2822_v52  ;;  %v2085_v63 = vadd.f32 %v7272_v59, %v7365_v9  ;;  %v2692_v2 = vmul.f32 0.1, %v1570_v53  ;;  %vm2564_vm14 = vcmp.gt.f32.partialorder %v2082_v55, 0.0  ;;  %v7452_v14 = vpop.f32.mrb[63].mxu1 }
 0x15e   :  { %v2820_v3 = vmul.f32 0.1, %v2082_v55  ;;  %vm2439_vm15 = vcmp.gt.f32.partialorder %v1581_v50, 0.0  ;;  %v2695_v4 = vmul.f32 0.1, %v1581_v50  ;;  %vm2567_vm1 = vcmp.gt.f32.partialorder %v2093_v56, 0.0 }
 0x15f   :  { %v2823_v5 = vmul.f32 0.1, %v2093_v56  ;;  %v2948_v6 = vsel %vm2436_vm13, %v1570_v53, %v2692_v2  ;;  %vm2437_vm2 = vcmp.gt.f32.partialorder %v1573_v62, 0.0  ;;  %v2693_v10 = vmul.f32 0.1, %v1573_v62 }
 0x160   :  { %v3076_v7 = vsel %vm2564_vm14, %v2082_v55, %v2820_v3  ;;  %v2951_v9 = vsel %vm2439_vm15, %v1581_v50, %v2695_v4  ;;  %vm2565_vm3 = vcmp.gt.f32.partialorder %v2085_v63, 0.0  ;;  %v2821_v13 = vmul.f32 0.1, %v2085_v63 }
 0x161   :  { %v3079_v12 = vsel %vm2567_vm1, %v2093_v56, %v2823_v5  ;;  %v5346_v15 = vpack.c.bf16 %v2951_v9, %v2950_v60  ;;  %v2949_v17 = vsel %vm2437_vm2, %v1573_v62, %v2693_v10  ;;  %v1594_v18 = vadd.f32 %v7272_v59, %v7387_v22  ;;  %v7460_v25 = vpop.f32.mrb[64].mxu0  ;;  %v7462_v26 = vpop.f32.mrb[64].mxu1 }
 0x162   :  { %v5666_v16 = vpack.c.bf16 %v3079_v12, %v3078_v61  ;;  %v5341_v19 = vpack.c.bf16 %v2949_v17, %v2948_v6  ;;  %v3077_v20 = vsel %vm2565_vm3, %v2085_v63, %v2821_v13  ;;  %v2106_v21 = vadd.f32 %v7272_v59, %v7389_v23  ;;  %v7472_v32 = vpop.f32.mrb[65].mxu0 }
 0x163   :  { %v1586_v24 = vadd.f32 %v7272_v59, %v7395_v28  ;;  %5874 = vst [vmem:[%s8240_s3 + $0xd8] sm:$0xff] %v5346_v15   ;;  %v5661_v22 = vpack.c.bf16 %v3077_v20, %v3076_v7  ;;  %vm2442_vm4 = vcmp.gt.f32.partialorder %v1594_v18, 0.0  ;;  %v2698_v27 = vmul.f32 0.1, %v1594_v18  ;;  %v7474_v28 = vpop.f32.mrb[65].mxu1  ;;  %v7484_v39 = vpop.f32.mrb[66].mxu0 }
 0x164   :  { %5938 = vst [vmem:[%s8240_s3 + $0x2d8] sm:$0xff] %v5666_v16   ;;  %v2098_v23 = vadd.f32 %v7272_v59, %v7397_v31  ;;  %5873 = vst [vmem:[%s8240_s3 + $0xd0] sm:$0xff] %v5341_v19   ;;  %vm2570_vm5 = vcmp.gt.f32.partialorder %v2106_v21, 0.0  ;;  %v2826_v33 = vmul.f32 0.1, %v2106_v21  ;;  %v1597_v31 = vadd.f32 %v7272_v59, %v7401_v34  ;;  %v7486_v35 = vpop.f32.mrb[66].mxu1 }
 0x165   :  { %vm2440_vm0 = vcmp.gt.f32.partialorder %v1586_v24, 0.0  ;;  %v2696_v29 = vmul.f32 0.1, %v1586_v24  ;;  %5937 = vst [vmem:[%s8240_s3 + $0x2d0] sm:$0xff] %v5661_v22   ;;  %v2954_v38 = vsel %vm2442_vm4, %v1594_v18, %v2698_v27  ;;  %v2109_v36 = vadd.f32 %v7272_v59, %v7403_v37  ;;  %v7492_v45 = vpop.f32.mrb[67].mxu0  ;;  %v7494_v46 = vpop.f32.mrb[67].mxu1 }
 0x166   :  { %vm2568_vm6 = vcmp.gt.f32.partialorder %v2098_v23, 0.0  ;;  %v2824_v30 = vmul.f32 0.1, %v2098_v23  ;;  %v3082_v40 = vsel %vm2570_vm5, %v2106_v21, %v2826_v33  ;;  %v1589_v44 = vadd.f32 %v7272_v59, %v7407_v41 }
 0x167   :  { %v2952_v43 = vsel %vm2440_vm0, %v1586_v24, %v2696_v29  ;;  %vm2443_vm7 = vcmp.gt.f32.partialorder %v1597_v31, 0.0  ;;  %v2699_v48 = vmul.f32 0.1, %v1597_v31  ;;  %v2101_v34 = vadd.f32 %v7272_v59, %v7409_v42 }
 0x168   :  { %v3080_v47 = vsel %vm2568_vm6, %v2098_v23, %v2824_v30  ;;  %vm2571_vm8 = vcmp.gt.f32.partialorder %v2109_v36, 0.0  ;;  %v2827_v49 = vmul.f32 0.1, %v2109_v36  ;;  %vm2441_vm9 = vcmp.gt.f32.partialorder %v1589_v44, 0.0 }
 0x169   :  { %v2697_v51 = vmul.f32 0.1, %v1589_v44  ;;  %v2955_v52 = vsel %vm2443_vm7, %v1597_v31, %v2699_v48  ;;  %vm2569_vm10 = vcmp.gt.f32.partialorder %v2101_v34, 0.0  ;;  %v2825_v37 = vmul.f32 0.1, %v2101_v34  ;;  %v7502_v60 = vpop.f32.mrb[68].mxu0 }
 0x16a   :  { %v1610_v41 = vadd.f32 %v7272_v59, %v7416_v54  ;;  %v5356_v53 = vpack.c.bf16 %v2955_v52, %v2954_v38  ;;  %v3083_v55 = vsel %vm2571_vm8, %v2109_v36, %v2827_v49  ;;  %v2122_v56 = vadd.f32 %v7272_v59, %v7432_v57  ;;  %v7504_v61 = vpop.f32.mrb[68].mxu1  ;;  %v7506_v2 = vpop.f32.mrb[69].mxu0 }
 0x16b   :  { %v2953_v50 = vsel %vm2441_vm9, %v1589_v44, %v2697_v51  ;;  %v5676_v42 = vpack.c.bf16 %v3083_v55, %v3082_v40  ;;  %v3081_v63 = vsel %vm2569_vm10, %v2101_v34, %v2825_v37  ;;  %v7508_v3 = vpop.f32.mrb[69].mxu1  ;;  %v7513_v5 = vpop.f32.mrb[70].mxu0  ;;  %v1602_v6 = vadd.f32 %v7272_v59, %v7434_v58 }
 0x16c   :  { %v5351_v62 = vpack.c.bf16 %v2953_v50, %v2952_v43  ;;  %vm2446_vm11 = vcmp.gt.f32.partialorder %v1610_v41, 0.0  ;;  %5876 = vst [vmem:[%s8240_s3 + $0xe8] sm:$0xff] %v5356_v53   ;;  %v5671_v54 = vpack.c.bf16 %v3081_v63, %v3080_v47  ;;  %v2702_v4 = vmul.f32 0.1, %v1610_v41  ;;  %v7529_v12 = vpop.f32.mrb[70].mxu1  ;;  %v7531_v13 = vpop.f32.mrb[71].mxu0 }
 0x16d   :  { %vm2574_vm12 = vcmp.gt.f32.partialorder %v2122_v56, 0.0  ;;  %v2830_v57 = vmul.f32 0.1, %v2122_v56  ;;  %5940 = vst [vmem:[%s8240_s3 + $0x2e8] sm:$0xff] %v5676_v42   ;;  %v2114_v7 = vadd.f32 %v7272_v59, %v7444_v0  ;;  %v1613_v10 = vadd.f32 %v7272_v59, %v7446_v1  ;;  %v7541_v16 = vpop.f32.mrb[71].mxu1 }
 0x16e   :  { %5875 = vst [vmem:[%s8240_s3 + $0xe0] sm:$0xff] %v5351_v62   ;;  %v2125_v9 = vadd.f32 %v7272_v59, %v7448_v8  ;;  %5939 = vst [vmem:[%s8240_s3 + $0x2e0] sm:$0xff] %v5671_v54   ;;  %v2958_v15 = vsel %vm2446_vm11, %v1610_v41, %v2702_v4  ;;  %v1605_v0 = vadd.f32 %v7272_v59, %v7450_v11  ;;  %vm2444_vm13 = vcmp.gt.f32.partialorder %v1602_v6, 0.0 }
 0x16f   :  { %v3086_v58 = vsel %vm2574_vm12, %v2122_v56, %v2830_v57  ;;  %v2117_v1 = vadd.f32 %v7272_v59, %v7452_v14  ;;  %v2700_v8 = vmul.f32 0.1, %v1602_v6  ;;  %vm2572_vm14 = vcmp.gt.f32.partialorder %v2114_v7, 0.0 }
 0x170   :  { %v2828_v17 = vmul.f32 0.1, %v2114_v7  ;;  %vm2447_vm15 = vcmp.gt.f32.partialorder %v1613_v10, 0.0  ;;  %v2703_v18 = vmul.f32 0.1, %v1613_v10  ;;  %vm2575_vm1 = vcmp.gt.f32.partialorder %v2125_v9, 0.0 }
 0x171   :  { %v2831_v19 = vmul.f32 0.1, %v2125_v9  ;;  %v2956_v20 = vsel %vm2444_vm13, %v1602_v6, %v2700_v8  ;;  %vm2445_vm2 = vcmp.gt.f32.partialorder %v1605_v0, 0.0  ;;  %v2701_v24 = vmul.f32 0.1, %v1605_v0  ;;  %v7543_v23 = vpop.f32.mrb[72].mxu0 }
 0x172   :  { %v3084_v21 = vsel %vm2572_vm14, %v2114_v7, %v2828_v17  ;;  %v2959_v22 = vsel %vm2447_vm15, %v1613_v10, %v2703_v18  ;;  %vm2573_vm3 = vcmp.gt.f32.partialorder %v2117_v1, 0.0  ;;  %v2829_v11 = vmul.f32 0.1, %v2117_v1  ;;  %v7545_v14 = vpop.f32.mrb[72].mxu1  ;;  %v7549_v31 = vpop.f32.mrb[73].mxu0 }
 0x173   :  { %v3087_v27 = vsel %vm2575_vm1, %v2125_v9, %v2831_v19  ;;  %v5366_v33 = vpack.c.bf16 %v2959_v22, %v2958_v15  ;;  %v2957_v38 = vsel %vm2445_vm2, %v1605_v0, %v2701_v24  ;;  %v1626_v30 = vadd.f32 %v7272_v59, %v7460_v25  ;;  %v7551_v40 = vpop.f32.mrb[73].mxu1  ;;  %v7557_v48 = vpop.f32.mrb[74].mxu0 }
 0x174   :  { %v5686_v29 = vpack.c.bf16 %v3087_v27, %v3086_v58  ;;  %v5361_v43 = vpack.c.bf16 %v2957_v38, %v2956_v20  ;;  %v3085_v36 = vsel %vm2573_vm3, %v2117_v1, %v2829_v11  ;;  %v2138_v44 = vadd.f32 %v7272_v59, %v7462_v26  ;;  %v7559_v34 = vpop.f32.mrb[74].mxu1  ;;  %v7569_v51 = vpop.f32.mrb[75].mxu0 }
 0x175   :  { %v1618_v47 = vadd.f32 %v7272_v59, %v7472_v32  ;;  %5878 = vst [vmem:[%s8240_s3 + $0xf8] sm:$0xff] %v5366_v33   ;;  %v5681_v25 = vpack.c.bf16 %v3085_v36, %v3084_v21  ;;  %vm2450_vm4 = vcmp.gt.f32.partialorder %v1626_v30, 0.0  ;;  %v2706_v49 = vmul.f32 0.1, %v1626_v30  ;;  %v7571_v32 = vpop.f32.mrb[75].mxu1 }
 0x176   :  { %5942 = vst [vmem:[%s8240_s3 + $0x2f8] sm:$0xff] %v5686_v29   ;;  %v2130_v26 = vadd.f32 %v7272_v59, %v7474_v28  ;;  %5877 = vst [vmem:[%s8240_s3 + $0xf0] sm:$0xff] %v5361_v43   ;;  %vm2578_vm5 = vcmp.gt.f32.partialorder %v2138_v44, 0.0  ;;  %v2834_v52 = vmul.f32 0.1, %v2138_v44  ;;  %v1629_v28 = vadd.f32 %v7272_v59, %v7484_v39 }
 0x177   :  { %vm2448_vm0 = vcmp.gt.f32.partialorder %v1618_v47, 0.0  ;;  %v2704_v37 = vmul.f32 0.1, %v1618_v47  ;;  %5941 = vst [vmem:[%s8240_s3 + $0x2f0] sm:$0xff] %v5681_v25   ;;  %v2962_v41 = vsel %vm2450_vm4, %v1626_v30, %v2706_v49  ;;  %v2141_v56 = vadd.f32 %v7272_v59, %v7486_v35 }
 0x178   :  { %vm2576_vm6 = vcmp.gt.f32.partialorder %v2130_v26, 0.0  ;;  %v2832_v53 = vmul.f32 0.1, %v2130_v26  ;;  %v3090_v55 = vsel %vm2578_vm5, %v2138_v44, %v2834_v52  ;;  %v1621_v42 = vadd.f32 %v7272_v59, %v7492_v45 }
 0x179   :  { %v2960_v50 = vsel %vm2448_vm0, %v1618_v47, %v2704_v37  ;;  %vm2451_vm7 = vcmp.gt.f32.partialorder %v1629_v28, 0.0  ;;  %v2707_v63 = vmul.f32 0.1, %v1629_v28  ;;  %v2133_v54 = vadd.f32 %v7272_v59, %v7494_v46  ;;  %v7589_v35 = vpop.f32.mrb[76].mxu0  ;;  %v7591_v10 = vpop.f32.mrb[76].mxu1 }
 0x17a   :  { %v3088_v62 = vsel %vm2576_vm6, %v2130_v26, %v2832_v53  ;;  %vm2579_vm8 = vcmp.gt.f32.partialorder %v2141_v56, 0.0  ;;  %v2835_v4 = vmul.f32 0.1, %v2141_v56  ;;  %vm2449_vm9 = vcmp.gt.f32.partialorder %v1621_v42, 0.0  ;;  %v7595_v58 = vpop.f32.mrb[77].mxu0  ;;  %v7597_v0 = vpop.f32.mrb[77].mxu1 }
 0x17b   :  { %v2705_v57 = vmul.f32 0.1, %v1621_v42  ;;  %v2963_v6 = vsel %vm2451_vm7, %v1629_v28, %v2707_v63  ;;  %vm2577_vm10 = vcmp.gt.f32.partialorder %v2133_v54, 0.0  ;;  %v2833_v39 = vmul.f32 0.1, %v2133_v54  ;;  %v7599_v18 = vpop.f32.mrb[78].mxu0 }
 0x17c   :  { %v1642_v7 = vadd.f32 %v7272_v59, %v7502_v60  ;;  %v5376_v45 = vpack.c.bf16 %v2963_v6, %v2962_v41  ;;  %v3091_v9 = vsel %vm2579_vm8, %v2141_v56, %v2835_v4  ;;  %v2154_v46 = vadd.f32 %v7272_v59, %v7504_v61  ;;  %v7601_v60 = vpop.f32.mrb[78].mxu1  ;;  %v7606_v21 = vpop.f32.mrb[79].mxu0 }
 0x17d   :  { %v2961_v15 = vsel %vm2449_vm9, %v1621_v42, %v2705_v57  ;;  %v5696_v1 = vpack.c.bf16 %v3091_v9, %v3090_v55  ;;  %v3089_v17 = vsel %vm2577_vm10, %v2133_v54, %v2833_v39  ;;  %v1634_v24 = vadd.f32 %v7272_v59, %v7506_v2  ;;  %v7622_v33 = vpop.f32.mrb[79].mxu1 }
 0x17e   :  { %v5371_v8 = vpack.c.bf16 %v2961_v15, %v2960_v50  ;;  %vm2454_vm11 = vcmp.gt.f32.partialorder %v1642_v7, 0.0  ;;  %5880 = vst [vmem:[%s8240_s3 + $0x108] sm:$0xff] %v5376_v45   ;;  %v5691_v19 = vpack.c.bf16 %v3089_v17, %v3088_v62  ;;  %v2710_v20 = vmul.f32 0.1, %v1642_v7 }
 0x17f   :  { %vm2582_vm12 = vcmp.gt.f32.partialorder %v2154_v46, 0.0  ;;  %v2838_v61 = vmul.f32 0.1, %v2154_v46  ;;  %5944 = vst [vmem:[%s8240_s3 + $0x308] sm:$0xff] %v5696_v1   ;;  %v2146_v22 = vadd.f32 %v7272_v59, %v7508_v3  ;;  %v1645_v27 = vadd.f32 %v7272_v59, %v7513_v5 }
 0x180   :  { %5879 = vst [vmem:[%s8240_s3 + $0x100] sm:$0xff] %v5371_v8   ;;  %v2157_v11 = vadd.f32 %v7272_v59, %v7529_v12  ;;  %5943 = vst [vmem:[%s8240_s3 + $0x300] sm:$0xff] %v5691_v19   ;;  %v2966_v29 = vsel %vm2454_vm11, %v1642_v7, %v2710_v20  ;;  %v1637_v2 = vadd.f32 %v7272_v59, %v7531_v13  ;;  %vm2452_vm13 = vcmp.gt.f32.partialorder %v1634_v24, 0.0 }
 0x181   :  { %v3094_v38 = vsel %vm2582_vm12, %v2154_v46, %v2838_v61  ;;  %v2149_v3 = vadd.f32 %v7272_v59, %v7541_v16  ;;  %v2708_v5 = vmul.f32 0.1, %v1634_v24  ;;  %vm2580_vm14 = vcmp.gt.f32.partialorder %v2146_v22, 0.0  ;;  %v7632_v25 = vpop.f32.mrb[80].mxu0  ;;  %v7634_v49 = vpop.f32.mrb[80].mxu1 }
 0x182   :  { %v2836_v30 = vmul.f32 0.1, %v2146_v22  ;;  %vm2455_vm15 = vcmp.gt.f32.partialorder %v1645_v27, 0.0  ;;  %v2711_v12 = vmul.f32 0.1, %v1645_v27  ;;  %vm2583_vm1 = vcmp.gt.f32.partialorder %v2157_v11, 0.0 }
 0x183   :  { %v2839_v43 = vmul.f32 0.1, %v2157_v11  ;;  %v2964_v36 = vsel %vm2452_vm13, %v1634_v24, %v2708_v5  ;;  %vm2453_vm2 = vcmp.gt.f32.partialorder %v1637_v2, 0.0  ;;  %v2709_v47 = vmul.f32 0.1, %v1637_v2  ;;  %v7636_v52 = vpop.f32.mrb[81].mxu0 }
 0x184   :  { %v3092_v44 = vsel %vm2580_vm14, %v2146_v22, %v2836_v30  ;;  %v2967_v13 = vsel %vm2455_vm15, %v1645_v27, %v2711_v12  ;;  %vm2581_vm3 = vcmp.gt.f32.partialorder %v2149_v3, 0.0  ;;  %v2837_v16 = vmul.f32 0.1, %v2149_v3  ;;  %v7638_v37 = vpop.f32.mrb[81].mxu1  ;;  %v7642_v50 = vpop.f32.mrb[82].mxu0 }
 0x185   :  { %v3095_v26 = vsel %vm2583_vm1, %v2157_v11, %v2839_v43  ;;  %v5386_v41 = vpack.c.bf16 %v2967_v13, %v2966_v29  ;;  %v2965_v28 = vsel %vm2453_vm2, %v1637_v2, %v2709_v47  ;;  %v1658_v55 = vadd.f32 %v7272_v59, %v7543_v23  ;;  %v7644_v56 = vpop.f32.mrb[82].mxu1  ;;  %v7650_v4 = vpop.f32.mrb[83].mxu0 }
 0x186   :  { %v5706_v53 = vpack.c.bf16 %v3095_v26, %v3094_v38  ;;  %v5381_v42 = vpack.c.bf16 %v2965_v28, %v2964_v36  ;;  %v3093_v62 = vsel %vm2581_vm3, %v2149_v3, %v2837_v16  ;;  %v2170_v63 = vadd.f32 %v7272_v59, %v7545_v14  ;;  %v7652_v57 = vpop.f32.mrb[83].mxu1 }
 0x187   :  { %v1650_v54 = vadd.f32 %v7272_v59, %v7549_v31  ;;  %5882 = vst [vmem:[%s8240_s3 + $0x118] sm:$0xff] %v5386_v41   ;;  %v5701_v23 = vpack.c.bf16 %v3093_v62, %v3092_v44  ;;  %vm2458_vm4 = vcmp.gt.f32.partialorder %v1658_v55, 0.0  ;;  %v2714_v6 = vmul.f32 0.1, %v1658_v55 }
 0x188   :  { %5946 = vst [vmem:[%s8240_s3 + $0x318] sm:$0xff] %v5706_v53   ;;  %v2162_v14 = vadd.f32 %v7272_v59, %v7551_v40  ;;  %5881 = vst [vmem:[%s8240_s3 + $0x110] sm:$0xff] %v5381_v42   ;;  %vm2586_vm5 = vcmp.gt.f32.partialorder %v2170_v63, 0.0  ;;  %v2842_v31 = vmul.f32 0.1, %v2170_v63  ;;  %v1661_v9 = vadd.f32 %v7272_v59, %v7557_v48 }
 0x189   :  { %vm2456_vm0 = vcmp.gt.f32.partialorder %v1650_v54, 0.0  ;;  %v2712_v39 = vmul.f32 0.1, %v1650_v54  ;;  %5945 = vst [vmem:[%s8240_s3 + $0x310] sm:$0xff] %v5701_v23   ;;  %v2970_v7 = vsel %vm2458_vm4, %v1658_v55, %v2714_v6  ;;  %v2173_v46 = vadd.f32 %v7272_v59, %v7559_v34  ;;  %v7674_v8 = vpop.f32.mrb[84].mxu0  ;;  %v7676_v17 = vpop.f32.mrb[84].mxu1 }
 0x18a   :  { %vm2584_vm6 = vcmp.gt.f32.partialorder %v2162_v14, 0.0  ;;  %v2840_v45 = vmul.f32 0.1, %v2162_v14  ;;  %v3098_v15 = vsel %vm2586_vm5, %v2170_v63, %v2842_v31  ;;  %v1653_v1 = vadd.f32 %v7272_v59, %v7569_v51  ;;  %v7680_v24 = vpop.f32.mrb[85].mxu0  ;;  %v7682_v48 = vpop.f32.mrb[85].mxu1 }
 0x18b   :  { %v2968_v40 = vsel %vm2456_vm0, %v1650_v54, %v2712_v39  ;;  %vm2459_vm7 = vcmp.gt.f32.partialorder %v1661_v9, 0.0  ;;  %v2715_v20 = vmul.f32 0.1, %v1661_v9  ;;  %v2165_v61 = vadd.f32 %v7272_v59, %v7571_v32  ;;  %v7686_v29 = vpop.f32.mrb[86].mxu0  ;;  %v7688_v38 = vpop.f32.mrb[86].mxu1 }
 0x18c   :  { %v3096_v19 = vsel %vm2584_vm6, %v2162_v14, %v2840_v45  ;;  %vm2587_vm8 = vcmp.gt.f32.partialorder %v2173_v46, 0.0  ;;  %v2843_v22 = vmul.f32 0.1, %v2173_v46  ;;  %vm2457_vm9 = vcmp.gt.f32.partialorder %v1653_v1, 0.0  ;;  %v7692_v30 = vpop.f32.mrb[87].mxu0  ;;  %v7694_v12 = vpop.f32.mrb[87].mxu1 }
 0x18d   :  { %v2713_v34 = vmul.f32 0.1, %v1653_v1  ;;  %v2971_v27 = vsel %vm2459_vm7, %v1661_v9, %v2715_v20  ;;  %vm2585_vm10 = vcmp.gt.f32.partialorder %v2165_v61, 0.0  ;;  %v2841_v51 = vmul.f32 0.1, %v2165_v61 }
 0x18e   :  { %v1674_v11 = vadd.f32 %v7272_v59, %v7589_v35  ;;  %v5396_v2 = vpack.c.bf16 %v2971_v27, %v2970_v7  ;;  %v3099_v32 = vsel %vm2587_vm8, %v2173_v46, %v2843_v22  ;;  %v2186_v5 = vadd.f32 %v7272_v59, %v7591_v10 }
 0x18f   :  { %v2969_v3 = vsel %vm2457_vm9, %v1653_v1, %v2713_v34  ;;  %v5716_v43 = vpack.c.bf16 %v3099_v32, %v3098_v15  ;;  %v3097_v44 = vsel %vm2585_vm10, %v2165_v61, %v2841_v51  ;;  %v1666_v10 = vadd.f32 %v7272_v59, %v7595_v58  ;;  %v7759_v32 = vld [vmem:[%s8239_s2] ss:$0 sm:$0xff] }
 0x190   :  { %v5391_v36 = vpack.c.bf16 %v2969_v3, %v2968_v40  ;;  %vm2462_vm11 = vcmp.gt.f32.partialorder %v1674_v11, 0.0  ;;  %5884 = vst [vmem:[%s8240_s3 + $0x128] sm:$0xff] %v5396_v2   ;;  %v5711_v35 = vpack.c.bf16 %v3097_v44, %v3096_v19  ;;  %v2718_v47 = vmul.f32 0.1, %v1674_v11 }
 0x191   :  { %vm2590_vm12 = vcmp.gt.f32.partialorder %v2186_v5, 0.0  ;;  %v2846_v13 = vmul.f32 0.1, %v2186_v5  ;;  %5948 = vst [vmem:[%s8240_s3 + $0x328] sm:$0xff] %v5716_v43   ;;  %v2178_v26 = vadd.f32 %v7272_v59, %v7597_v0  ;;  %v1677_v16 = vadd.f32 %v7272_v59, %v7599_v18  ;;  %v7720_v42 = vpop.f32.mrb[88].mxu0  ;;  %v7722_v0 = vpop.f32.mrb[88].mxu1 }
 0x192   :  { %5883 = vst [vmem:[%s8240_s3 + $0x120] sm:$0xff] %v5391_v36   ;;  %v2189_v41 = vadd.f32 %v7272_v59, %v7601_v60  ;;  %5947 = vst [vmem:[%s8240_s3 + $0x320] sm:$0xff] %v5711_v35   ;;  %v2974_v53 = vsel %vm2462_vm11, %v1674_v11, %v2718_v47  ;;  %v1669_v55 = vadd.f32 %v7272_v59, %v7606_v21  ;;  %vm2460_vm13 = vcmp.gt.f32.partialorder %v1666_v10, 0.0  ;;  %v7724_v21 = vpop.f32.mrb[89].mxu0  ;;  %v7726_v14 = vpop.f32.mrb[89].mxu1 }
 0x193   :  { %v3102_v28 = vsel %vm2590_vm12, %v2186_v5, %v2846_v13  ;;  %v2181_v58 = vadd.f32 %v7272_v59, %v7622_v33  ;;  %v2716_v18 = vmul.f32 0.1, %v1666_v10  ;;  %vm2588_vm14 = vcmp.gt.f32.partialorder %v2178_v26, 0.0  ;;  %v7728_v7 = vpop.f32.mrb[90].mxu0  ;;  %v7730_v45 = vpop.f32.mrb[90].mxu1 }
 0x194   :  { %v2844_v60 = vmul.f32 0.1, %v2178_v26  ;;  %vm2463_vm15 = vcmp.gt.f32.partialorder %v1677_v16, 0.0  ;;  %v2719_v62 = vmul.f32 0.1, %v1677_v16  ;;  %vm2591_vm1 = vcmp.gt.f32.partialorder %v2189_v41, 0.0 }
 0x195   :  { %v2847_v63 = vmul.f32 0.1, %v2189_v41  ;;  %v2972_v54 = vsel %vm2460_vm13, %v1666_v10, %v2716_v18  ;;  %vm2461_vm2 = vcmp.gt.f32.partialorder %v1669_v55, 0.0  ;;  %v2717_v6 = vmul.f32 0.1, %v1669_v55  ;;  %v7734_v1 = vpop.f32.mrb[91].mxu0 }
 0x196   :  { %v3100_v23 = vsel %vm2588_vm14, %v2178_v26, %v2844_v60  ;;  %v2975_v33 = vsel %vm2463_vm15, %v1677_v16, %v2719_v62  ;;  %vm2589_vm3 = vcmp.gt.f32.partialorder %v2181_v58, 0.0  ;;  %v2845_v39 = vmul.f32 0.1, %v2181_v58  ;;  %v7736_v19 = vpop.f32.mrb[91].mxu1 }
 0x197   :  { %v3103_v31 = vsel %vm2591_vm1, %v2189_v41, %v2847_v63  ;;  %v5406_v9 = vpack.c.bf16 %v2975_v33, %v2974_v53  ;;  %v2973_v40 = vsel %vm2461_vm2, %v1669_v55, %v2717_v6  ;;  %v1690_v46 = vadd.f32 %v7272_v59, %v7632_v25 }
 0x198   :  { %v5726_v15 = vpack.c.bf16 %v3103_v31, %v3102_v28  ;;  %v5401_v20 = vpack.c.bf16 %v2973_v40, %v2972_v54  ;;  %v3101_v61 = vsel %vm2589_vm3, %v2181_v58, %v2845_v39  ;;  %v2202_v22 = vadd.f32 %v7272_v59, %v7634_v49 }
 0x199   :  { %v1682_v34 = vadd.f32 %v7272_v59, %v7636_v52  ;;  %5886 = vst [vmem:[%s8240_s3 + $0x138] sm:$0xff] %v5406_v9   ;;  %v5721_v25 = vpack.c.bf16 %v3101_v61, %v3100_v23  ;;  %vm2466_vm4 = vcmp.gt.f32.partialorder %v1690_v46, 0.0  ;;  %v2722_v27 = vmul.f32 0.1, %v1690_v46  ;;  %v7765_v3 = vpop.f32.mrb[92].mxu1 }
 0x19a   :  { %5950 = vst [vmem:[%s8240_s3 + $0x338] sm:$0xff] %v5726_v15   ;;  %v2194_v51 = vadd.f32 %v7272_v59, %v7638_v37  ;;  %5885 = vst [vmem:[%s8240_s3 + $0x130] sm:$0xff] %v5401_v20   ;;  %vm2594_vm5 = vcmp.gt.f32.partialorder %v2202_v22, 0.0  ;;  %v2850_v49 = vmul.f32 0.1, %v2202_v22  ;;  %v1693_v59 = vadd.f32 %v7759_v32, %v7642_v50  ;;  %v7763_v37 = vpop.f32.mrb[92].mxu0 }
 0x19b   :  { %vm2464_vm0 = vcmp.gt.f32.partialorder %v1682_v34, 0.0  ;;  %v2720_v52 = vmul.f32 0.1, %v1682_v34  ;;  %5949 = vst [vmem:[%s8240_s3 + $0x330] sm:$0xff] %v5721_v25   ;;  %v2978_v11 = vsel %vm2466_vm4, %v1690_v46, %v2722_v27  ;;  %v2205_v36 = vadd.f32 %v7759_v32, %v7644_v56  ;;  %v7771_v35 = vpop.f32.mrb[93].mxu0  ;;  %v7773_v47 = vpop.f32.mrb[93].mxu1 }
 0x19c   :  { %vm2592_vm6 = vcmp.gt.f32.partialorder %v2194_v51, 0.0  ;;  %v2848_v2 = vmul.f32 0.1, %v2194_v51  ;;  %v3106_v5 = vsel %vm2594_vm5, %v2202_v22, %v2850_v49  ;;  %v1685_v44 = vadd.f32 %v7759_v32, %v7650_v4  ;;  %v7777_v26 = vpop.f32.mrb[94].mxu0  ;;  %v7779_v16 = vpop.f32.mrb[94].mxu1 }
 0x19d   :  { %v2976_v43 = vsel %vm2464_vm0, %v1682_v34, %v2720_v52  ;;  %vm2467_vm7 = vcmp.gt.f32.partialorder %v1693_v59, 0.0  ;;  %v2723_v10 = vmul.f32 0.1, %v1693_v59  ;;  %v2197_v50 = vadd.f32 %v7759_v32, %v7652_v57  ;;  %v7783_v55 = vpop.f32.mrb[95].mxu0  ;;  %v7785_v58 = vpop.f32.mrb[95].mxu1 }
 0x19e   :  { %v3104_v13 = vsel %vm2592_vm6, %v2194_v51, %v2848_v2  ;;  %vm2595_vm8 = vcmp.gt.f32.partialorder %v2205_v36, 0.0  ;;  %v2851_v41 = vmul.f32 0.1, %v2205_v36  ;;  %vm2465_vm9 = vcmp.gt.f32.partialorder %v1685_v44, 0.0 }
 0x19f   :  { %v2721_v56 = vmul.f32 0.1, %v1685_v44  ;;  %v2979_v53 = vsel %vm2467_vm7, %v1693_v59, %v2723_v10  ;;  %vm2593_vm10 = vcmp.gt.f32.partialorder %v2197_v50, 0.0  ;;  %v2849_v4 = vmul.f32 0.1, %v2197_v50 }
 0x1a0   :  { %v1706_v28 = vadd.f32 %v7759_v32, %v7674_v8  ;;  %v5416_v18 = vpack.c.bf16 %v2979_v53, %v2978_v11  ;;  %v3107_v57 = vsel %vm2595_vm8, %v2205_v36, %v2851_v41  ;;  %v2218_v62 = vadd.f32 %v7759_v32, %v7676_v17 }
 0x1a1   :  { %v2977_v60 = vsel %vm2465_vm9, %v1685_v44, %v2721_v56  ;;  %v5736_v63 = vpack.c.bf16 %v3107_v57, %v3106_v5  ;;  %v3105_v23 = vsel %vm2593_vm10, %v2197_v50, %v2849_v4  ;;  %v7792_v31 = vpop.f32.mrb[96].mxu0  ;;  %v1698_v17 = vadd.f32 %v7759_v32, %v7680_v24  ;;  %v7808_v40 = vpop.f32.mrb[96].mxu1 }
 0x1a2   :  { %v5411_v54 = vpack.c.bf16 %v2977_v60, %v2976_v43  ;;  %vm2470_vm11 = vcmp.gt.f32.partialorder %v1706_v28, 0.0  ;;  %5888 = vst [vmem:[%s8240_s3 + $0x148] sm:$0xff] %v5416_v18   ;;  %v5731_v6 = vpack.c.bf16 %v3105_v23, %v3104_v13  ;;  %v2726_v8 = vmul.f32 0.1, %v1706_v28  ;;  %v7810_v46 = vpop.f32.mrb[97].mxu0  ;;  %v7820_v61 = vpop.f32.mrb[97].mxu1 }
 0x1a3   :  { %vm2598_vm12 = vcmp.gt.f32.partialorder %v2218_v62, 0.0  ;;  %v2854_v33 = vmul.f32 0.1, %v2218_v62  ;;  %5952 = vst [vmem:[%s8240_s3 + $0x348] sm:$0xff] %v5736_v63   ;;  %v2210_v39 = vadd.f32 %v7759_v32, %v7682_v48  ;;  %v1709_v9 = vadd.f32 %v7759_v32, %v7686_v29 }
 0x1a4   :  { %5887 = vst [vmem:[%s8240_s3 + $0x140] sm:$0xff] %v5411_v54   ;;  %v2221_v15 = vadd.f32 %v7759_v32, %v7688_v38  ;;  %5951 = vst [vmem:[%s8240_s3 + $0x340] sm:$0xff] %v5731_v6   ;;  %v2982_v20 = vsel %vm2470_vm11, %v1706_v28, %v2726_v8  ;;  %v1701_v48 = vadd.f32 %v7759_v32, %v7692_v30  ;;  %v7822_v38 = vpop.f32.mrb[98].mxu0  ;;  %vm2468_vm13 = vcmp.gt.f32.partialorder %v1698_v17, 0.0  ;;  %v7824_v30 = vpop.f32.mrb[98].mxu1 }
 0x1a5   :  { %v3110_v24 = vsel %vm2598_vm12, %v2218_v62, %v2854_v33  ;;  %v2213_v29 = vadd.f32 %v7759_v32, %v7694_v12  ;;  %v2724_v22 = vmul.f32 0.1, %v1698_v17  ;;  %vm2596_vm14 = vcmp.gt.f32.partialorder %v2210_v39, 0.0  ;;  %v7826_v11 = vpop.f32.mrb[99].mxu0  ;;  %v7828_v5 = vpop.f32.mrb[99].mxu1 }
 0x1a6   :  { %v2852_v34 = vmul.f32 0.1, %v2210_v39  ;;  %vm2471_vm15 = vcmp.gt.f32.partialorder %v1709_v9, 0.0  ;;  %v2727_v25 = vmul.f32 0.1, %v1709_v9  ;;  %vm2599_vm1 = vcmp.gt.f32.partialorder %v2221_v15, 0.0 }
 0x1a7   :  { %v2855_v27 = vmul.f32 0.1, %v2221_v15  ;;  %v2980_v51 = vsel %vm2468_vm13, %v1698_v17, %v2724_v22  ;;  %vm2469_vm2 = vcmp.gt.f32.partialorder %v1701_v48, 0.0  ;;  %v2725_v52 = vmul.f32 0.1, %v1701_v48 }
 0x1a8   :  { %v3108_v49 = vsel %vm2596_vm14, %v2210_v39, %v2852_v34  ;;  %v2983_v12 = vsel %vm2471_vm15, %v1709_v9, %v2727_v25  ;;  %vm2597_vm3 = vcmp.gt.f32.partialorder %v2213_v29, 0.0  ;;  %v2853_v59 = vmul.f32 0.1, %v2213_v29 }
 0x1a9   :  { %v3111_v2 = vsel %vm2599_vm1, %v2221_v15, %v2855_v27  ;;  %v5426_v43 = vpack.c.bf16 %v2983_v12, %v2982_v20  ;;  %v2981_v44 = vsel %vm2469_vm2, %v1701_v48, %v2725_v52  ;;  %v1722_v13 = vadd.f32 %v7759_v32, %v7720_v42  ;;  %v7836_v53 = vpop.f32.mrb[100].mxu0  ;;  %v7838_v4 = vpop.f32.mrb[100].mxu1 }
 0x1aa   :  { %v5746_v36 = vpack.c.bf16 %v3111_v2, %v3110_v24  ;;  %v5421_v10 = vpack.c.bf16 %v2981_v44, %v2980_v51  ;;  %v3109_v50 = vsel %vm2597_vm3, %v2213_v29, %v2853_v59  ;;  %v2234_v41 = vadd.f32 %v7759_v32, %v7722_v0  ;;  %v7848_v18 = vpop.f32.mrb[101].mxu0 }
 0x1ab   :  { %v1714_v56 = vadd.f32 %v7759_v32, %v7724_v21  ;;  %5890 = vst [vmem:[%s8240_s3 + $0x158] sm:$0xff] %v5426_v43   ;;  %v5741_v42 = vpack.c.bf16 %v3109_v50, %v3108_v49  ;;  %vm2474_vm4 = vcmp.gt.f32.partialorder %v1722_v13, 0.0  ;;  %v2730_v28 = vmul.f32 0.1, %v1722_v13  ;;  %v7850_v21 = vpop.f32.mrb[101].mxu1  ;;  %v7860_v54 = vpop.f32.mrb[102].mxu0 }
 0x1ac   :  { %5954 = vst [vmem:[%s8240_s3 + $0x358] sm:$0xff] %v5746_v36   ;;  %v2226_v0 = vadd.f32 %v7759_v32, %v7726_v14  ;;  %5889 = vst [vmem:[%s8240_s3 + $0x150] sm:$0xff] %v5421_v10   ;;  %vm2602_vm5 = vcmp.gt.f32.partialorder %v2234_v41, 0.0  ;;  %v2858_v57 = vmul.f32 0.1, %v2234_v41  ;;  %v1725_v14 = vadd.f32 %v7759_v32, %v7728_v7  ;;  %v7862_v23 = vpop.f32.mrb[102].mxu1 }
 0x1ad   :  { %vm2472_vm0 = vcmp.gt.f32.partialorder %v1714_v56, 0.0  ;;  %v2728_v60 = vmul.f32 0.1, %v1714_v56  ;;  %5953 = vst [vmem:[%s8240_s3 + $0x350] sm:$0xff] %v5741_v42   ;;  %v2986_v62 = vsel %vm2474_vm4, %v1722_v13, %v2730_v28  ;;  %v2237_v33 = vadd.f32 %v7759_v32, %v7730_v45  ;;  %v7868_v39 = vpop.f32.mrb[103].mxu0  ;;  %v7870_v9 = vpop.f32.mrb[103].mxu1 }
 0x1ae   :  { %vm2600_vm6 = vcmp.gt.f32.partialorder %v2226_v0, 0.0  ;;  %v2856_v63 = vmul.f32 0.1, %v2226_v0  ;;  %v3114_v6 = vsel %vm2602_vm5, %v2234_v41, %v2858_v57  ;;  %v1717_v17 = vadd.f32 %v7759_v32, %v7734_v1 }
 0x1af   :  { %v2984_v8 = vsel %vm2472_vm0, %v1714_v56, %v2728_v60  ;;  %vm2475_vm7 = vcmp.gt.f32.partialorder %v1725_v14, 0.0  ;;  %v2731_v20 = vmul.f32 0.1, %v1725_v14  ;;  %v2229_v7 = vadd.f32 %v7759_v32, %v7736_v19 }
 0x1b0   :  { %v3112_v15 = vsel %vm2600_vm6, %v2226_v0, %v2856_v63  ;;  %vm2603_vm8 = vcmp.gt.f32.partialorder %v2237_v33, 0.0  ;;  %v2859_v24 = vmul.f32 0.1, %v2237_v33  ;;  %vm2473_vm9 = vcmp.gt.f32.partialorder %v1717_v17, 0.0 }
 0x1b1   :  { %v2729_v48 = vmul.f32 0.1, %v1717_v17  ;;  %v2987_v29 = vsel %vm2475_vm7, %v1725_v14, %v2731_v20  ;;  %vm2601_vm10 = vcmp.gt.f32.partialorder %v2229_v7, 0.0  ;;  %v2857_v45 = vmul.f32 0.1, %v2229_v7  ;;  %v7878_v51 = vpop.f32.mrb[104].mxu0 }
 0x1b2   :  { %v1738_v1 = vadd.f32 %v7759_v32, %v7763_v37  ;;  %v5436_v22 = vpack.c.bf16 %v2987_v29, %v2986_v62  ;;  %v3115_v34 = vsel %vm2603_vm8, %v2237_v33, %v2859_v24  ;;  %v2250_v27 = vadd.f32 %v7759_v32, %v7765_v3  ;;  %v7880_v49 = vpop.f32.mrb[104].mxu1  ;;  %v7882_v2 = vpop.f32.mrb[105].mxu0 }
 0x1b3   :  { %v2985_v25 = vsel %vm2473_vm9, %v1717_v17, %v2729_v48  ;;  %v5756_v19 = vpack.c.bf16 %v3115_v34, %v3114_v6  ;;  %v3113_v12 = vsel %vm2601_vm10, %v2229_v7, %v2857_v45  ;;  %v7884_v59 = vpop.f32.mrb[105].mxu1  ;;  %v7889_v36 = vpop.f32.mrb[106].mxu0  ;;  %v1730_v44 = vadd.f32 %v7759_v32, %v7771_v35 }
 0x1b4   :  { %v5431_v52 = vpack.c.bf16 %v2985_v25, %v2984_v8  ;;  %vm2478_vm11 = vcmp.gt.f32.partialorder %v1738_v1, 0.0  ;;  %5892 = vst [vmem:[%s8240_s3 + $0x168] sm:$0xff] %v5436_v22   ;;  %v5751_v37 = vpack.c.bf16 %v3113_v12, %v3112_v15  ;;  %v2734_v43 = vmul.f32 0.1, %v1738_v1  ;;  %v7905_v41 = vpop.f32.mrb[106].mxu1  ;;  %v7907_v56 = vpop.f32.mrb[107].mxu0 }
 0x1b5   :  { %vm2606_vm12 = vcmp.gt.f32.partialorder %v2250_v27, 0.0  ;;  %v2862_v3 = vmul.f32 0.1, %v2250_v27  ;;  %5956 = vst [vmem:[%s8240_s3 + $0x368] sm:$0xff] %v5756_v19   ;;  %v2242_v13 = vadd.f32 %v7759_v32, %v7773_v47  ;;  %v1741_v10 = vadd.f32 %v7759_v32, %v7777_v26  ;;  %v7917_v28 = vpop.f32.mrb[107].mxu1 }
 0x1b6   :  { %5891 = vst [vmem:[%s8240_s3 + $0x160] sm:$0xff] %v5431_v52   ;;  %v2253_v50 = vadd.f32 %v7759_v32, %v7779_v16  ;;  %5955 = vst [vmem:[%s8240_s3 + $0x360] sm:$0xff] %v5751_v37   ;;  %v2990_v42 = vsel %vm2478_vm11, %v1738_v1, %v2734_v43  ;;  %v1733_v47 = vadd.f32 %v7759_v32, %v7783_v55  ;;  %vm2476_vm13 = vcmp.gt.f32.partialorder %v1730_v44, 0.0 }
 0x1b7   :  { %v3118_v35 = vsel %vm2606_vm12, %v2250_v27, %v2862_v3  ;;  %v2245_v26 = vadd.f32 %v7759_v32, %v7785_v58  ;;  %v2732_v16 = vmul.f32 0.1, %v1730_v44  ;;  %vm2604_vm14 = vcmp.gt.f32.partialorder %v2242_v13, 0.0 }
 0x1b8   :  { %v2860_v0 = vmul.f32 0.1, %v2242_v13  ;;  %vm2479_vm15 = vcmp.gt.f32.partialorder %v1741_v10, 0.0  ;;  %v2735_v57 = vmul.f32 0.1, %v1741_v10  ;;  %vm2607_vm1 = vcmp.gt.f32.partialorder %v2253_v50, 0.0 }
 0x1b9   :  { %v2863_v60 = vmul.f32 0.1, %v2253_v50  ;;  %v2988_v62 = vsel %vm2476_vm13, %v1730_v44, %v2732_v16  ;;  %vm2477_vm2 = vcmp.gt.f32.partialorder %v1733_v47, 0.0  ;;  %v2733_v14 = vmul.f32 0.1, %v1733_v47  ;;  %v7919_v33 = vpop.f32.mrb[108].mxu0 }
 0x1ba   :  { %v3116_v63 = vsel %vm2604_vm14, %v2242_v13, %v2860_v0  ;;  %v2991_v6 = vsel %vm2479_vm15, %v1741_v10, %v2735_v57  ;;  %vm2605_vm3 = vcmp.gt.f32.partialorder %v2245_v26, 0.0  ;;  %v2861_v55 = vmul.f32 0.1, %v2245_v26  ;;  %v7923_v7 = vpop.f32.mrb[108].mxu1  ;;  %v7925_v24 = vpop.f32.mrb[109].mxu0 }
 0x1bb   :  { %v3119_v8 = vsel %vm2607_vm1, %v2253_v50, %v2863_v60  ;;  %v5446_v58 = vpack.c.bf16 %v2991_v6, %v2990_v42  ;;  %v2989_v15 = vsel %vm2477_vm2, %v1733_v47, %v2733_v14  ;;  %v1754_v20 = vadd.f32 %v7759_v32, %v7792_v31  ;;  %v7931_v22 = vpop.f32.mrb[109].mxu1  ;;  %v7933_v34 = vpop.f32.mrb[110].mxu0 }
 0x1bc   :  { %v5766_v17 = vpack.c.bf16 %v3119_v8, %v3118_v35  ;;  %v5441_v48 = vpack.c.bf16 %v2989_v15, %v2988_v62  ;;  %v3117_v29 = vsel %vm2605_vm3, %v2245_v26, %v2861_v55  ;;  %v2266_v45 = vadd.f32 %v7759_v32, %v7808_v40  ;;  %v7943_v27 = vpop.f32.mrb[110].mxu1 }
 0x1bd   :  { %v1746_v1 = vadd.f32 %v7759_v32, %v7810_v46  ;;  %5894 = vst [vmem:[%s8240_s3 + $0x178] sm:$0xff] %v5446_v58   ;;  %v5761_v31 = vpack.c.bf16 %v3117_v29, %v3116_v63  ;;  %vm2482_vm4 = vcmp.gt.f32.partialorder %v1754_v20, 0.0  ;;  %v2738_v25 = vmul.f32 0.1, %v1754_v20  ;;  %v7945_v46 = vpop.f32.mrb[111].mxu0  ;;  %v7955_v43 = vpop.f32.mrb[111].mxu1 }
 0x1be   :  { %5958 = vst [vmem:[%s8240_s3 + $0x378] sm:$0xff] %v5766_v17   ;;  %v2258_v40 = vadd.f32 %v7759_v32, %v7820_v61  ;;  %5893 = vst [vmem:[%s8240_s3 + $0x170] sm:$0xff] %v5441_v48   ;;  %vm2610_vm5 = vcmp.gt.f32.partialorder %v2266_v45, 0.0  ;;  %v2866_v19 = vmul.f32 0.1, %v2266_v45  ;;  %v1757_v61 = vadd.f32 %v7759_v32, %v7822_v38 }
 0x1bf   :  { %vm2480_vm0 = vcmp.gt.f32.partialorder %v1746_v1, 0.0  ;;  %v2736_v52 = vmul.f32 0.1, %v1746_v1  ;;  %5957 = vst [vmem:[%s8240_s3 + $0x370] sm:$0xff] %v5761_v31   ;;  %v2994_v12 = vsel %vm2482_vm4, %v1754_v20, %v2738_v25  ;;  %v2269_v13 = vadd.f32 %v7759_v32, %v7824_v30 }
 0x1c0   :  { %vm2608_vm6 = vcmp.gt.f32.partialorder %v2258_v40, 0.0  ;;  %v2864_v37 = vmul.f32 0.1, %v2258_v40  ;;  %v3122_v3 = vsel %vm2610_vm5, %v2266_v45, %v2866_v19  ;;  %v1749_v10 = vadd.f32 %v7759_v32, %v7826_v11 }
 0x1c1   :  { %v2992_v44 = vsel %vm2480_vm0, %v1746_v1, %v2736_v52  ;;  %vm2483_vm7 = vcmp.gt.f32.partialorder %v1757_v61, 0.0  ;;  %v2739_v42 = vmul.f32 0.1, %v1757_v61  ;;  %v2261_v35 = vadd.f32 %v7759_v32, %v7828_v5  ;;  %v7965_v30 = vpop.f32.mrb[112].mxu0 }
 0x1c2   :  { %v3120_v50 = vsel %vm2608_vm6, %v2258_v40, %v2864_v37  ;;  %vm2611_vm8 = vcmp.gt.f32.partialorder %v2269_v13, 0.0  ;;  %v2867_v47 = vmul.f32 0.1, %v2269_v13  ;;  %vm2481_vm9 = vcmp.gt.f32.partialorder %v1749_v10, 0.0  ;;  %v7967_v57 = vpop.f32.mrb[112].mxu1  ;;  %v7971_v63 = vpop.f32.mrb[113].mxu0 }
 0x1c3   :  { %v2737_v38 = vmul.f32 0.1, %v1749_v10  ;;  %v2995_v26 = vsel %vm2483_vm7, %v1757_v61, %v2739_v42  ;;  %vm2609_vm10 = vcmp.gt.f32.partialorder %v2261_v35, 0.0  ;;  %v2865_v16 = vmul.f32 0.1, %v2261_v35  ;;  %v7973_v14 = vpop.f32.mrb[113].mxu1 }
 0x1c4   :  { %v1770_v0 = vadd.f32 %v7759_v32, %v7836_v53  ;;  %v5456_v11 = vpack.c.bf16 %v2995_v26, %v2994_v12  ;;  %v3123_v60 = vsel %vm2611_vm8, %v2269_v13, %v2867_v47  ;;  %v2282_v5 = vadd.f32 %v7759_v32, %v7838_v4  ;;  %v7975_v58 = vpop.f32.mrb[114].mxu0  ;;  %v7977_v53 = vpop.f32.mrb[114].mxu1 }
 0x1c5   :  { %v2993_v62 = vsel %vm2481_vm9, %v1749_v10, %v2737_v38  ;;  %v5776_v6 = vpack.c.bf16 %v3123_v60, %v3122_v3  ;;  %v3121_v55 = vsel %vm2609_vm10, %v2261_v35, %v2865_v16  ;;  %v7982_v20 = vpop.f32.mrb[115].mxu0  ;;  %v1762_v48 = vadd.f32 %v7759_v32, %v7848_v18  ;;  %v7998_v31 = vpop.f32.mrb[115].mxu1 }
 0x1c6   :  { %v5451_v8 = vpack.c.bf16 %v2993_v62, %v2992_v44  ;;  %vm2486_vm11 = vcmp.gt.f32.partialorder %v1770_v0, 0.0  ;;  %5896 = vst [vmem:[%s8240_s3 + $0x188] sm:$0xff] %v5456_v11   ;;  %v5771_v17 = vpack.c.bf16 %v3121_v55, %v3120_v50  ;;  %v2742_v15 = vmul.f32 0.1, %v1770_v0 }
 0x1c7   :  { %vm2614_vm12 = vcmp.gt.f32.partialorder %v2282_v5, 0.0  ;;  %v2870_v4 = vmul.f32 0.1, %v2282_v5  ;;  %5960 = vst [vmem:[%s8240_s3 + $0x388] sm:$0xff] %v5776_v6   ;;  %v2274_v29 = vadd.f32 %v7759_v32, %v7850_v21  ;;  %v1773_v45 = vadd.f32 %v7759_v32, %v7860_v54 }
 0x1c8   :  { %5895 = vst [vmem:[%s8240_s3 + $0x180] sm:$0xff] %v5451_v8   ;;  %v2285_v1 = vadd.f32 %v7759_v32, %v7862_v23  ;;  %5959 = vst [vmem:[%s8240_s3 + $0x380] sm:$0xff] %v5771_v17   ;;  %v2998_v25 = vsel %vm2486_vm11, %v1770_v0, %v2742_v15  ;;  %v1765_v18 = vadd.f32 %v7759_v32, %v7868_v39  ;;  %vm2484_vm13 = vcmp.gt.f32.partialorder %v1762_v48, 0.0 }
 0x1c9   :  { %v3126_v40 = vsel %vm2614_vm12, %v2282_v5, %v2870_v4  ;;  %v2277_v21 = vadd.f32 %v7759_v32, %v7870_v9  ;;  %v2740_v54 = vmul.f32 0.1, %v1762_v48  ;;  %vm2612_vm14 = vcmp.gt.f32.partialorder %v2274_v29, 0.0  ;;  %v8008_v3 = vpop.f32.mrb[116].mxu0 }
 0x1ca   :  { %v2868_v19 = vmul.f32 0.1, %v2274_v29  ;;  %vm2487_vm15 = vcmp.gt.f32.partialorder %v1773_v45, 0.0  ;;  %v2743_v23 = vmul.f32 0.1, %v1773_v45  ;;  %vm2615_vm1 = vcmp.gt.f32.partialorder %v2285_v1, 0.0 }
 0x1cb   :  { %v2871_v52 = vmul.f32 0.1, %v2285_v1  ;;  %v2996_v12 = vsel %vm2484_vm13, %v1762_v48, %v2740_v54  ;;  %vm2485_vm2 = vcmp.gt.f32.partialorder %v1765_v18, 0.0  ;;  %v2741_v61 = vmul.f32 0.1, %v1765_v18  ;;  %v8010_v44 = vpop.f32.mrb[116].mxu1 }
 0x1cc   :  { %v3124_v37 = vsel %vm2612_vm14, %v2274_v29, %v2868_v19  ;;  %v2999_v39 = vsel %vm2487_vm15, %v1773_v45, %v2743_v23  ;;  %vm2613_vm3 = vcmp.gt.f32.partialorder %v2277_v21, 0.0  ;;  %v2869_v9 = vmul.f32 0.1, %v2277_v21  ;;  %v8012_v10 = vpop.f32.mrb[117].mxu0  ;;  %v8014_v50 = vpop.f32.mrb[117].mxu1 }
 0x1cd   :  { %v3127_v13 = vsel %vm2615_vm1, %v2285_v1, %v2871_v52  ;;  %v5466_v42 = vpack.c.bf16 %v2999_v39, %v2998_v25  ;;  %v2997_v47 = vsel %vm2485_vm2, %v1765_v18, %v2741_v61  ;;  %v1786_v38 = vadd.f32 %v7759_v32, %v7878_v51  ;;  %v8018_v26 = vpop.f32.mrb[118].mxu0  ;;  %v8020_v16 = vpop.f32.mrb[118].mxu1 }
 0x1ce   :  { %v5786_v35 = vpack.c.bf16 %v3127_v13, %v3126_v40  ;;  %v5461_v0 = vpack.c.bf16 %v2997_v47, %v2996_v12  ;;  %v3125_v11 = vsel %vm2613_vm3, %v2277_v21, %v2869_v9  ;;  %v2298_v60 = vadd.f32 %v7759_v32, %v7880_v49  ;;  %v8026_v5 = vpop.f32.mrb[119].mxu0  ;;  %v8028_v6 = vpop.f32.mrb[119].mxu1 }
 0x1cf   :  { %v1778_v62 = vadd.f32 %v7759_v32, %v7882_v2  ;;  %5898 = vst [vmem:[%s8240_s3 + $0x198] sm:$0xff] %v5466_v42   ;;  %v5781_v51 = vpack.c.bf16 %v3125_v11, %v3124_v37  ;;  %vm2490_vm4 = vcmp.gt.f32.partialorder %v1786_v38, 0.0  ;;  %v2746_v8 = vmul.f32 0.1, %v1786_v38 }
 0x1d0   :  { %5962 = vst [vmem:[%s8240_s3 + $0x398] sm:$0xff] %v5786_v35   ;;  %v2290_v49 = vadd.f32 %v7759_v32, %v7884_v59  ;;  %5897 = vst [vmem:[%s8240_s3 + $0x190] sm:$0xff] %v5461_v0   ;;  %vm2618_vm5 = vcmp.gt.f32.partialorder %v2298_v60, 0.0  ;;  %v2874_v2 = vmul.f32 0.1, %v2298_v60  ;;  %v1789_v4 = vadd.f32 %v7759_v32, %v7889_v36 }
 0x1d1   :  { %vm2488_vm0 = vcmp.gt.f32.partialorder %v1778_v62, 0.0  ;;  %v2744_v55 = vmul.f32 0.1, %v1778_v62  ;;  %5961 = vst [vmem:[%s8240_s3 + $0x390] sm:$0xff] %v5781_v51   ;;  %v3002_v17 = vsel %vm2490_vm4, %v1786_v38, %v2746_v8  ;;  %v2301_v29 = vadd.f32 %v7759_v32, %v7905_v41  ;;  %v8050_v1 = vpop.f32.mrb[120].mxu0 }
 0x1d2   :  { %vm2616_vm6 = vcmp.gt.f32.partialorder %v2290_v49, 0.0  ;;  %v2872_v15 = vmul.f32 0.1, %v2290_v49  ;;  %v3130_v48 = vsel %vm2618_vm5, %v2298_v60, %v2874_v2  ;;  %v1781_v45 = vadd.f32 %v7759_v32, %v7907_v56  ;;  %v8054_v21 = vpop.f32.mrb[120].mxu1  ;;  %v8056_v54 = vpop.f32.mrb[121].mxu0 }
 0x1d3   :  { %v3000_v59 = vsel %vm2488_vm0, %v1778_v62, %v2744_v55  ;;  %vm2491_vm7 = vcmp.gt.f32.partialorder %v1789_v4, 0.0  ;;  %v2747_v40 = vmul.f32 0.1, %v1789_v4  ;;  %v2293_v18 = vadd.f32 %v7759_v32, %v7917_v28  ;;  %v8060_v52 = vpop.f32.mrb[121].mxu1  ;;  %v8062_v12 = vpop.f32.mrb[122].mxu0 }
 0x1d4   :  { %v3128_v25 = vsel %vm2616_vm6, %v2290_v49, %v2872_v15  ;;  %vm2619_vm8 = vcmp.gt.f32.partialorder %v2301_v29, 0.0  ;;  %v2875_v36 = vmul.f32 0.1, %v2301_v29  ;;  %vm2489_vm9 = vcmp.gt.f32.partialorder %v1781_v45, 0.0  ;;  %v8066_v13 = vpop.f32.mrb[122].mxu1  ;;  %v8068_v9 = vpop.f32.mrb[123].mxu0 }
 0x1d5   :  { %v2745_v19 = vmul.f32 0.1, %v1781_v45  ;;  %v3003_v41 = vsel %vm2491_vm7, %v1789_v4, %v2747_v40  ;;  %vm2617_vm10 = vcmp.gt.f32.partialorder %v2293_v18, 0.0  ;;  %v2873_v23 = vmul.f32 0.1, %v2293_v18  ;;  %v8070_v38 = vpop.f32.mrb[123].mxu1 }
 0x1d6   :  { %v1802_v56 = vadd.f32 %v7759_v32, %v7919_v33  ;;  %v5476_v37 = vpack.c.bf16 %v3003_v41, %v3002_v17  ;;  %v3131_v28 = vsel %vm2619_vm8, %v2301_v29, %v2875_v36  ;;  %v2314_v39 = vadd.f32 %v7759_v32, %v7923_v7 }
 0x1d7   :  { %v3001_v61 = vsel %vm2489_vm9, %v1781_v45, %v2745_v19  ;;  %v5796_v42 = vpack.c.bf16 %v3131_v28, %v3130_v48  ;;  %v3129_v47 = vsel %vm2617_vm10, %v2293_v18, %v2873_v23  ;;  %v1794_v7 = vadd.f32 %v7759_v32, %v7925_v24 }
 0x1d8   :  { %v5471_v35 = vpack.c.bf16 %v3001_v61, %v3000_v59  ;;  %vm2494_vm11 = vcmp.gt.f32.partialorder %v1802_v56, 0.0  ;;  %5900 = vst [vmem:[%s8240_s3 + $0x1a8] sm:$0xff] %v5476_v37   ;;  %v5791_v33 = vpack.c.bf16 %v3129_v47, %v3128_v25  ;;  %v2750_v0 = vmul.f32 0.1, %v1802_v56 }
 0x1d9   :  { %vm2622_vm12 = vcmp.gt.f32.partialorder %v2314_v39, 0.0  ;;  %v2878_v11 = vmul.f32 0.1, %v2314_v39  ;;  %5964 = vst [vmem:[%s8240_s3 + $0x3a8] sm:$0xff] %v5796_v42   ;;  %v2306_v60 = vadd.f32 %v7759_v32, %v7931_v22  ;;  %v1805_v62 = vadd.f32 %v7759_v32, %v7933_v34  ;;  %v8096_v55 = vpop.f32.mrb[124].mxu0 }
 0x1da   :  { %5899 = vst [vmem:[%s8240_s3 + $0x1a0] sm:$0xff] %v5471_v35   ;;  %v2317_v51 = vadd.f32 %v7759_v32, %v7943_v27  ;;  %5963 = vst [vmem:[%s8240_s3 + $0x3a0] sm:$0xff] %v5791_v33   ;;  %v3006_v8 = vsel %vm2494_vm11, %v1802_v56, %v2750_v0  ;;  %v1797_v2 = vadd.f32 %v7759_v32, %v7945_v46  ;;  %vm2492_vm13 = vcmp.gt.f32.partialorder %v1794_v7, 0.0  ;;  %v8098_v59 = vpop.f32.mrb[124].mxu1  ;;  %v8100_v46 = vpop.f32.mrb[125].mxu0 }
 0x1db   :  { %v3134_v49 = vsel %vm2622_vm12, %v2314_v39, %v2878_v11  ;;  %v2309_v24 = vadd.f32 %v7759_v32, %v7955_v43  ;;  %v2748_v22 = vmul.f32 0.1, %v1794_v7  ;;  %vm2620_vm14 = vcmp.gt.f32.partialorder %v2306_v60, 0.0  ;;  %v8102_v25 = vpop.f32.mrb[125].mxu1  ;;  %v8104_v40 = vpop.f32.mrb[126].mxu0 }
 0x1dc   :  { %v2876_v34 = vmul.f32 0.1, %v2306_v60  ;;  %vm2495_vm15 = vcmp.gt.f32.partialorder %v1805_v62, 0.0  ;;  %v2751_v27 = vmul.f32 0.1, %v1805_v62  ;;  %vm2623_vm1 = vcmp.gt.f32.partialorder %v2317_v51, 0.0 }
 0x1dd   :  { %v2879_v17 = vmul.f32 0.1, %v2317_v51  ;;  %v3004_v15 = vsel %vm2492_vm13, %v1794_v7, %v2748_v22  ;;  %vm2493_vm2 = vcmp.gt.f32.partialorder %v1797_v2, 0.0  ;;  %v2749_v48 = vmul.f32 0.1, %v1797_v2  ;;  %v8108_v23 = vpop.f32.mrb[126].mxu1 }
 0x1de   :  { %v3132_v4 = vsel %vm2620_vm14, %v2306_v60, %v2876_v34  ;;  %v3007_v29 = vsel %vm2495_vm15, %v1805_v62, %v2751_v27  ;;  %vm2621_vm3 = vcmp.gt.f32.partialorder %v2309_v24, 0.0  ;;  %v2877_v45 = vmul.f32 0.1, %v2309_v24  ;;  %v8110_v56 = vpop.f32.mrb[127].mxu0  ;;  %v8116_v42 = vpop.f32.mrb[127].mxu1 }
 0x1df   :  { %v3135_v43 = vsel %vm2623_vm1, %v2317_v51, %v2879_v17  ;;  %v5486_v18 = vpack.c.bf16 %v3007_v29, %v3006_v8  ;;  %v3005_v19 = vsel %vm2493_vm2, %v1797_v2, %v2749_v48  ;;  %v1818_v41 = vadd.f32 %v7759_v32, %v7965_v30 }
 0x1e0   :  { %v5806_v36 = vpack.c.bf16 %v3135_v43, %v3134_v49  ;;  %v5481_v37 = vpack.c.bf16 %v3005_v19, %v3004_v15  ;;  %v3133_v28 = vsel %vm2621_vm3, %v2309_v24, %v2877_v45  ;;  %v2330_v61 = vadd.f32 %v7759_v32, %v7967_v57 }
 0x1e1   :  { %v1810_v39 = vadd.f32 %v7759_v32, %v7971_v63  ;;  %5902 = vst [vmem:[%s8240_s3 + $0x1b8] sm:$0xff] %v5486_v18   ;;  %v5801_v30 = vpack.c.bf16 %v3133_v28, %v3132_v4  ;;  %vm2498_vm4 = vcmp.gt.f32.partialorder %v1818_v41, 0.0  ;;  %v2754_v35 = vmul.f32 0.1, %v1818_v41 }
 0x1e2   :  { %5966 = vst [vmem:[%s8240_s3 + $0x3b8] sm:$0xff] %v5806_v36   ;;  %v2322_v47 = vadd.f32 %v7759_v32, %v7973_v14  ;;  %5901 = vst [vmem:[%s8240_s3 + $0x1b0] sm:$0xff] %v5481_v37   ;;  %vm2626_vm5 = vcmp.gt.f32.partialorder %v2330_v61, 0.0  ;;  %v2882_v57 = vmul.f32 0.1, %v2330_v61  ;;  %v1821_v11 = vadd.f32 %v7759_v32, %v7975_v58 }
 0x1e3   :  { %vm2496_vm0 = vcmp.gt.f32.partialorder %v1810_v39, 0.0  ;;  %v2752_v63 = vmul.f32 0.1, %v1810_v39  ;;  %5965 = vst [vmem:[%s8240_s3 + $0x3b0] sm:$0xff] %v5801_v30   ;;  %v3010_v33 = vsel %vm2498_vm4, %v1818_v41, %v2754_v35  ;;  %v2333_v60 = vadd.f32 %v7759_v32, %v7977_v53 }
 0x1e4   :  { %vm2624_vm6 = vcmp.gt.f32.partialorder %v2322_v47, 0.0  ;;  %v2880_v0 = vmul.f32 0.1, %v2322_v47  ;;  %v3138_v7 = vsel %vm2626_vm5, %v2330_v61, %v2882_v57  ;;  %v1813_v62 = vadd.f32 %v7759_v32, %v7982_v20 }
 0x1e5   :  { %v3008_v14 = vsel %vm2496_vm0, %v1810_v39, %v2752_v63  ;;  %vm2499_vm7 = vcmp.gt.f32.partialorder %v1821_v11, 0.0  ;;  %v2755_v8 = vmul.f32 0.1, %v1821_v11  ;;  %v2325_v49 = vadd.f32 %v7759_v32, %v7998_v31 }
 0x1e6   :  { %v3136_v51 = vsel %vm2624_vm6, %v2322_v47, %v2880_v0  ;;  %vm2627_vm8 = vcmp.gt.f32.partialorder %v2333_v60, 0.0  ;;  %v2883_v2 = vmul.f32 0.1, %v2333_v60  ;;  %vm2497_vm9 = vcmp.gt.f32.partialorder %v1813_v62, 0.0 }
 0x1e7   :  { %v2753_v24 = vmul.f32 0.1, %v1813_v62  ;;  %v3011_v22 = vsel %vm2499_vm7, %v1821_v11, %v2755_v8  ;;  %vm2625_vm10 = vcmp.gt.f32.partialorder %v2325_v49, 0.0  ;;  %v2881_v58 = vmul.f32 0.1, %v2325_v49 }
 0x1e8   :  { %v1834_v34 = vadd.f32 %v7759_v32, %v8008_v3  ;;  %v5496_v53 = vpack.c.bf16 %v3011_v22, %v3010_v33  ;;  %v3139_v27 = vsel %vm2627_vm8, %v2333_v60, %v2883_v2  ;;  %v2346_v20 = vadd.f32 %v7759_v32, %v8010_v44 }
 0x1e9   :  { %v3009_v17 = vsel %vm2497_vm9, %v1813_v62, %v2753_v24  ;;  %v5816_v15 = vpack.c.bf16 %v3139_v27, %v3138_v7  ;;  %v3137_v48 = vsel %vm2625_vm10, %v2325_v49, %v2881_v58  ;;  %v1826_v3 = vadd.f32 %v7759_v32, %v8012_v10 }
 0x1ea   :  { %v5491_v4 = vpack.c.bf16 %v3009_v17, %v3008_v14  ;;  %vm2502_vm11 = vcmp.gt.f32.partialorder %v1834_v34, 0.0  ;;  %5904 = vst [vmem:[%s8240_s3 + $0x1c8] sm:$0xff] %v5496_v53   ;;  %v5811_v31 = vpack.c.bf16 %v3137_v48, %v3136_v51  ;;  %v2758_v29 = vmul.f32 0.1, %v1834_v34 }
 0x1eb   :  { %vm2630_vm12 = vcmp.gt.f32.partialorder %v2346_v20, 0.0  ;;  %v2886_v43 = vmul.f32 0.1, %v2346_v20  ;;  %5968 = vst [vmem:[%s8240_s3 + $0x3c8] sm:$0xff] %v5816_v15   ;;  %v2338_v44 = vadd.f32 %v7759_v32, %v8014_v50  ;;  %v1837_v45 = vadd.f32 %v7759_v32, %v8018_v26 }
 0x1ec   :  { %5903 = vst [vmem:[%s8240_s3 + $0x1c0] sm:$0xff] %v5491_v4   ;;  %v2349_v18 = vadd.f32 %v7759_v32, %v8020_v16  ;;  %5967 = vst [vmem:[%s8240_s3 + $0x3c0] sm:$0xff] %v5811_v31   ;;  %v3014_v36 = vsel %vm2502_vm11, %v1834_v34, %v2758_v29  ;;  %v1829_v41 = vadd.f32 %v7759_v32, %v8026_v5  ;;  %vm2500_vm13 = vcmp.gt.f32.partialorder %v1826_v3, 0.0 }
 0x1ed   :  { %v3142_v19 = vsel %vm2630_vm12, %v2346_v20, %v2886_v43  ;;  %v2341_v10 = vadd.f32 %v7759_v32, %v8028_v6  ;;  %v2756_v50 = vmul.f32 0.1, %v1826_v3  ;;  %vm2628_vm14 = vcmp.gt.f32.partialorder %v2338_v44, 0.0 }
 0x1ee   :  { %v2884_v37 = vmul.f32 0.1, %v2338_v44  ;;  %vm2503_vm15 = vcmp.gt.f32.partialorder %v1837_v45, 0.0  ;;  %v2759_v26 = vmul.f32 0.1, %v1837_v45  ;;  %vm2631_vm1 = vcmp.gt.f32.partialorder %v2349_v18, 0.0 }
 0x1ef   :  { %v2887_v16 = vmul.f32 0.1, %v2349_v18  ;;  %v3012_v28 = vsel %vm2500_vm13, %v1826_v3, %v2756_v50  ;;  %vm2501_vm2 = vcmp.gt.f32.partialorder %v1829_v41, 0.0  ;;  %v2757_v39 = vmul.f32 0.1, %v1829_v41 }
 0x1f0   :  { %v3140_v61 = vsel %vm2628_vm14, %v2338_v44, %v2884_v37  ;;  %v3015_v30 = vsel %vm2503_vm15, %v1837_v45, %v2759_v26  ;;  %vm2629_vm3 = vcmp.gt.f32.partialorder %v2341_v10, 0.0  ;;  %v2885_v47 = vmul.f32 0.1, %v2341_v10 }
 0x1f1   :  { %v3143_v35 = vsel %vm2631_vm1, %v2349_v18, %v2887_v16  ;;  %v5506_v5 = vpack.c.bf16 %v3015_v30, %v3014_v36  ;;  %v3013_v63 = vsel %vm2501_vm2, %v1829_v41, %v2757_v39  ;;  %v1850_v6 = vadd.f32 %v7759_v32, %v8050_v1 }
 0x1f2   :  { %v5826_v57 = vpack.c.bf16 %v3143_v35, %v3142_v19  ;;  %v5501_v33 = vpack.c.bf16 %v3013_v63, %v3012_v28  ;;  %v3141_v0 = vsel %vm2629_vm3, %v2341_v10, %v2885_v47  ;;  %v2362_v11 = vadd.f32 %v7759_v32, %v8054_v21 }
 0x1f3   :  { %v1842_v7 = vadd.f32 %v7759_v32, %v8056_v54  ;;  %5906 = vst [vmem:[%s8240_s3 + $0x1d8] sm:$0xff] %v5506_v5   ;;  %v5821_v14 = vpack.c.bf16 %v3141_v0, %v3140_v61  ;;  %vm2506_vm4 = vcmp.gt.f32.partialorder %v1850_v6, 0.0  ;;  %v2762_v60 = vmul.f32 0.1, %v1850_v6 }
 0x1f4   :  { %5970 = vst [vmem:[%s8240_s3 + $0x3d8] sm:$0xff] %v5826_v57   ;;  %v2354_v1 = vadd.f32 %v7759_v32, %v8060_v52  ;;  %5905 = vst [vmem:[%s8240_s3 + $0x1d0] sm:$0xff] %v5501_v33   ;;  %vm2634_vm5 = vcmp.gt.f32.partialorder %v2362_v11, 0.0  ;;  %v2890_v21 = vmul.f32 0.1, %v2362_v11  ;;  %v1853_v51 = vadd.f32 %v7759_v32, %v8062_v12 }
 0x1f5   :  { %vm2504_vm0 = vcmp.gt.f32.partialorder %v1842_v7, 0.0  ;;  %v2760_v54 = vmul.f32 0.1, %v1842_v7  ;;  %5969 = vst [vmem:[%s8240_s3 + $0x3d0] sm:$0xff] %v5821_v14   ;;  %v3018_v62 = vsel %vm2506_vm4, %v1850_v6, %v2762_v60  ;;  %v2365_v52 = vadd.f32 %v7759_v32, %v8066_v13 }
 0x1f6   :  { %vm2632_vm6 = vcmp.gt.f32.partialorder %v2354_v1, 0.0  ;;  %v3146_v8 = vsel %vm2634_vm5, %v2362_v11, %v2890_v21  ;;  %v2888_v49 = vmul.f32 0.1, %v2354_v1  ;;  %v1845_v2 = vadd.f32 %v7759_v32, %v8068_v9 }
 0x1f7   :  { %v3016_v24 = vsel %vm2504_vm0, %v1842_v7, %v2760_v54  ;;  %vm2507_vm7 = vcmp.gt.f32.partialorder %v1853_v51, 0.0  ;;  %v2763_v22 = vmul.f32 0.1, %v1853_v51  ;;  %v2357_v58 = vadd.f32 %v7759_v32, %v8070_v38 }
 0x1f8   :  { %vm2635_vm8 = vcmp.gt.f32.partialorder %v2365_v52, 0.0  ;;  %v2891_v34 = vmul.f32 0.1, %v2365_v52  ;;  %vm2505_vm9 = vcmp.gt.f32.partialorder %v1845_v2, 0.0  ;;  %v2761_v53 = vmul.f32 0.1, %v1845_v2 }
 0x1f9   :  { %v3019_v27 = vsel %vm2507_vm7, %v1853_v51, %v2763_v22  ;;  %vm2633_vm10 = vcmp.gt.f32.partialorder %v2357_v58, 0.0  ;;  %v2889_v12 = vmul.f32 0.1, %v2357_v58  ;;  %v1866_v17 = vadd.f32 %v7759_v32, %v8096_v55 }
 0x1fa   :  { %v5516_v13 = vpack.c.bf16 %v3019_v27, %v3018_v62  ;;  %v3147_v20 = vsel %vm2635_vm8, %v2365_v52, %v2891_v34  ;;  %v3017_v15 = vsel %vm2505_vm9, %v1845_v2, %v2761_v53  ;;  %v2378_v9 = vadd.f32 %v7759_v32, %v8098_v59 }
 0x1fb   :  { %v3144_v4 = vsel %vm2632_vm6, %v2354_v1, %v2888_v49  ;;  %v5836_v48 = vpack.c.bf16 %v3147_v20, %v3146_v8  ;;  %v5511_v38 = vpack.c.bf16 %v3017_v15, %v3016_v24  ;;  %v3145_v31 = vsel %vm2633_vm10, %v2357_v58, %v2889_v12 }
 0x1fc   :  { %5908 = vst [vmem:[%s8240_s3 + $0x1e8] sm:$0xff] %v5516_v13   ;;  %v5831_v29 = vpack.c.bf16 %v3145_v31, %v3144_v4  ;;  %vm2510_vm11 = vcmp.gt.f32.partialorder %v1866_v17, 0.0  ;;  %v2766_v43 = vmul.f32 0.1, %v1866_v17  ;;  %v2894_v3 = vmul.f32 0.1, %v2378_v9 }
 0x1fd   :  { %5972 = vst [vmem:[%s8240_s3 + $0x3e8] sm:$0xff] %v5836_v48   ;;  %5907 = vst [vmem:[%s8240_s3 + $0x1e0] sm:$0xff] %v5511_v38   ;;  %v1858_v55 = vadd.f32 %v7759_v32, %v8100_v46  ;;  %v2370_v59 = vadd.f32 %v7759_v32, %v8102_v25  ;;  %v1869_v44 = vadd.f32 %v7759_v32, %v8104_v40  ;;  %vm2638_vm12 = vcmp.gt.f32.partialorder %v2378_v9, 0.0 }
 0x1fe   :  { %v2381_v45 = vadd.f32 %v7759_v32, %v8108_v23  ;;  %5971 = vst [vmem:[%s8240_s3 + $0x3e0] sm:$0xff] %v5831_v29   ;;  %v1861_v18 = vadd.f32 %v7759_v32, %v8110_v56  ;;  %v2373_v46 = vadd.f32 %v7759_v32, %v8116_v42  ;;  %v3022_v36 = vsel %vm2510_vm11, %v1866_v17, %v2766_v43 }
 0x1ff   :  { %vm2508_vm13 = vcmp.gt.f32.partialorder %v1858_v55, 0.0  ;;  %v2764_v25 = vmul.f32 0.1, %v1858_v55  ;;  %v2892_v19 = vmul.f32 0.1, %v2370_v59  ;;  %vm2511_vm14 = vcmp.gt.f32.partialorder %v1869_v44, 0.0 }
 0x200   :  { %v2767_v40 = vmul.f32 0.1, %v1869_v44  ;;  %vm2639_vm15 = vcmp.gt.f32.partialorder %v2381_v45, 0.0  ;;  %v2895_v41 = vmul.f32 0.1, %v2381_v45  ;;  %v3150_v23 = vsel %vm2638_vm12, %v2378_v9, %v2894_v3 }
 0x201   :  { %vm2636_vm1 = vcmp.gt.f32.partialorder %v2370_v59, 0.0  ;;  %vm2509_vm2 = vcmp.gt.f32.partialorder %v1861_v18, 0.0  ;;  %v2765_v10 = vmul.f32 0.1, %v1861_v18  ;;  %vm2637_vm3 = vcmp.gt.f32.partialorder %v2373_v46, 0.0 }
 0x202   :  { %v3023_v50 = vsel %vm2511_vm14, %v1869_v44, %v2767_v40  ;;  %v3151_v37 = vsel %vm2639_vm15, %v2381_v45, %v2895_v41  ;;  %v2893_v26 = vmul.f32 0.1, %v2373_v46  ;;  %v3020_v56 = vsel %vm2508_vm13, %v1858_v55, %v2764_v25 }
 0x203   :  { %v5526_v16 = vpack.c.bf16 %v3023_v50, %v3022_v36  ;;  %v5846_v28 = vpack.c.bf16 %v3151_v37, %v3150_v23  ;;  %v3021_v32 = vsel %vm2509_vm2, %v1861_v18, %v2765_v10  ;;  %v3148_v42 = vsel %vm2636_vm1, %v2370_v59, %v2892_v19 }
 0x204   :  { %v5521_v61 = vpack.c.bf16 %v3021_v32, %v3020_v56  ;;  %v3149_v39 = vsel %vm2637_vm3, %v2373_v46, %v2893_v26 }
 0x205   :  { %5910 = vst [vmem:[%s8240_s3 + $0x1f8] sm:$0xff] %v5526_v16   ;;  %5974 = vst [vmem:[%s8240_s3 + $0x3f8] sm:$0xff] %v5846_v28   ;;  %v5841_v30 = vpack.c.bf16 %v3149_v39, %v3148_v42 }
 0x206   :  { %5909 = vst [vmem:[%s8240_s3 + $0x1f0] sm:$0xff] %v5521_v61  }
 0x207   :  { %5973 = vst [vmem:[%s8240_s3 + $0x3f0] sm:$0xff] %v5841_v30  }

// kernel: _lambda_.11
= control target key start
LH: loop header
LB: loop body
LE: loop exit
PB: predicated region body
PF: predicated region fallthrough
CT: control target
= control target key end

     0   :  { %vm282_vm0 = vcmask 588800   ;;  %vm379_vm1 = vcmask 1043456   ;;  %s2074_s1 = inlined_call_operand.vmem [shape: bf16[72,128], index: 1, kind: input, shape index: {}]   ;;  %s2075_s0 = inlined_call_operand.vmem [shape: bf16[512,72], index: 0, kind: input, shape index: {}]   ;;  %s2076_s2 = inlined_call_operand.vmem [shape: f32[1,128], index: 2, kind: input, shape index: {}]   ;;  %s2077_s3 = inlined_call_operand.vmem [shape: bf16[512,128], index: 3, kind: output, shape index: {}]  }
   0x1   :  { %v1700_v0 = vld [vmem:[%s2074_s1] sm:$0xff]   ;;  %v1701_v1 = vld [vmem:[%s2074_s1 + $0x8] sm:$0xff]   ;;  %v1702_v2 = vld [vmem:[%s2074_s1 + $0x10] sm:$0xff]  }
   0x2   :  { %1614 = vmatprep.subr.bf16.mxu0 %v1700_v0  ;;  %1688 = vmatprep.subr.bf16.mxu1 %v1700_v0  ;;  %v1705_v3 = vld [vmem:[%s2075_s0] sm:$0xff]   ;;  %v1703_v5 = vld [vmem:[%s2074_s1 + $0x18] sm:$0xff]   ;;  %v1707_v8 = vld [vmem:[%s2075_s0 + $0x8] sm:$0xff]  }
   0x3   :  { %1615 = vmatpush3.bf16.msra.mxu0 %v1700_v0  ;;  %1693 = vmatpush3.bf16.msra.mxu1 %v1700_v0  ;;  %v1706_v4 = vld [vmem:[%s2075_s0 + $0x80] sm:$0xff]   ;;  %v1708_v9 = vld [vmem:[%s2075_s0 + $0x88] sm:$0xff]   ;;  %v1709_v10 = vld [vmem:[%s2075_s0 + $0x10] sm:$0xff]  }
   0x4   :  { %1616 = vmatprep.subr.bf16.mxu0 %v1701_v1  ;;  %1689 = vmatprep.subr.bf16.mxu1 %v1701_v1  ;;  %v1704_v6 = vld [vmem:[%s2074_s1 + $0x20] ss:$0 sps:$4 sm:$0xff]   ;;  %v1710_v11 = vld [vmem:[%s2075_s0 + $0x90] sm:$0xff]   ;;  %v1711_v12 = vld [vmem:[%s2075_s0 + $0x18] sm:$0xff]  }
   0x5   :  { %1624 = vmatprep.mubr.msk.bf16.mxu0 %vm282_vm0, %v1705_v3  ;;  %1656 = vmatprep.mubr.msk.bf16.mxu1 %vm282_vm0, %v1706_v4  ;;  %v381_v7 = vsel %vm379_vm1, %v1704_v6, 0  ;;  %v1712_v13 = vld [vmem:[%s2075_s0 + $0x98] sm:$0xff]   ;;  %v1713_v14 = vld [vmem:[%s2075_s0 + $0x20] sm:$0xff]   ;;  %v1715_v16 = vld [vmem:[%s2075_s0 + $0x28] sm:$0xff]  }
   0x6   :  { %v1714_v15 = vld [vmem:[%s2075_s0 + $0xa0] sm:$0xff]   ;;  %v1716_v17 = vld [vmem:[%s2075_s0 + $0xa8] sm:$0xff]   ;;  %v1717_v18 = vld [vmem:[%s2075_s0 + $0x30] sm:$0xff]  }
   0x7   :  { %1617 = vmatpush3.bf16.msra.mxu0 %v1701_v1  ;;  %1694 = vmatpush3.bf16.msra.mxu1 %v1701_v1  ;;  %v1718_v19 = vld [vmem:[%s2075_s0 + $0xb0] sm:$0xff]   ;;  %v1719_v20 = vld [vmem:[%s2075_s0 + $0x38] sm:$0xff]   ;;  %v1721_v22 = vld [vmem:[%s2075_s0 + $0x40] sm:$0xff]  }
   0x8   :  { %1618 = vmatprep.subr.bf16.mxu0 %v1702_v2  ;;  %1690 = vmatprep.subr.bf16.mxu1 %v1702_v2  ;;  %v1720_v21 = vld [vmem:[%s2075_s0 + $0xb8] sm:$0xff]   ;;  %v1722_v23 = vld [vmem:[%s2075_s0 + $0xc0] sm:$0xff]   ;;  %v1723_v24 = vld [vmem:[%s2075_s0 + $0x48] sm:$0xff]  }
   0x9   :  { %v1724_v25 = vld [vmem:[%s2075_s0 + $0xc8] sm:$0xff]   ;;  %v1725_v26 = vld [vmem:[%s2075_s0 + $0x50] sm:$0xff]   ;;  %v1727_v28 = vld [vmem:[%s2075_s0 + $0x58] sm:$0xff]  }
   0xa   :  { %v1726_v27 = vld [vmem:[%s2075_s0 + $0xd0] sm:$0xff]   ;;  %v1728_v29 = vld [vmem:[%s2075_s0 + $0xd8] sm:$0xff]   ;;  %v1729_v30 = vld [vmem:[%s2075_s0 + $0x60] sm:$0xff]  }
   0xb   :  { %1619 = vmatpush3.bf16.msra.mxu0 %v1702_v2  ;;  %1695 = vmatpush3.bf16.msra.mxu1 %v1702_v2  ;;  %v1730_v31 = vld [vmem:[%s2075_s0 + $0xe0] sm:$0xff]   ;;  %v1731_v32 = vld [vmem:[%s2075_s0 + $0x68] sm:$0xff]   ;;  %v1733_v34 = vld [vmem:[%s2075_s0 + $0x70] sm:$0xff]  }
   0xc   :  { %1620 = vmatprep.subr.bf16.mxu0 %v1703_v5  ;;  %1691 = vmatprep.subr.bf16.mxu1 %v1703_v5  ;;  %v1732_v33 = vld [vmem:[%s2075_s0 + $0xe8] sm:$0xff]   ;;  %v1734_v35 = vld [vmem:[%s2075_s0 + $0xf0] sm:$0xff]   ;;  %v1735_v36 = vld [vmem:[%s2075_s0 + $0x78] sm:$0xff]  }
   0xd   :  { %v1736_v37 = vld [vmem:[%s2075_s0 + $0xf8] sm:$0xff]   ;;  %v1903_v38 = vld [vmem:[%s2076_s2] ss:$0 sm:$0xff] }
   0xf   :  { %1621 = vmatpush3.bf16.msra.mxu0 %v1703_v5  ;;  %1696 = vmatpush3.bf16.msra.mxu1 %v1703_v5 }
  0x10   :  { %1698 = vmatprep.subr.msk.bf16.mxu0 %vm379_vm1, %v1704_v6  ;;  %1699 = vmatprep.subr.msk.bf16.mxu1 %vm379_vm1, %v1704_v6 }
  0x13   :  { %1623 = vmatpush3.bf16.msra.mxu0 %v381_v7  ;;  %1697 = vmatpush3.bf16.msra.mxu1 %v381_v7 }
  0x16   :  { %1625 = vmatmul.mubr.msk.bf16.vlgmr.msra.gmra.mrb[0].mxu0 %vm282_vm0, %v1707_v8  ;;  %1657 = vmatmul.mubr.msk.bf16.vlgmr.msra.gmra.mrb[0].mxu1 %vm282_vm0, %v1708_v9 }
  0x17   :  { %1628 = vmatprep.mubr.msk.bf16.mxu0 %vm282_vm0, %v1709_v10  ;;  %1660 = vmatprep.mubr.msk.bf16.mxu1 %vm282_vm0, %v1710_v11 }
  0x1e   :  { %1629 = vmatmul.mubr.msk.bf16.gmra.mrb[4].mxu0 %vm282_vm0, %v1711_v12  ;;  %1661 = vmatmul.mubr.msk.bf16.gmra.mrb[4].mxu1 %vm282_vm0, %v1712_v13 }
  0x1f   :  { %1632 = vmatprep.mubr.msk.bf16.mxu0 %vm282_vm0, %v1713_v14  ;;  %1664 = vmatprep.mubr.msk.bf16.mxu1 %vm282_vm0, %v1714_v15 }
  0x26   :  { %1633 = vmatmul.mubr.msk.bf16.gmra.mrb[8].mxu0 %vm282_vm0, %v1715_v16  ;;  %1665 = vmatmul.mubr.msk.bf16.gmra.mrb[8].mxu1 %vm282_vm0, %v1716_v17 }
  0x27   :  { %1636 = vmatprep.mubr.msk.bf16.mxu0 %vm282_vm0, %v1717_v18  ;;  %1668 = vmatprep.mubr.msk.bf16.mxu1 %vm282_vm0, %v1718_v19 }
  0x2e   :  { %1637 = vmatmul.mubr.msk.bf16.gmra.mrb[12].mxu0 %vm282_vm0, %v1719_v20  ;;  %1669 = vmatmul.mubr.msk.bf16.gmra.mrb[12].mxu1 %vm282_vm0, %v1720_v21 }
  0x2f   :  { %1640 = vmatprep.mubr.msk.bf16.mxu0 %vm282_vm0, %v1721_v22  ;;  %1672 = vmatprep.mubr.msk.bf16.mxu1 %vm282_vm0, %v1722_v23 }
  0x36   :  { %1641 = vmatmul.mubr.msk.bf16.gmra.mrb[16].mxu0 %vm282_vm0, %v1723_v24  ;;  %1673 = vmatmul.mubr.msk.bf16.gmra.mrb[16].mxu1 %vm282_vm0, %v1724_v25 }
  0x37   :  { %1644 = vmatprep.mubr.msk.bf16.mxu0 %vm282_vm0, %v1725_v26  ;;  %1676 = vmatprep.mubr.msk.bf16.mxu1 %vm282_vm0, %v1726_v27 }
  0x3e   :  { %1645 = vmatmul.mubr.msk.bf16.gmra.mrb[20].mxu0 %vm282_vm0, %v1727_v28  ;;  %1677 = vmatmul.mubr.msk.bf16.gmra.mrb[20].mxu1 %vm282_vm0, %v1728_v29 }
  0x3f   :  { %1648 = vmatprep.mubr.msk.bf16.mxu0 %vm282_vm0, %v1729_v30  ;;  %1680 = vmatprep.mubr.msk.bf16.mxu1 %vm282_vm0, %v1730_v31 }
  0x46   :  { %1649 = vmatmul.mubr.msk.bf16.gmra.mrb[24].mxu0 %vm282_vm0, %v1731_v32  ;;  %1681 = vmatmul.mubr.msk.bf16.gmra.mrb[24].mxu1 %vm282_vm0, %v1732_v33 }
  0x47   :  { %1652 = vmatprep.mubr.msk.bf16.mxu0 %vm282_vm0, %v1733_v34  ;;  %1684 = vmatprep.mubr.msk.bf16.mxu1 %vm282_vm0, %v1734_v35 }
  0x4e   :  { %1653 = vmatmul.mubr.msk.bf16.gmra.mrb[28].mxu0 %vm282_vm0, %v1735_v36  ;;  %1685 = vmatmul.mubr.msk.bf16.gmra.mrb[28].mxu1 %vm282_vm0, %v1736_v37 }
  0xe9   :  { %v1626_v39 = vpop.f32.mrb[0].mxu0  ;;  %v1658_v40 = vpop.f32.mrb[0].mxu1 }
  0xea   :  { %v426_v41 = vadd.f32 %v1626_v39, %v1903_v38  ;;  %v554_v42 = vadd.f32 %v1658_v40, %v1903_v38  ;;  %v417_v43 = vpop.f32.mrb[1].mxu0  ;;  %v545_v44 = vpop.f32.mrb[1].mxu1 }
  0xeb   :  { %v418_v45 = vadd.f32 %v1903_v38, %v417_v43  ;;  %v546_v46 = vadd.f32 %v1903_v38, %v545_v44  ;;  %v1627_v47 = vpop.f32.mrb[2].mxu0  ;;  %v1659_v48 = vpop.f32.mrb[2].mxu1 }
  0xec   :  { %vm674_vm2 = vcmp.gt.f32.partialorder %v426_v41, 0.0  ;;  %v738_v49 = vmul.f32 0.1, %v426_v41  ;;  %vm706_vm3 = vcmp.gt.f32.partialorder %v554_v42, 0.0  ;;  %v770_v50 = vmul.f32 0.1, %v554_v42 }
  0xed   :  { %vm672_vm4 = vcmp.gt.f32.partialorder %v418_v45, 0.0  ;;  %v736_v51 = vmul.f32 0.1, %v418_v45  ;;  %vm704_vm5 = vcmp.gt.f32.partialorder %v546_v46, 0.0  ;;  %v768_v52 = vmul.f32 0.1, %v546_v46 }
  0xee   :  { %v429_v53 = vadd.f32 %v1627_v47, %v1903_v38  ;;  %v557_v54 = vadd.f32 %v1659_v48, %v1903_v38  ;;  %v420_v55 = vpop.f32.mrb[3].mxu0  ;;  %v548_v56 = vpop.f32.mrb[3].mxu1  ;;  %v802_v57 = vsel %vm674_vm2, %v426_v41, %v738_v49  ;;  %v834_v58 = vsel %vm706_vm3, %v554_v42, %v770_v50 }
  0xef   :  { %v421_v59 = vadd.f32 %v1903_v38, %v420_v55  ;;  %v549_v60 = vadd.f32 %v1903_v38, %v548_v56  ;;  %v800_v1 = vsel %vm672_vm4, %v418_v45, %v736_v51  ;;  %v832_v2 = vsel %vm704_vm5, %v546_v46, %v768_v52 }
  0xf0   :  { %vm675_vm6 = vcmp.gt.f32.partialorder %v429_v53, 0.0  ;;  %v739_v61 = vmul.f32 0.1, %v429_v53  ;;  %vm707_vm7 = vcmp.gt.f32.partialorder %v557_v54, 0.0  ;;  %v771_v62 = vmul.f32 0.1, %v557_v54 }
  0xf1   :  { %vm673_vm8 = vcmp.gt.f32.partialorder %v421_v59, 0.0  ;;  %v737_v63 = vmul.f32 0.1, %v421_v59  ;;  %vm705_vm9 = vcmp.gt.f32.partialorder %v549_v60, 0.0  ;;  %v769_v0 = vmul.f32 0.1, %v549_v60 }
  0xf2   :  { %v803_v3 = vsel %vm675_vm6, %v429_v53, %v739_v61  ;;  %v835_v4 = vsel %vm707_vm7, %v557_v54, %v771_v62  ;;  %v1630_v5 = vpop.f32.mrb[4].mxu0  ;;  %v1662_v6 = vpop.f32.mrb[4].mxu1 }
  0xf3   :  { %v1394_v7 = vpack.c.bf16 %v803_v3, %v802_v57  ;;  %v1474_v8 = vpack.c.bf16 %v835_v4, %v834_v58  ;;  %v801_v9 = vsel %vm673_vm8, %v421_v59, %v737_v63  ;;  %v833_v10 = vsel %vm705_vm9, %v549_v60, %v769_v0  ;;  %v433_v11 = vpop.f32.mrb[5].mxu0  ;;  %v561_v12 = vpop.f32.mrb[5].mxu1 }
  0xf4   :  { %v1389_v13 = vpack.c.bf16 %v801_v9, %v800_v1  ;;  %v1469_v14 = vpack.c.bf16 %v833_v10, %v832_v2  ;;  %v442_v15 = vadd.f32 %v1630_v5, %v1903_v38  ;;  %v570_v16 = vadd.f32 %v1662_v6, %v1903_v38  ;;  %v1631_v17 = vpop.f32.mrb[6].mxu0  ;;  %v1663_v18 = vpop.f32.mrb[6].mxu1 }
  0xf5   :  { %1546 = vst [vmem:[%s2077_s3 + $0x8] sm:$0xff] %v1394_v7   ;;  %1562 = vst [vmem:[%s2077_s3 + $0x88] sm:$0xff] %v1474_v8   ;;  %v434_v19 = vadd.f32 %v1903_v38, %v433_v11  ;;  %v562_v20 = vadd.f32 %v1903_v38, %v561_v12  ;;  %v445_v21 = vadd.f32 %v1631_v17, %v1903_v38  ;;  %v436_v23 = vpop.f32.mrb[7].mxu0  ;;  %v564_v24 = vpop.f32.mrb[7].mxu1 }
  0xf6   :  { %v573_v22 = vadd.f32 %v1663_v18, %v1903_v38  ;;  %1390 = vst [vmem:[%s2077_s3] sm:$0xff] %v1389_v13   ;;  %1561 = vst [vmem:[%s2077_s3 + $0x80] sm:$0xff] %v1469_v14   ;;  %vm678_vm10 = vcmp.gt.f32.partialorder %v442_v15, 0.0  ;;  %v742_v25 = vmul.f32 0.1, %v442_v15  ;;  %vm710_vm11 = vcmp.gt.f32.partialorder %v570_v16, 0.0 }
  0xf7   :  { %v774_v26 = vmul.f32 0.1, %v570_v16  ;;  %vm676_vm12 = vcmp.gt.f32.partialorder %v434_v19, 0.0  ;;  %v740_v27 = vmul.f32 0.1, %v434_v19  ;;  %vm708_vm13 = vcmp.gt.f32.partialorder %v562_v20, 0.0 }
  0xf8   :  { %v772_v28 = vmul.f32 0.1, %v562_v20  ;;  %v806_v29 = vsel %vm678_vm10, %v442_v15, %v742_v25  ;;  %vm679_vm14 = vcmp.gt.f32.partialorder %v445_v21, 0.0  ;;  %v743_v31 = vmul.f32 0.1, %v445_v21 }
  0xf9   :  { %v838_v30 = vsel %vm710_vm11, %v570_v16, %v774_v26  ;;  %v804_v32 = vsel %vm676_vm12, %v434_v19, %v740_v27  ;;  %vm711_vm15 = vcmp.gt.f32.partialorder %v573_v22, 0.0  ;;  %v775_v34 = vmul.f32 0.1, %v573_v22  ;;  %v1634_v35 = vpop.f32.mrb[8].mxu0  ;;  %v1666_v36 = vpop.f32.mrb[8].mxu1 }
  0xfa   :  { %v836_v33 = vsel %vm708_vm13, %v562_v20, %v772_v28  ;;  %v807_v37 = vsel %vm679_vm14, %v445_v21, %v743_v31  ;;  %v437_v39 = vadd.f32 %v1903_v38, %v436_v23  ;;  %v565_v40 = vadd.f32 %v1903_v38, %v564_v24  ;;  %v449_v42 = vpop.f32.mrb[9].mxu0  ;;  %v577_v43 = vpop.f32.mrb[9].mxu1 }
  0xfb   :  { %v458_v41 = vadd.f32 %v1634_v35, %v1903_v38  ;;  %v1404_v44 = vpack.c.bf16 %v807_v37, %v806_v29  ;;  %v839_v45 = vsel %vm711_vm15, %v573_v22, %v775_v34  ;;  %v586_v46 = vadd.f32 %v1666_v36, %v1903_v38  ;;  %v1635_v48 = vpop.f32.mrb[10].mxu0  ;;  %v1667_v49 = vpop.f32.mrb[10].mxu1 }
  0xfc   :  { %v450_v47 = vadd.f32 %v1903_v38, %v449_v42  ;;  %v1484_v50 = vpack.c.bf16 %v839_v45, %v838_v30  ;;  %vm677_vm0 = vcmp.gt.f32.partialorder %v437_v39, 0.0  ;;  %v741_v51 = vmul.f32 0.1, %v437_v39  ;;  %v452_v52 = vpop.f32.mrb[11].mxu0  ;;  %v580_v53 = vpop.f32.mrb[11].mxu1 }
  0xfd   :  { %vm709_vm1 = vcmp.gt.f32.partialorder %v565_v40, 0.0  ;;  %1548 = vst [vmem:[%s2077_s3 + $0x18] sm:$0xff] %v1404_v44   ;;  %v773_v54 = vmul.f32 0.1, %v565_v40  ;;  %vm682_vm2 = vcmp.gt.f32.partialorder %v458_v41, 0.0  ;;  %vm714_vm3 = vcmp.gt.f32.partialorder %v586_v46, 0.0 }
  0xfe   :  { %v746_v55 = vmul.f32 0.1, %v458_v41  ;;  %1564 = vst [vmem:[%s2077_s3 + $0x98] sm:$0xff] %v1484_v50   ;;  %v805_v56 = vsel %vm677_vm0, %v437_v39, %v741_v51  ;;  %v778_v57 = vmul.f32 0.1, %v586_v46  ;;  %vm680_vm4 = vcmp.gt.f32.partialorder %v450_v47, 0.0 }
  0xff   :  { %v744_v58 = vmul.f32 0.1, %v450_v47  ;;  %v1399_v59 = vpack.c.bf16 %v805_v56, %v804_v32  ;;  %v837_v60 = vsel %vm709_vm1, %v565_v40, %v773_v54  ;;  %v578_v62 = vadd.f32 %v1903_v38, %v577_v43 }
 0x100   :  { %v810_v61 = vsel %vm682_vm2, %v458_v41, %v746_v55  ;;  %v1479_v63 = vpack.c.bf16 %v837_v60, %v836_v33  ;;  %v842_v0 = vsel %vm714_vm3, %v586_v46, %v778_v57  ;;  %v461_v2 = vadd.f32 %v1635_v48, %v1903_v38 }
 0x101   :  { %v808_v1 = vsel %vm680_vm4, %v450_v47, %v744_v58  ;;  %1547 = vst [vmem:[%s2077_s3 + $0x10] sm:$0xff] %v1399_v59   ;;  %vm712_vm5 = vcmp.gt.f32.partialorder %v578_v62, 0.0  ;;  %v776_v3 = vmul.f32 0.1, %v578_v62  ;;  %v589_v4 = vadd.f32 %v1667_v49, %v1903_v38  ;;  %v1638_v6 = vpop.f32.mrb[12].mxu0  ;;  %v1670_v7 = vpop.f32.mrb[12].mxu1 }
 0x102   :  { %v453_v5 = vadd.f32 %v1903_v38, %v452_v52  ;;  %1563 = vst [vmem:[%s2077_s3 + $0x90] sm:$0xff] %v1479_v63   ;;  %vm683_vm6 = vcmp.gt.f32.partialorder %v461_v2, 0.0  ;;  %v747_v8 = vmul.f32 0.1, %v461_v2  ;;  %v581_v9 = vadd.f32 %v1903_v38, %v580_v53  ;;  %v465_v11 = vpop.f32.mrb[13].mxu0  ;;  %v593_v12 = vpop.f32.mrb[13].mxu1 }
 0x103   :  { %v474_v10 = vadd.f32 %v1638_v6, %v1903_v38  ;;  %v840_v13 = vsel %vm712_vm5, %v578_v62, %v776_v3  ;;  %vm715_vm7 = vcmp.gt.f32.partialorder %v589_v4, 0.0  ;;  %v779_v14 = vmul.f32 0.1, %v589_v4  ;;  %v1639_v15 = vpop.f32.mrb[14].mxu0  ;;  %v1671_v16 = vpop.f32.mrb[14].mxu1 }
 0x104   :  { %vm681_vm8 = vcmp.gt.f32.partialorder %v453_v5, 0.0  ;;  %v811_v17 = vsel %vm683_vm6, %v461_v2, %v747_v8  ;;  %v745_v18 = vmul.f32 0.1, %v453_v5  ;;  %vm713_vm9 = vcmp.gt.f32.partialorder %v581_v9, 0.0  ;;  %v468_v20 = vpop.f32.mrb[15].mxu0  ;;  %v596_v24 = vpop.f32.mrb[15].mxu1 }
 0x105   :  { %v777_v19 = vmul.f32 0.1, %v581_v9  ;;  %v1414_v21 = vpack.c.bf16 %v811_v17, %v810_v61  ;;  %v843_v22 = vsel %vm715_vm7, %v589_v4, %v779_v14  ;;  %vm686_vm10 = vcmp.gt.f32.partialorder %v474_v10, 0.0 }
 0x106   :  { %v750_v23 = vmul.f32 0.1, %v474_v10  ;;  %v1494_v25 = vpack.c.bf16 %v843_v22, %v842_v0  ;;  %v809_v26 = vsel %vm681_vm8, %v453_v5, %v745_v18  ;;  %v602_v28 = vadd.f32 %v1670_v7, %v1903_v38 }
 0x107   :  { %v841_v27 = vsel %vm713_vm9, %v581_v9, %v777_v19  ;;  %1550 = vst [vmem:[%s2077_s3 + $0x28] sm:$0xff] %v1414_v21   ;;  %v1409_v29 = vpack.c.bf16 %v809_v26, %v808_v1  ;;  %v466_v32 = vadd.f32 %v1903_v38, %v465_v11  ;;  %v594_v34 = vadd.f32 %v1903_v38, %v593_v12 }
 0x108   :  { %v1489_v30 = vpack.c.bf16 %v841_v27, %v840_v13  ;;  %v814_v31 = vsel %vm686_vm10, %v474_v10, %v750_v23  ;;  %1566 = vst [vmem:[%s2077_s3 + $0xa8] sm:$0xff] %v1494_v25   ;;  %vm718_vm11 = vcmp.gt.f32.partialorder %v602_v28, 0.0  ;;  %v782_v33 = vmul.f32 0.1, %v602_v28 }
 0x109   :  { %v477_v35 = vadd.f32 %v1639_v15, %v1903_v38  ;;  %1549 = vst [vmem:[%s2077_s3 + $0x20] sm:$0xff] %v1409_v29   ;;  %vm684_vm12 = vcmp.gt.f32.partialorder %v466_v32, 0.0  ;;  %v748_v36 = vmul.f32 0.1, %v466_v32  ;;  %v605_v37 = vadd.f32 %v1671_v16, %v1903_v38  ;;  %v1642_v40 = vpop.f32.mrb[16].mxu0  ;;  %v1674_v41 = vpop.f32.mrb[16].mxu1 }
 0x10a   :  { %1565 = vst [vmem:[%s2077_s3 + $0xa0] sm:$0xff] %v1489_v30   ;;  %v469_v39 = vadd.f32 %v1903_v38, %v468_v20  ;;  %v846_v42 = vsel %vm718_vm11, %v602_v28, %v782_v33  ;;  %vm716_vm13 = vcmp.gt.f32.partialorder %v594_v34, 0.0  ;;  %v780_v43 = vmul.f32 0.1, %v594_v34  ;;  %v481_v44 = vpop.f32.mrb[17].mxu0  ;;  %v609_v45 = vpop.f32.mrb[17].mxu1 }
 0x10b   :  { %vm687_vm14 = vcmp.gt.f32.partialorder %v477_v35, 0.0  ;;  %v812_v46 = vsel %vm684_vm12, %v466_v32, %v748_v36  ;;  %v751_v47 = vmul.f32 0.1, %v477_v35  ;;  %vm719_vm15 = vcmp.gt.f32.partialorder %v605_v37, 0.0  ;;  %v1643_v49 = vpop.f32.mrb[18].mxu0  ;;  %v1675_v53 = vpop.f32.mrb[18].mxu1 }
 0x10c   :  { %v783_v48 = vmul.f32 0.1, %v605_v37  ;;  %v844_v50 = vsel %vm716_vm13, %v594_v34, %v780_v43  ;;  %vm685_vm0 = vcmp.gt.f32.partialorder %v469_v39, 0.0  ;;  %v749_v51 = vmul.f32 0.1, %v469_v39  ;;  %v484_v54 = vpop.f32.mrb[19].mxu0 }
 0x10d   :  { %v597_v52 = vadd.f32 %v1903_v38, %v596_v24  ;;  %v815_v55 = vsel %vm687_vm14, %v477_v35, %v751_v47  ;;  %v490_v57 = vadd.f32 %v1642_v40, %v1903_v38  ;;  %v618_v58 = vadd.f32 %v1674_v41, %v1903_v38  ;;  %v612_v59 = vpop.f32.mrb[19].mxu1 }
 0x10e   :  { %v847_v56 = vsel %vm719_vm15, %v605_v37, %v783_v48  ;;  %v1424_v60 = vpack.c.bf16 %v815_v55, %v814_v31  ;;  %v813_v62 = vsel %vm685_vm0, %v469_v39, %v749_v51  ;;  %v482_v3 = vadd.f32 %v1903_v38, %v481_v44 }
 0x10f   :  { %v1504_v61 = vpack.c.bf16 %v847_v56, %v846_v42  ;;  %vm717_vm1 = vcmp.gt.f32.partialorder %v597_v52, 0.0  ;;  %v1419_v63 = vpack.c.bf16 %v813_v62, %v812_v46  ;;  %v781_v0 = vmul.f32 0.1, %v597_v52 }
 0x110   :  { %vm690_vm2 = vcmp.gt.f32.partialorder %v490_v57, 0.0  ;;  %v754_v1 = vmul.f32 0.1, %v490_v57  ;;  %1552 = vst [vmem:[%s2077_s3 + $0x38] sm:$0xff] %v1424_v60   ;;  %vm722_vm3 = vcmp.gt.f32.partialorder %v618_v58, 0.0  ;;  %v610_v4 = vadd.f32 %v1903_v38, %v609_v45 }
 0x111   :  { %1568 = vst [vmem:[%s2077_s3 + $0xb8] sm:$0xff] %v1504_v61   ;;  %v786_v2 = vmul.f32 0.1, %v618_v58  ;;  %1551 = vst [vmem:[%s2077_s3 + $0x30] sm:$0xff] %v1419_v63   ;;  %v845_v5 = vsel %vm717_vm1, %v597_v52, %v781_v0  ;;  %v493_v7 = vadd.f32 %v1643_v49, %v1903_v38  ;;  %v621_v8 = vadd.f32 %v1675_v53, %v1903_v38  ;;  %v1646_v9 = vpop.f32.mrb[20].mxu0  ;;  %v1678_v10 = vpop.f32.mrb[20].mxu1 }
 0x112   :  { %v818_v6 = vsel %vm690_vm2, %v490_v57, %v754_v1  ;;  %v1499_v11 = vpack.c.bf16 %v845_v5, %v844_v50  ;;  %vm688_vm4 = vcmp.gt.f32.partialorder %v482_v3, 0.0  ;;  %v752_v13 = vmul.f32 0.1, %v482_v3  ;;  %v497_v14 = vpop.f32.mrb[21].mxu0  ;;  %v625_v15 = vpop.f32.mrb[21].mxu1 }
 0x113   :  { %v850_v12 = vsel %vm722_vm3, %v618_v58, %v786_v2  ;;  %vm720_vm5 = vcmp.gt.f32.partialorder %v610_v4, 0.0  ;;  %v784_v16 = vmul.f32 0.1, %v610_v4  ;;  %vm691_vm6 = vcmp.gt.f32.partialorder %v493_v7, 0.0  ;;  %v1647_v21 = vpop.f32.mrb[22].mxu0  ;;  %v1679_v22 = vpop.f32.mrb[22].mxu1 }
 0x114   :  { %v755_v17 = vmul.f32 0.1, %v493_v7  ;;  %1567 = vst [vmem:[%s2077_s3 + $0xb0] sm:$0xff] %v1499_v11   ;;  %v816_v18 = vsel %vm688_vm4, %v482_v3, %v752_v13  ;;  %vm723_vm7 = vcmp.gt.f32.partialorder %v621_v8, 0.0  ;;  %v787_v19 = vmul.f32 0.1, %v621_v8 }
 0x115   :  { %v485_v20 = vadd.f32 %v1903_v38, %v484_v54  ;;  %v848_v23 = vsel %vm720_vm5, %v610_v4, %v784_v16  ;;  %v613_v25 = vadd.f32 %v1903_v38, %v612_v59  ;;  %v506_v26 = vadd.f32 %v1646_v9, %v1903_v38  ;;  %v500_v27 = vpop.f32.mrb[23].mxu0  ;;  %v628_v28 = vpop.f32.mrb[23].mxu1 }
 0x116   :  { %v819_v24 = vsel %vm691_vm6, %v493_v7, %v755_v17  ;;  %v851_v30 = vsel %vm723_vm7, %v621_v8, %v787_v19  ;;  %v634_v36 = vadd.f32 %v1678_v10, %v1903_v38  ;;  %v498_v37 = vadd.f32 %v1903_v38, %v497_v14 }
 0x117   :  { %v1434_v29 = vpack.c.bf16 %v819_v24, %v818_v6  ;;  %vm689_vm8 = vcmp.gt.f32.partialorder %v485_v20, 0.0  ;;  %v753_v31 = vmul.f32 0.1, %v485_v20  ;;  %v1514_v32 = vpack.c.bf16 %v851_v30, %v850_v12 }
 0x118   :  { %vm721_vm9 = vcmp.gt.f32.partialorder %v613_v25, 0.0  ;;  %v785_v33 = vmul.f32 0.1, %v613_v25  ;;  %vm694_vm10 = vcmp.gt.f32.partialorder %v506_v26, 0.0  ;;  %v758_v35 = vmul.f32 0.1, %v506_v26 }
 0x119   :  { %1554 = vst [vmem:[%s2077_s3 + $0x48] sm:$0xff] %v1434_v29   ;;  %v817_v34 = vsel %vm689_vm8, %v485_v20, %v753_v31  ;;  %1570 = vst [vmem:[%s2077_s3 + $0xc8] sm:$0xff] %v1514_v32   ;;  %v626_v41 = vadd.f32 %v1903_v38, %v625_v15  ;;  %v509_v42 = vadd.f32 %v1647_v21, %v1903_v38  ;;  %v1650_v43 = vpop.f32.mrb[24].mxu0  ;;  %v1682_v44 = vpop.f32.mrb[24].mxu1  ;;  %vm726_vm11 = vcmp.gt.f32.partialorder %v634_v36, 0.0 }
 0x11a   :  { %v1429_v39 = vpack.c.bf16 %v817_v34, %v816_v18  ;;  %v849_v40 = vsel %vm721_vm9, %v613_v25, %v785_v33  ;;  %v790_v46 = vmul.f32 0.1, %v634_v36  ;;  %v513_v47 = vpop.f32.mrb[25].mxu0  ;;  %v641_v48 = vpop.f32.mrb[25].mxu1  ;;  %v822_v49 = vsel %vm694_vm10, %v506_v26, %v758_v35 }
 0x11b   :  { %v1509_v45 = vpack.c.bf16 %v849_v40, %v848_v23  ;;  %vm692_vm12 = vcmp.gt.f32.partialorder %v498_v37, 0.0  ;;  %v756_v50 = vmul.f32 0.1, %v498_v37  ;;  %v788_v51 = vmul.f32 0.1, %v626_v41  ;;  %v1651_v54 = vpop.f32.mrb[26].mxu0 }
 0x11c   :  { %1553 = vst [vmem:[%s2077_s3 + $0x40] sm:$0xff] %v1429_v39   ;;  %vm724_vm13 = vcmp.gt.f32.partialorder %v626_v41, 0.0  ;;  %vm695_vm14 = vcmp.gt.f32.partialorder %v509_v42, 0.0  ;;  %v759_v52 = vmul.f32 0.1, %v509_v42  ;;  %v637_v53 = vadd.f32 %v1679_v22, %v1903_v38  ;;  %v1683_v55 = vpop.f32.mrb[26].mxu1 }
 0x11d   :  { %1569 = vst [vmem:[%s2077_s3 + $0xc0] sm:$0xff] %v1509_v45   ;;  %v854_v56 = vsel %vm726_vm11, %v634_v36, %v790_v46  ;;  %v820_v57 = vsel %vm692_vm12, %v498_v37, %v756_v50  ;;  %v501_v58 = vadd.f32 %v1903_v38, %v500_v27  ;;  %v629_v59 = vadd.f32 %v1903_v38, %v628_v28  ;;  %v516_v60 = vpop.f32.mrb[27].mxu0  ;;  %v644_v61 = vpop.f32.mrb[27].mxu1 }
 0x11e   :  { %v823_v62 = vsel %vm695_vm14, %v509_v42, %v759_v52  ;;  %vm727_vm15 = vcmp.gt.f32.partialorder %v637_v53, 0.0  ;;  %v791_v63 = vmul.f32 0.1, %v637_v53  ;;  %v522_v0 = vadd.f32 %v1650_v43, %v1903_v38 }
 0x11f   :  { %v1444_v1 = vpack.c.bf16 %v823_v62, %v822_v49  ;;  %vm693_vm0 = vcmp.gt.f32.partialorder %v501_v58, 0.0  ;;  %v757_v2 = vmul.f32 0.1, %v501_v58  ;;  %vm725_vm1 = vcmp.gt.f32.partialorder %v629_v59, 0.0 }
 0x120   :  { %v855_v3 = vsel %vm727_vm15, %v637_v53, %v791_v63  ;;  %v789_v4 = vmul.f32 0.1, %v629_v59  ;;  %vm698_vm2 = vcmp.gt.f32.partialorder %v522_v0, 0.0  ;;  %v762_v5 = vmul.f32 0.1, %v522_v0 }
 0x121   :  { %1556 = vst [vmem:[%s2077_s3 + $0x58] sm:$0xff] %v1444_v1   ;;  %v1524_v6 = vpack.c.bf16 %v855_v3, %v854_v56  ;;  %v821_v7 = vsel %vm693_vm0, %v501_v58, %v757_v2  ;;  %v650_v8 = vadd.f32 %v1682_v44, %v1903_v38  ;;  %v514_v9 = vadd.f32 %v1903_v38, %v513_v47  ;;  %v1654_v10 = vpop.f32.mrb[28].mxu0  ;;  %v1686_v11 = vpop.f32.mrb[28].mxu1 }
 0x122   :  { %v852_v12 = vsel %vm724_vm13, %v626_v41, %v788_v51  ;;  %v1439_v13 = vpack.c.bf16 %v821_v7, %v820_v57  ;;  %v853_v14 = vsel %vm725_vm1, %v629_v59, %v789_v4  ;;  %v642_v15 = vadd.f32 %v1903_v38, %v641_v48  ;;  %v529_v16 = vpop.f32.mrb[29].mxu0  ;;  %v657_v17 = vpop.f32.mrb[29].mxu1 }
 0x123   :  { %1572 = vst [vmem:[%s2077_s3 + $0xd8] sm:$0xff] %v1524_v6   ;;  %v1519_v18 = vpack.c.bf16 %v853_v14, %v852_v12  ;;  %vm730_vm3 = vcmp.gt.f32.partialorder %v650_v8, 0.0  ;;  %v794_v19 = vmul.f32 0.1, %v650_v8  ;;  %vm696_vm4 = vcmp.gt.f32.partialorder %v514_v9, 0.0  ;;  %v1655_v20 = vpop.f32.mrb[30].mxu0 }
 0x124   :  { %v1687_v21 = vpop.f32.mrb[30].mxu1  ;;  %1555 = vst [vmem:[%s2077_s3 + $0x50] sm:$0xff] %v1439_v13   ;;  %v826_v22 = vsel %vm698_vm2, %v522_v0, %v762_v5  ;;  %v760_v23 = vmul.f32 0.1, %v514_v9  ;;  %vm728_vm5 = vcmp.gt.f32.partialorder %v642_v15, 0.0  ;;  %v525_v24 = vadd.f32 %v1651_v54, %v1903_v38  ;;  %v532_v25 = vpop.f32.mrb[31].mxu0 }
 0x125   :  { %1571 = vst [vmem:[%s2077_s3 + $0xd0] sm:$0xff] %v1519_v18   ;;  %v792_v26 = vmul.f32 0.1, %v642_v15  ;;  %v653_v27 = vadd.f32 %v1683_v55, %v1903_v38  ;;  %v517_v28 = vadd.f32 %v1903_v38, %v516_v60  ;;  %v645_v29 = vadd.f32 %v1903_v38, %v644_v61  ;;  %v660_v30 = vpop.f32.mrb[31].mxu1 }
 0x126   :  { %v858_v31 = vsel %vm730_vm3, %v650_v8, %v794_v19  ;;  %v824_v32 = vsel %vm696_vm4, %v514_v9, %v760_v23  ;;  %vm699_vm6 = vcmp.gt.f32.partialorder %v525_v24, 0.0  ;;  %v763_v33 = vmul.f32 0.1, %v525_v24 }
 0x127   :  { %vm731_vm7 = vcmp.gt.f32.partialorder %v653_v27, 0.0  ;;  %v795_v34 = vmul.f32 0.1, %v653_v27  ;;  %vm697_vm8 = vcmp.gt.f32.partialorder %v517_v28, 0.0  ;;  %v761_v35 = vmul.f32 0.1, %v517_v28 }
 0x128   :  { %v827_v36 = vsel %vm699_vm6, %v525_v24, %v763_v33  ;;  %vm729_vm9 = vcmp.gt.f32.partialorder %v645_v29, 0.0  ;;  %v793_v37 = vmul.f32 0.1, %v645_v29  ;;  %v538_v39 = vadd.f32 %v1654_v10, %v1903_v38 }
 0x129   :  { %v1454_v40 = vpack.c.bf16 %v827_v36, %v826_v22  ;;  %v859_v41 = vsel %vm731_vm7, %v653_v27, %v795_v34  ;;  %v825_v42 = vsel %vm697_vm8, %v517_v28, %v761_v35  ;;  %v666_v43 = vadd.f32 %v1686_v11, %v1903_v38 }
 0x12a   :  { %v856_v44 = vsel %vm728_vm5, %v642_v15, %v792_v26  ;;  %v1534_v45 = vpack.c.bf16 %v859_v41, %v858_v31  ;;  %v1449_v46 = vpack.c.bf16 %v825_v42, %v824_v32  ;;  %v857_v47 = vsel %vm729_vm9, %v645_v29, %v793_v37 }
 0x12b   :  { %1558 = vst [vmem:[%s2077_s3 + $0x68] sm:$0xff] %v1454_v40   ;;  %v1529_v48 = vpack.c.bf16 %v857_v47, %v856_v44  ;;  %vm702_vm10 = vcmp.gt.f32.partialorder %v538_v39, 0.0  ;;  %v766_v49 = vmul.f32 0.1, %v538_v39  ;;  %v798_v50 = vmul.f32 0.1, %v666_v43 }
 0x12c   :  { %1574 = vst [vmem:[%s2077_s3 + $0xe8] sm:$0xff] %v1534_v45   ;;  %1557 = vst [vmem:[%s2077_s3 + $0x60] sm:$0xff] %v1449_v46   ;;  %v530_v51 = vadd.f32 %v1903_v38, %v529_v16  ;;  %v658_v52 = vadd.f32 %v1903_v38, %v657_v17  ;;  %v541_v53 = vadd.f32 %v1655_v20, %v1903_v38  ;;  %vm734_vm11 = vcmp.gt.f32.partialorder %v666_v43, 0.0 }
 0x12d   :  { %v669_v54 = vadd.f32 %v1687_v21, %v1903_v38  ;;  %1573 = vst [vmem:[%s2077_s3 + $0xe0] sm:$0xff] %v1529_v48   ;;  %v533_v55 = vadd.f32 %v1903_v38, %v532_v25  ;;  %v661_v56 = vadd.f32 %v1903_v38, %v660_v30  ;;  %v830_v57 = vsel %vm702_vm10, %v538_v39, %v766_v49 }
 0x12e   :  { %vm700_vm12 = vcmp.gt.f32.partialorder %v530_v51, 0.0  ;;  %v764_v58 = vmul.f32 0.1, %v530_v51  ;;  %v796_v59 = vmul.f32 0.1, %v658_v52  ;;  %vm703_vm13 = vcmp.gt.f32.partialorder %v541_v53, 0.0 }
 0x12f   :  { %v767_v60 = vmul.f32 0.1, %v541_v53  ;;  %vm735_vm14 = vcmp.gt.f32.partialorder %v669_v54, 0.0  ;;  %v799_v61 = vmul.f32 0.1, %v669_v54  ;;  %v862_v62 = vsel %vm734_vm11, %v666_v43, %v798_v50 }
 0x130   :  { %vm732_vm15 = vcmp.gt.f32.partialorder %v658_v52, 0.0  ;;  %vm701_vm0 = vcmp.gt.f32.partialorder %v533_v55, 0.0  ;;  %v765_v63 = vmul.f32 0.1, %v533_v55  ;;  %vm733_vm1 = vcmp.gt.f32.partialorder %v661_v56, 0.0 }
 0x131   :  { %v831_v0 = vsel %vm703_vm13, %v541_v53, %v767_v60  ;;  %v863_v1 = vsel %vm735_vm14, %v669_v54, %v799_v61  ;;  %v797_v2 = vmul.f32 0.1, %v661_v56  ;;  %v828_v3 = vsel %vm700_vm12, %v530_v51, %v764_v58 }
 0x132   :  { %v1464_v4 = vpack.c.bf16 %v831_v0, %v830_v57  ;;  %v1544_v5 = vpack.c.bf16 %v863_v1, %v862_v62  ;;  %v829_v38 = vsel %vm701_vm0, %v533_v55, %v765_v63  ;;  %v860_v6 = vsel %vm732_vm15, %v658_v52, %v796_v59 }
 0x133   :  { %v1459_v7 = vpack.c.bf16 %v829_v38, %v828_v3  ;;  %v861_v8 = vsel %vm733_vm1, %v661_v56, %v797_v2 }
 0x134   :  { %1560 = vst [vmem:[%s2077_s3 + $0x78] sm:$0xff] %v1464_v4   ;;  %1576 = vst [vmem:[%s2077_s3 + $0xf8] sm:$0xff] %v1544_v5   ;;  %v1539_v9 = vpack.c.bf16 %v861_v8, %v860_v6 }
 0x135   :  { %1559 = vst [vmem:[%s2077_s3 + $0x70] sm:$0xff] %v1459_v7  }
 0x136   :  { %1575 = vst [vmem:[%s2077_s3 + $0xf0] sm:$0xff] %v1539_v9  }

// kernel: _lambda_.12
= control target key start
LH: loop header
LB: loop body
LE: loop exit
PB: predicated region body
PF: predicated region fallthrough
CT: control target
= control target key end

     0   :  { %vm257_vm0 = vcmask 130048   ;;  %s2795_s1 = inlined_call_operand.vmem [shape: bf16[16,128], index: 1, kind: input, shape index: {}]   ;;  %s2796_s0 = inlined_call_operand.vmem [shape: bf16[512,16], index: 0, kind: input, shape index: {}, may-alias: {0,3}]   ;;  %s2797_s3 = inlined_call_operand.vmem [shape: bf16[512,128], index: 3, kind: input, shape index: {}, may-alias: {0,3}]   ;;  %s2798_s2 = inlined_call_operand.vmem [shape: f32[1,128], index: 2, kind: input, shape index: {}]   ;;  %s2799_s4 = inlined_call_operand.vmem [shape: bf16[512,128], index: 4, kind: output, shape index: {}]  }
   0x1   :  { %v1996_v0 = vld [vmem:[%s2795_s1] sm:$0xff]   ;;  %v1999_v3 = vld [vmem:[%s2796_s0 + $0x8] sm:$0xff]   ;;  %v2001_v5 = vld [vmem:[%s2796_s0 + $0x10] sm:$0xff]  }
   0x2   :  { %v1997_v1 = vld [vmem:[%s2796_s0] sm:$0xff]   ;;  %1928 = vmatprep.subr.bf16.mxu0 %v1996_v0  ;;  %1994 = vmatprep.subr.bf16.mxu1 %v1996_v0  ;;  %v2000_v4 = vld [vmem:[%s2796_s0 + $0x88] sm:$0xff]   ;;  %v2002_v6 = vld [vmem:[%s2796_s0 + $0x90] sm:$0xff]  }
   0x3   :  { %v1998_v2 = vld [vmem:[%s2796_s0 + $0x80] sm:$0xff]   ;;  %1929 = vmatpush3.bf16.msra.mxu0 %v1996_v0  ;;  %1995 = vmatpush3.bf16.msra.mxu1 %v1996_v0  ;;  %v2003_v7 = vld [vmem:[%s2796_s0 + $0x18] sm:$0xff]   ;;  %v2007_v11 = vld [vmem:[%s2796_s0 + $0x28] sm:$0xff]  }
   0x4   :  { %1930 = vmatprep.mubr.msk.bf16.mxu0 %vm257_vm0, %v1997_v1  ;;  %1962 = vmatprep.mubr.msk.bf16.mxu1 %vm257_vm0, %v1998_v2  ;;  %v2004_v8 = vld [vmem:[%s2796_s0 + $0x98] sm:$0xff]   ;;  %v2005_v9 = vld [vmem:[%s2796_s0 + $0x20] sm:$0xff]   ;;  %v2008_v12 = vld [vmem:[%s2796_s0 + $0xa8] sm:$0xff]  }
   0x5   :  { %v2006_v10 = vld [vmem:[%s2796_s0 + $0xa0] sm:$0xff]   ;;  %v2009_v13 = vld [vmem:[%s2796_s0 + $0x30] sm:$0xff]   ;;  %v2011_v15 = vld [vmem:[%s2796_s0 + $0x38] sm:$0xff]  }
   0x6   :  { %1931 = vmatmul.mubr.msk.bf16.vlgmr.msra.gmra.mrb[0].mxu0 %vm257_vm0, %v1999_v3  ;;  %1963 = vmatmul.mubr.msk.bf16.vlgmr.msra.gmra.mrb[0].mxu1 %vm257_vm0, %v2000_v4  ;;  %v2010_v14 = vld [vmem:[%s2796_s0 + $0xb0] sm:$0xff]   ;;  %v2012_v16 = vld [vmem:[%s2796_s0 + $0xb8] sm:$0xff]   ;;  %v2013_v17 = vld [vmem:[%s2796_s0 + $0x40] sm:$0xff]  }
   0x7   :  { %1934 = vmatprep.mubr.msk.bf16.mxu0 %vm257_vm0, %v2001_v5  ;;  %1966 = vmatprep.mubr.msk.bf16.mxu1 %vm257_vm0, %v2002_v6  ;;  %v2014_v18 = vld [vmem:[%s2796_s0 + $0xc0] sm:$0xff]   ;;  %v2015_v19 = vld [vmem:[%s2796_s0 + $0x48] sm:$0xff]   ;;  %v2017_v21 = vld [vmem:[%s2796_s0 + $0x50] sm:$0xff]  }
   0x8   :  { %v2016_v20 = vld [vmem:[%s2796_s0 + $0xc8] sm:$0xff]   ;;  %v2018_v22 = vld [vmem:[%s2796_s0 + $0xd0] sm:$0xff]   ;;  %v2019_v23 = vld [vmem:[%s2796_s0 + $0x58] sm:$0xff]  }
   0x9   :  { %v2020_v24 = vld [vmem:[%s2796_s0 + $0xd8] sm:$0xff]   ;;  %v2021_v25 = vld [vmem:[%s2796_s0 + $0x60] sm:$0xff]   ;;  %v2023_v27 = vld [vmem:[%s2796_s0 + $0x68] sm:$0xff]  }
   0xa   :  { %v2022_v26 = vld [vmem:[%s2796_s0 + $0xe0] sm:$0xff]   ;;  %v2024_v28 = vld [vmem:[%s2796_s0 + $0xe8] sm:$0xff]   ;;  %v2025_v29 = vld [vmem:[%s2796_s0 + $0x70] sm:$0xff]  }
   0xb   :  { %v2026_v30 = vld [vmem:[%s2796_s0 + $0xf0] sm:$0xff]   ;;  %v2027_v31 = vld [vmem:[%s2796_s0 + $0x78] sm:$0xff]   ;;  %v2188_v33 = vld [vmem:[%s2797_s3 + $0x8] sm:$0xff]  }
   0xc   :  { %v2028_v32 = vld [vmem:[%s2796_s0 + $0xf8] sm:$0xff]   ;;  %v2193_v34 = vld [vmem:[%s2797_s3 + $0x88] sm:$0xff]   ;;  %v2198_v35 = vld [vmem:[%s2797_s3] sm:$0xff]   ;;  %v1551_v39 = vunpack.c.l.bf16 %v2188_v33  ;;  %v1552_v45 = vunpack.c.h.bf16 %v2188_v33 }
   0xd   :  { %v2203_v36 = vld [vmem:[%s2797_s3 + $0x80] sm:$0xff]   ;;  %v2208_v37 = vld [vmem:[%s2797_s3 + $0x18] sm:$0xff]   ;;  %v1615_v40 = vunpack.c.l.bf16 %v2193_v34  ;;  %v2220_v41 = vld [vmem:[%s2797_s3 + $0x10] sm:$0xff]   ;;  %v1547_v43 = vunpack.c.l.bf16 %v2198_v35  ;;  %v1616_v46 = vunpack.c.h.bf16 %v2193_v34  ;;  %v1548_v49 = vunpack.c.h.bf16 %v2198_v35 }
   0xe   :  { %1935 = vmatmul.mubr.msk.bf16.gmra.mrb[4].mxu0 %vm257_vm0, %v2003_v7  ;;  %1967 = vmatmul.mubr.msk.bf16.gmra.mrb[4].mxu1 %vm257_vm0, %v2004_v8  ;;  %v2213_v38 = vld [vmem:[%s2797_s3 + $0x98] sm:$0xff]   ;;  %v2225_v42 = vld [vmem:[%s2797_s3 + $0x90] sm:$0xff]   ;;  %v1611_v44 = vunpack.c.l.bf16 %v2203_v36  ;;  %v2234_v47 = vld [vmem:[%s2797_s3 + $0x28] sm:$0xff]   ;;  %v1612_v50 = vunpack.c.h.bf16 %v2203_v36  ;;  %v1559_v51 = vunpack.c.l.bf16 %v2208_v37 }
   0xf   :  { %1938 = vmatprep.mubr.msk.bf16.mxu0 %vm257_vm0, %v2005_v9  ;;  %1970 = vmatprep.mubr.msk.bf16.mxu1 %vm257_vm0, %v2006_v10  ;;  %v2239_v48 = vld [vmem:[%s2797_s3 + $0xa8] sm:$0xff]   ;;  %v1623_v52 = vunpack.c.l.bf16 %v2213_v38  ;;  %v2248_v53 = vld [vmem:[%s2797_s3 + $0x20] sm:$0xff]   ;;  %v2262_v59 = vld [vmem:[%s2797_s3 + $0x38] sm:$0xff]  }
  0x10   :  { %v2253_v54 = vld [vmem:[%s2797_s3 + $0xa0] sm:$0xff]   ;;  %v2267_v60 = vld [vmem:[%s2797_s3 + $0xb8] sm:$0xff]   ;;  %v2276_v1 = vld [vmem:[%s2797_s3 + $0x30] sm:$0xff]  }
  0x11   :  { %v2281_v2 = vld [vmem:[%s2797_s3 + $0xb0] sm:$0xff]   ;;  %v2290_v7 = vld [vmem:[%s2797_s3 + $0x48] sm:$0xff]  }
  0x12   :  { %v2295_v8 = vld [vmem:[%s2797_s3 + $0xc8] sm:$0xff]  }
  0x16   :  { %1939 = vmatmul.mubr.msk.bf16.gmra.mrb[8].mxu0 %vm257_vm0, %v2007_v11  ;;  %1971 = vmatmul.mubr.msk.bf16.gmra.mrb[8].mxu1 %vm257_vm0, %v2008_v12 }
  0x17   :  { %1942 = vmatprep.mubr.msk.bf16.mxu0 %vm257_vm0, %v2009_v13  ;;  %1974 = vmatprep.mubr.msk.bf16.mxu1 %vm257_vm0, %v2010_v14  ;;  %v2304_v13 = vld [vmem:[%s2797_s3 + $0x40] sm:$0xff]  }
  0x18   :  { %v2309_v14 = vld [vmem:[%s2797_s3 + $0xc0] sm:$0xff]  }
  0x1e   :  { %1943 = vmatmul.mubr.msk.bf16.gmra.mrb[12].mxu0 %vm257_vm0, %v2011_v15  ;;  %1975 = vmatmul.mubr.msk.bf16.gmra.mrb[12].mxu1 %vm257_vm0, %v2012_v16  ;;  %v2383_v15 = vld [vmem:[%s2797_s3 + $0x78] sm:$0xff]  }
  0x1f   :  { %1946 = vmatprep.mubr.msk.bf16.mxu0 %vm257_vm0, %v2013_v17  ;;  %1978 = vmatprep.mubr.msk.bf16.mxu1 %vm257_vm0, %v2014_v18 }
  0x26   :  { %1947 = vmatmul.mubr.msk.bf16.gmra.mrb[16].mxu0 %vm257_vm0, %v2015_v19  ;;  %1979 = vmatmul.mubr.msk.bf16.gmra.mrb[16].mxu1 %vm257_vm0, %v2016_v20  ;;  %v2318_v19 = vld [vmem:[%s2797_s3 + $0x58] sm:$0xff]  }
  0x27   :  { %1950 = vmatprep.mubr.msk.bf16.mxu0 %vm257_vm0, %v2017_v21  ;;  %1982 = vmatprep.mubr.msk.bf16.mxu1 %vm257_vm0, %v2018_v22  ;;  %v2323_v20 = vld [vmem:[%s2797_s3 + $0xd8] sm:$0xff]  }
  0x2e   :  { %1951 = vmatmul.mubr.msk.bf16.gmra.mrb[20].mxu0 %vm257_vm0, %v2019_v23  ;;  %1983 = vmatmul.mubr.msk.bf16.gmra.mrb[20].mxu1 %vm257_vm0, %v2020_v24  ;;  %v2365_v23 = vld [vmem:[%s2797_s3 + $0xe0] sm:$0xff]  }
  0x2f   :  { %1954 = vmatprep.mubr.msk.bf16.mxu0 %vm257_vm0, %v2021_v25  ;;  %1986 = vmatprep.mubr.msk.bf16.mxu1 %vm257_vm0, %v2022_v26  ;;  %v2332_v25 = vld [vmem:[%s2797_s3 + $0x50] sm:$0xff]   ;;  %v2370_v24 = vld [vmem:[%s2798_s2] ss:$0 sm:$0xff] }
  0x30   :  { %v2337_v26 = vld [vmem:[%s2797_s3 + $0xd0] sm:$0xff]  }
  0x36   :  { %1955 = vmatmul.mubr.msk.bf16.gmra.mrb[24].mxu0 %vm257_vm0, %v2023_v27  ;;  %1987 = vmatmul.mubr.msk.bf16.gmra.mrb[24].mxu1 %vm257_vm0, %v2024_v28  ;;  %v2388_v28 = vld [vmem:[%s2797_s3 + $0xf8] sm:$0xff]  }
  0x37   :  { %1958 = vmatprep.mubr.msk.bf16.mxu0 %vm257_vm0, %v2025_v29  ;;  %1990 = vmatprep.mubr.msk.bf16.mxu1 %vm257_vm0, %v2026_v30  ;;  %v2360_v30 = vld [vmem:[%s2797_s3 + $0x60] sm:$0xff]  }
  0x3e   :  { %1959 = vmatmul.mubr.msk.bf16.gmra.mrb[28].mxu0 %vm257_vm0, %v2027_v31  ;;  %1991 = vmatmul.mubr.msk.bf16.gmra.mrb[28].mxu1 %vm257_vm0, %v2028_v32  ;;  %v2346_v31 = vld [vmem:[%s2797_s3 + $0x68] sm:$0xff]  }
  0x3f   :  { %v2351_v32 = vld [vmem:[%s2797_s3 + $0xe8] sm:$0xff]  }
  0xd9   :  { %v1932_v29 = vpop.f32.mrb[0].mxu0  ;;  %v1964_v22 = vpop.f32.mrb[0].mxu1 }
  0xda   :  { %v397_v27 = vadd.f32 %v1932_v29, %v2370_v24  ;;  %v525_v12 = vadd.f32 %v1964_v22, %v2370_v24  ;;  %v388_v11 = vpop.f32.mrb[1].mxu0  ;;  %v516_v10 = vpop.f32.mrb[1].mxu1  ;;  %v2405_v22 = vld [vmem:[%s2797_s3 + $0x70] sm:$0xff]  }
  0xdb   :  { %v389_v5 = vadd.f32 %v2370_v24, %v388_v11  ;;  %v517_v21 = vadd.f32 %v2370_v24, %v516_v10  ;;  %v1933_v4 = vpop.f32.mrb[2].mxu0  ;;  %v1965_v18 = vpop.f32.mrb[2].mxu1 }
  0xdc   :  { %vm645_vm1 = vcmp.gt.f32.partialorder %v397_v27, 0.0  ;;  %v709_v29 = vmul.f32 0.1, %v397_v27  ;;  %vm677_vm2 = vcmp.gt.f32.partialorder %v525_v12, 0.0  ;;  %v741_v9 = vmul.f32 0.1, %v525_v12 }
  0xdd   :  { %vm643_vm3 = vcmp.gt.f32.partialorder %v389_v5, 0.0  ;;  %v707_v6 = vmul.f32 0.1, %v389_v5  ;;  %vm675_vm4 = vcmp.gt.f32.partialorder %v517_v21, 0.0  ;;  %v739_v11 = vmul.f32 0.1, %v517_v21 }
  0xde   :  { %v773_v10 = vsel %vm645_vm1, %v397_v27, %v709_v29  ;;  %v805_v3 = vsel %vm677_vm2, %v525_v12, %v741_v9  ;;  %v400_v0 = vadd.f32 %v1933_v4, %v2370_v24  ;;  %v528_v17 = vadd.f32 %v1965_v18, %v2370_v24  ;;  %v391_v16 = vpop.f32.mrb[3].mxu0  ;;  %v519_v63 = vpop.f32.mrb[3].mxu1 }
  0xdf   :  { %v965_v62 = vadd.f32 %v1551_v39, %v773_v10  ;;  %v771_v61 = vsel %vm643_vm3, %v389_v5, %v707_v6  ;;  %v803_v58 = vsel %vm675_vm4, %v517_v21, %v739_v11  ;;  %v997_v56 = vadd.f32 %v1615_v40, %v805_v3 }
  0xe0   :  { %v963_v27 = vadd.f32 %v1547_v43, %v771_v61  ;;  %vm646_vm5 = vcmp.gt.f32.partialorder %v400_v0, 0.0  ;;  %v710_v9 = vmul.f32 0.1, %v400_v0  ;;  %vm678_vm6 = vcmp.gt.f32.partialorder %v528_v17, 0.0 }
  0xe1   :  { %v742_v4 = vmul.f32 0.1, %v528_v17  ;;  %v392_v12 = vadd.f32 %v2370_v24, %v391_v16  ;;  %v520_v18 = vadd.f32 %v2370_v24, %v519_v63  ;;  %v1936_v29 = vpop.f32.mrb[4].mxu0  ;;  %v1968_v39 = vpop.f32.mrb[4].mxu1  ;;  %v995_v5 = vadd.f32 %v1611_v44, %v803_v58 }
  0xe2   :  { %v774_v6 = vsel %vm646_vm5, %v400_v0, %v710_v9  ;;  %v413_v21 = vadd.f32 %v1936_v29, %v2370_v24  ;;  %v541_v40 = vadd.f32 %v1968_v39, %v2370_v24  ;;  %v404_v3 = vpop.f32.mrb[5].mxu0  ;;  %v532_v43 = vpop.f32.mrb[5].mxu1 }
  0xe3   :  { %v966_v61 = vadd.f32 %v1552_v45, %v774_v6  ;;  %v806_v11 = vsel %vm678_vm6, %v528_v17, %v742_v4  ;;  %vm644_vm7 = vcmp.gt.f32.partialorder %v392_v12, 0.0  ;;  %v708_v16 = vmul.f32 0.1, %v392_v12  ;;  %v1937_v10 = vpop.f32.mrb[6].mxu0  ;;  %v1969_v63 = vpop.f32.mrb[6].mxu1 }
  0xe4   :  { %v998_v57 = vadd.f32 %v1616_v46, %v806_v11  ;;  %vm676_vm8 = vcmp.gt.f32.partialorder %v520_v18, 0.0  ;;  %v740_v44 = vmul.f32 0.1, %v520_v18  ;;  %vm649_vm9 = vcmp.gt.f32.partialorder %v413_v21, 0.0  ;;  %v407_v58 = vpop.f32.mrb[7].mxu0  ;;  %v535_v0 = vpop.f32.mrb[7].mxu1 }
  0xe5   :  { %v1681_v9 = vpack.c.bf16 %v966_v61, %v965_v62  ;;  %v772_v29 = vsel %vm644_vm7, %v392_v12, %v708_v16  ;;  %v713_v39 = vmul.f32 0.1, %v413_v21  ;;  %vm681_vm10 = vcmp.gt.f32.partialorder %v541_v40, 0.0 }
  0xe6   :  { %v1761_v55 = vpack.c.bf16 %v998_v57, %v997_v56  ;;  %v964_v33 = vadd.f32 %v1548_v49, %v772_v29  ;;  %v804_v45 = vsel %vm676_vm8, %v520_v18, %v740_v44  ;;  %v745_v17 = vmul.f32 0.1, %v541_v40 }
  0xe7   :  { %1864 = vst [vmem:[%s2799_s4 + $0x8] sm:$0xff] %v1681_v9   ;;  %v996_v34 = vadd.f32 %v1612_v50, %v804_v45  ;;  %v777_v46 = vsel %vm649_vm9, %v413_v21, %v713_v39  ;;  %v405_v4 = vadd.f32 %v2370_v24, %v404_v3  ;;  %v533_v62 = vadd.f32 %v2370_v24, %v532_v43 }
  0xe8   :  { %1880 = vst [vmem:[%s2799_s4 + $0x88] sm:$0xff] %v1761_v55   ;;  %v1676_v35 = vpack.c.bf16 %v964_v33, %v963_v27  ;;  %v969_v49 = vadd.f32 %v1559_v51, %v777_v46  ;;  %v809_v56 = vsel %vm681_vm10, %v541_v40, %v745_v17  ;;  %v416_v57 = vadd.f32 %v1937_v10, %v2370_v24 }
  0xe9   :  { %v1756_v12 = vpack.c.bf16 %v996_v34, %v995_v5  ;;  %v1001_v36 = vadd.f32 %v1623_v52, %v809_v56  ;;  %vm647_vm11 = vcmp.gt.f32.partialorder %v405_v4, 0.0  ;;  %v711_v50 = vmul.f32 0.1, %v405_v4  ;;  %v1940_v18 = vpop.f32.mrb[8].mxu0  ;;  %v1972_v6 = vpop.f32.mrb[8].mxu1 }
  0xea   :  { %1677 = vst [vmem:[%s2799_s4] sm:$0xff] %v1676_v35   ;;  %vm679_vm12 = vcmp.gt.f32.partialorder %v533_v62, 0.0  ;;  %v743_v55 = vmul.f32 0.1, %v533_v62  ;;  %vm650_vm13 = vcmp.gt.f32.partialorder %v416_v57, 0.0  ;;  %v714_v27 = vmul.f32 0.1, %v416_v57 }
  0xeb   :  { %1879 = vst [vmem:[%s2799_s4 + $0x80] sm:$0xff] %v1756_v12   ;;  %v775_v51 = vsel %vm647_vm11, %v405_v4, %v711_v50  ;;  %v544_v5 = vadd.f32 %v1969_v63, %v2370_v24  ;;  %v408_v52 = vadd.f32 %v2370_v24, %v407_v58  ;;  %v536_v21 = vadd.f32 %v2370_v24, %v535_v0  ;;  %v420_v40 = vpop.f32.mrb[9].mxu0  ;;  %v548_v3 = vpop.f32.mrb[9].mxu1 }
  0xec   :  { %v2800_v43 = vunpack.c.l.bf16 %v2220_v41  ;;  %v807_v11 = vsel %vm679_vm12, %v533_v62, %v743_v55  ;;  %v778_v16 = vsel %vm650_vm13, %v416_v57, %v714_v27  ;;  %v429_v10 = vadd.f32 %v1940_v18, %v2370_v24  ;;  %v1941_v44 = vpop.f32.mrb[10].mxu0  ;;  %v1973_v9 = vpop.f32.mrb[10].mxu1 }
  0xed   :  { %v2801_v29 = vunpack.c.l.bf16 %v2225_v42  ;;  %v2802_v63 = vunpack.c.h.bf16 %v2208_v37  ;;  %vm682_vm14 = vcmp.gt.f32.partialorder %v544_v5, 0.0  ;;  %v746_v58 = vmul.f32 0.1, %v544_v5  ;;  %v423_v0 = vpop.f32.mrb[11].mxu0  ;;  %v551_v45 = vpop.f32.mrb[11].mxu1 }
  0xee   :  { %v967_v61 = vadd.f32 %v2800_v43, %v775_v51  ;;  %vm648_vm15 = vcmp.gt.f32.partialorder %v408_v52, 0.0  ;;  %v712_v17 = vmul.f32 0.1, %v408_v52  ;;  %vm680_vm0 = vcmp.gt.f32.partialorder %v536_v21, 0.0 }
  0xef   :  { %v999_v39 = vadd.f32 %v2801_v29, %v807_v11  ;;  %v970_v33 = vadd.f32 %v2802_v63, %v778_v16  ;;  %v744_v34 = vmul.f32 0.1, %v536_v21  ;;  %v810_v4 = vsel %vm682_vm14, %v544_v5, %v746_v58 }
  0xf0   :  { %vm653_vm1 = vcmp.gt.f32.partialorder %v429_v10, 0.0  ;;  %v717_v62 = vmul.f32 0.1, %v429_v10  ;;  %v2803_v35 = vunpack.c.h.bf16 %v2213_v38  ;;  %v776_v57 = vsel %vm648_vm15, %v408_v52, %v712_v17 }
  0xf1   :  { %v1691_v46 = vpack.c.bf16 %v970_v33, %v969_v49  ;;  %v808_v12 = vsel %vm680_vm0, %v536_v21, %v744_v34  ;;  %v557_v37 = vadd.f32 %v1972_v6, %v2370_v24  ;;  %v2804_v50 = vunpack.c.h.bf16 %v2220_v41  ;;  %v1944_v5 = vpop.f32.mrb[12].mxu0  ;;  %v1976_v38 = vpop.f32.mrb[12].mxu1 }
  0xf2   :  { %v1002_v56 = vadd.f32 %v2803_v35, %v810_v4  ;;  %v2805_v55 = vunpack.c.h.bf16 %v2225_v42  ;;  %v781_v27 = vsel %vm653_vm1, %v429_v10, %v717_v62  ;;  %v421_v51 = vadd.f32 %v2370_v24, %v420_v40  ;;  %v436_v11 = vpop.f32.mrb[13].mxu0  ;;  %v564_v16 = vpop.f32.mrb[13].mxu1 }
  0xf3   :  { %1866 = vst [vmem:[%s2799_s4 + $0x18] sm:$0xff] %v1691_v46   ;;  %v968_v18 = vadd.f32 %v2804_v50, %v776_v57  ;;  %v2806_v52 = vunpack.c.l.bf16 %v2234_v47  ;;  %vm685_vm2 = vcmp.gt.f32.partialorder %v557_v37, 0.0  ;;  %v749_v6 = vmul.f32 0.1, %v557_v37  ;;  %v2474_v42 = vpop.f32.mrb[14].mxu0  ;;  %v2476_v10 = vpop.f32.mrb[14].mxu1 }
  0xf4   :  { %v1000_v49 = vadd.f32 %v2805_v55, %v808_v12  ;;  %v1771_v43 = vpack.c.bf16 %v1002_v56, %v1001_v36  ;;  %vm651_vm3 = vcmp.gt.f32.partialorder %v421_v51, 0.0  ;;  %v715_v63 = vmul.f32 0.1, %v421_v51  ;;  %v439_v17 = vpop.f32.mrb[15].mxu0 }
  0xf5   :  { %v2472_v21 = vadd.f32 %v2806_v52, %v781_v27  ;;  %v1686_v29 = vpack.c.bf16 %v968_v18, %v967_v61  ;;  %v813_v36 = vsel %vm685_vm2, %v557_v37, %v749_v6  ;;  %v549_v40 = vadd.f32 %v2370_v24, %v548_v3  ;;  %v567_v61 = vpop.f32.mrb[15].mxu1 }
  0xf6   :  { %v1766_v41 = vpack.c.bf16 %v1000_v49, %v999_v39  ;;  %1882 = vst [vmem:[%s2799_s4 + $0x98] sm:$0xff] %v1771_v43   ;;  %v432_v33 = vadd.f32 %v1941_v44, %v2370_v24  ;;  %v560_v58 = vadd.f32 %v1973_v9, %v2370_v24  ;;  %v2807_v39 = vunpack.c.l.bf16 %v2239_v48 }
  0xf7   :  { %1865 = vst [vmem:[%s2799_s4 + $0x10] sm:$0xff] %v1686_v29   ;;  %v779_v46 = vsel %vm651_vm3, %v421_v51, %v715_v63  ;;  %v424_v3 = vadd.f32 %v2370_v24, %v423_v0  ;;  %v552_v44 = vadd.f32 %v2370_v24, %v551_v45  ;;  %v2808_v9 = vunpack.c.l.bf16 %v2248_v53 }
  0xf8   :  { %1881 = vst [vmem:[%s2799_s4 + $0x90] sm:$0xff] %v1766_v41   ;;  %v1005_v34 = vadd.f32 %v2807_v39, %v813_v36  ;;  %vm683_vm4 = vcmp.gt.f32.partialorder %v549_v40, 0.0  ;;  %v747_v62 = vmul.f32 0.1, %v549_v40  ;;  %vm654_vm5 = vcmp.gt.f32.partialorder %v432_v33, 0.0 }
  0xf9   :  { %v971_v4 = vadd.f32 %v2808_v9, %v779_v46  ;;  %v718_v35 = vmul.f32 0.1, %v432_v33  ;;  %vm686_vm6 = vcmp.gt.f32.partialorder %v560_v58, 0.0  ;;  %v750_v56 = vmul.f32 0.1, %v560_v58  ;;  %v1948_v49 = vpop.f32.mrb[16].mxu0 }
  0xfa   :  { %vm652_vm7 = vcmp.gt.f32.partialorder %v424_v3, 0.0  ;;  %v811_v57 = vsel %vm683_vm4, %v549_v40, %v747_v62  ;;  %v716_v12 = vmul.f32 0.1, %v424_v3  ;;  %vm684_vm8 = vcmp.gt.f32.partialorder %v552_v44, 0.0  ;;  %v1980_v27 = vpop.f32.mrb[16].mxu1  ;;  %v452_v63 = vpop.f32.mrb[17].mxu0 }
  0xfb   :  { %v748_v37 = vmul.f32 0.1, %v552_v44  ;;  %v2809_v50 = vunpack.c.l.bf16 %v2253_v54  ;;  %v782_v0 = vsel %vm654_vm5, %v432_v33, %v718_v35  ;;  %v814_v55 = vsel %vm686_vm6, %v560_v58, %v750_v56  ;;  %v2503_v36 = vpop.f32.mrb[17].mxu1  ;;  %v2509_v46 = vpop.f32.mrb[18].mxu0 }
  0xfc   :  { %v445_v45 = vadd.f32 %v1944_v5, %v2370_v24  ;;  %v2810_v51 = vunpack.c.h.bf16 %v2234_v47  ;;  %v2811_v52 = vunpack.c.h.bf16 %v2239_v48  ;;  %v780_v29 = vsel %vm652_vm7, %v424_v3, %v716_v12  ;;  %v2511_v47 = vpop.f32.mrb[18].mxu1  ;;  %v2516_v62 = vpop.f32.mrb[19].mxu0 }
  0xfd   :  { %v1003_v18 = vadd.f32 %v2809_v50, %v811_v57  ;;  %v812_v41 = vsel %vm684_vm8, %v552_v44, %v748_v37  ;;  %v2812_v40 = vunpack.c.h.bf16 %v2248_v53  ;;  %v2813_v33 = vunpack.c.h.bf16 %v2253_v54  ;;  %v2518_v53 = vpop.f32.mrb[19].mxu1 }
  0xfe   :  { %v974_v43 = vadd.f32 %v2810_v51, %v782_v0  ;;  %v1006_v6 = vadd.f32 %v2811_v52, %v814_v55  ;;  %vm657_vm9 = vcmp.gt.f32.partialorder %v445_v45, 0.0  ;;  %v721_v5 = vmul.f32 0.1, %v445_v45 }
  0xff   :  { %v972_v39 = vadd.f32 %v2812_v40, %v780_v29  ;;  %v1004_v58 = vadd.f32 %v2813_v33, %v812_v41  ;;  %v573_v3 = vadd.f32 %v1976_v38, %v2370_v24  ;;  %v437_v44 = vadd.f32 %v2370_v24, %v436_v11 }
 0x100   :  { %v1701_v48 = vpack.c.bf16 %v974_v43, %v2472_v21  ;;  %v1781_v9 = vpack.c.bf16 %v1006_v6, %v1005_v34  ;;  %v785_v56 = vsel %vm657_vm9, %v445_v45, %v721_v5  ;;  %v565_v57 = vadd.f32 %v2370_v24, %v564_v16 }
 0x101   :  { %v1696_v35 = vpack.c.bf16 %v972_v39, %v971_v4  ;;  %v1776_v54 = vpack.c.bf16 %v1004_v58, %v1003_v18  ;;  %v2814_v38 = vunpack.c.l.bf16 %v2262_v59  ;;  %vm689_vm10 = vcmp.gt.f32.partialorder %v573_v3, 0.0  ;;  %v2543_v43 = vpop.f32.mrb[20].mxu0  ;;  %v2545_v52 = vpop.f32.mrb[20].mxu1 }
 0x102   :  { %1868 = vst [vmem:[%s2799_s4 + $0x28] sm:$0xff] %v1701_v48   ;;  %1884 = vst [vmem:[%s2799_s4 + $0xa8] sm:$0xff] %v1781_v9   ;;  %v753_v11 = vmul.f32 0.1, %v573_v3  ;;  %vm655_vm11 = vcmp.gt.f32.partialorder %v437_v44, 0.0  ;;  %vm687_vm12 = vcmp.gt.f32.partialorder %v565_v57, 0.0  ;;  %v448_v4 = vadd.f32 %v2474_v42, %v2370_v24 }
 0x103   :  { %v977_v21 = vadd.f32 %v2814_v38, %v785_v56  ;;  %1867 = vst [vmem:[%s2799_s4 + $0x20] sm:$0xff] %v1696_v35   ;;  %1883 = vst [vmem:[%s2799_s4 + $0xa0] sm:$0xff] %v1776_v54   ;;  %v719_v16 = vmul.f32 0.1, %v437_v44  ;;  %v751_v34 = vmul.f32 0.1, %v565_v57  ;;  %v576_v37 = vadd.f32 %v2476_v10, %v2370_v24 }
 0x104   :  { %v817_v12 = vsel %vm689_vm10, %v573_v3, %v753_v11  ;;  %v440_v50 = vadd.f32 %v2370_v24, %v439_v17  ;;  %v568_v18 = vadd.f32 %v2370_v24, %v567_v61  ;;  %v2815_v0 = vunpack.c.l.bf16 %v2267_v60  ;;  %v2551_v17 = vpop.f32.mrb[21].mxu0  ;;  %v2553_v61 = vpop.f32.mrb[21].mxu1 }
 0x105   :  { %v783_v45 = vsel %vm655_vm11, %v437_v44, %v719_v16  ;;  %v815_v51 = vsel %vm687_vm12, %v565_v57, %v751_v34  ;;  %vm658_vm13 = vcmp.gt.f32.partialorder %v448_v4, 0.0  ;;  %v2816_v42 = vunpack.c.l.bf16 %v2276_v1  ;;  %v2557_v9 = vpop.f32.mrb[22].mxu0  ;;  %v2559_v3 = vpop.f32.mrb[22].mxu1 }
 0x106   :  { %v1009_v55 = vadd.f32 %v2815_v0, %v817_v12  ;;  %v2817_v29 = vunpack.c.l.bf16 %v2281_v2  ;;  %v722_v41 = vmul.f32 0.1, %v448_v4  ;;  %vm690_vm14 = vcmp.gt.f32.partialorder %v576_v37, 0.0  ;;  %v2564_v38 = vpop.f32.mrb[23].mxu0  ;;  %v2566_v11 = vpop.f32.mrb[23].mxu1 }
 0x107   :  { %v975_v6 = vadd.f32 %v2816_v42, %v783_v45  ;;  %v754_v40 = vmul.f32 0.1, %v576_v37  ;;  %vm656_vm15 = vcmp.gt.f32.partialorder %v440_v50, 0.0  ;;  %v720_v39 = vmul.f32 0.1, %v440_v50 }
 0x108   :  { %v1007_v10 = vadd.f32 %v2817_v29, %v815_v51  ;;  %vm688_vm0 = vcmp.gt.f32.partialorder %v568_v18, 0.0  ;;  %v786_v33 = vsel %vm658_vm13, %v448_v4, %v722_v41  ;;  %v752_v58 = vmul.f32 0.1, %v568_v18 }
 0x109   :  { %v461_v5 = vadd.f32 %v1948_v49, %v2370_v24  ;;  %v589_v48 = vadd.f32 %v1980_v27, %v2370_v24  ;;  %v2818_v44 = vunpack.c.h.bf16 %v2262_v59  ;;  %v818_v54 = vsel %vm690_vm14, %v576_v37, %v754_v40 }
 0x10a   :  { %v784_v56 = vsel %vm656_vm15, %v440_v50, %v720_v39  ;;  %v453_v57 = vadd.f32 %v2370_v24, %v452_v63  ;;  %v2819_v16 = vunpack.c.h.bf16 %v2267_v60  ;;  %v2820_v27 = vunpack.c.h.bf16 %v2276_v1 }
 0x10b   :  { %v978_v35 = vadd.f32 %v2818_v44, %v786_v33  ;;  %v816_v4 = vsel %vm688_vm0, %v568_v18, %v752_v58  ;;  %vm661_vm1 = vcmp.gt.f32.partialorder %v461_v5, 0.0  ;;  %v2821_v59 = vunpack.c.h.bf16 %v2281_v2  ;;  %v2581_v2 = vpop.f32.mrb[24].mxu1 }
 0x10c   :  { %v1010_v49 = vadd.f32 %v2819_v16, %v818_v54  ;;  %v976_v34 = vadd.f32 %v2820_v27, %v784_v56  ;;  %v725_v37 = vmul.f32 0.1, %v461_v5  ;;  %vm693_vm2 = vcmp.gt.f32.partialorder %v589_v48, 0.0  ;;  %v2597_v41 = vpop.f32.mrb[25].mxu1 }
 0x10d   :  { %v1711_v12 = vpack.c.bf16 %v978_v35, %v977_v21  ;;  %v1008_v0 = vadd.f32 %v2821_v59, %v816_v4  ;;  %v757_v45 = vmul.f32 0.1, %v589_v48  ;;  %vm659_vm3 = vcmp.gt.f32.partialorder %v453_v57, 0.0  ;;  %v2579_v21 = vpop.f32.mrb[24].mxu0 }
 0x10e   :  { %v1791_v50 = vpack.c.bf16 %v1010_v49, %v1009_v55  ;;  %v1706_v63 = vpack.c.bf16 %v976_v34, %v975_v6  ;;  %v789_v51 = vsel %vm661_vm1, %v461_v5, %v725_v37  ;;  %v723_v1 = vmul.f32 0.1, %v453_v57 }
 0x10f   :  { %1870 = vst [vmem:[%s2799_s4 + $0x38] sm:$0xff] %v1711_v12   ;;  %v1786_v60 = vpack.c.bf16 %v1008_v0, %v1007_v10  ;;  %v581_v18 = vadd.f32 %v2370_v24, %v2503_v36  ;;  %v2822_v55 = vunpack.c.l.bf16 %v2290_v7  ;;  %v821_v6 = vsel %vm693_vm2, %v589_v48, %v757_v45  ;;  %v2595_v10 = vpop.f32.mrb[25].mxu0 }
 0x110   :  { %1886 = vst [vmem:[%s2799_s4 + $0xb8] sm:$0xff] %v1791_v50   ;;  %1869 = vst [vmem:[%s2799_s4 + $0x30] sm:$0xff] %v1706_v63   ;;  %v464_v29 = vadd.f32 %v2509_v46, %v2370_v24  ;;  %v592_v36 = vadd.f32 %v2511_v47, %v2370_v24  ;;  %v2823_v40 = vunpack.c.l.bf16 %v2295_v8  ;;  %v787_v33 = vsel %vm659_vm3, %v453_v57, %v723_v1  ;;  %v2605_v5 = vpop.f32.mrb[26].mxu0  ;;  %v2607_v46 = vpop.f32.mrb[26].mxu1 }
 0x111   :  { %v981_v42 = vadd.f32 %v2822_v55, %v789_v51  ;;  %1885 = vst [vmem:[%s2799_s4 + $0xb0] sm:$0xff] %v1786_v60   ;;  %vm691_vm4 = vcmp.gt.f32.partialorder %v581_v18, 0.0  ;;  %v755_v58 = vmul.f32 0.1, %v581_v18  ;;  %v2824_v47 = vunpack.c.l.bf16 %v2304_v13  ;;  %v2611_v35 = vpop.f32.mrb[27].mxu0  ;;  %v2613_v54 = vpop.f32.mrb[27].mxu1 }
 0x112   :  { %v1013_v39 = vadd.f32 %v2823_v40, %v821_v6  ;;  %vm662_vm5 = vcmp.gt.f32.partialorder %v464_v29, 0.0  ;;  %v726_v44 = vmul.f32 0.1, %v464_v29  ;;  %vm694_vm6 = vcmp.gt.f32.partialorder %v592_v36, 0.0 }
 0x113   :  { %v979_v48 = vadd.f32 %v2824_v47, %v787_v33  ;;  %v819_v56 = vsel %vm691_vm4, %v581_v18, %v755_v58  ;;  %v758_v16 = vmul.f32 0.1, %v592_v36  ;;  %v456_v57 = vadd.f32 %v2370_v24, %v2516_v62  ;;  %v2631_v18 = vpop.f32.mrb[28].mxu1 }
 0x114   :  { %v584_v49 = vadd.f32 %v2370_v24, %v2518_v53  ;;  %v2825_v27 = vunpack.c.l.bf16 %v2309_v14  ;;  %v790_v4 = vsel %vm662_vm5, %v464_v29, %v726_v44  ;;  %v477_v12 = vadd.f32 %v2543_v43, %v2370_v24  ;;  %v2629_v43 = vpop.f32.mrb[28].mxu0 }
 0x115   :  { %v605_v59 = vadd.f32 %v2545_v52, %v2370_v24  ;;  %v2826_v0 = vunpack.c.h.bf16 %v2290_v7  ;;  %v822_v50 = vsel %vm694_vm6, %v592_v36, %v758_v16  ;;  %vm660_vm7 = vcmp.gt.f32.partialorder %v456_v57, 0.0  ;;  %v2636_v7 = vld [vmem:[%s2797_s3 + $0xf0] sm:$0xff]   ;;  %v2640_v36 = vpop.f32.mrb[29].mxu0 }
 0x116   :  { %v1011_v34 = vadd.f32 %v2825_v27, %v819_v56  ;;  %v724_v63 = vmul.f32 0.1, %v456_v57  ;;  %v2827_v62 = vunpack.c.h.bf16 %v2295_v8  ;;  %vm692_vm8 = vcmp.gt.f32.partialorder %v584_v49, 0.0  ;;  %v2654_v47 = vpop.f32.mrb[30].mxu0 }
 0x117   :  { %v982_v37 = vadd.f32 %v2826_v0, %v790_v4  ;;  %v756_v53 = vmul.f32 0.1, %v584_v49  ;;  %vm665_vm9 = vcmp.gt.f32.partialorder %v477_v12, 0.0  ;;  %v729_v1 = vmul.f32 0.1, %v477_v12 }
 0x118   :  { %v1014_v45 = vadd.f32 %v2827_v62, %v822_v50  ;;  %v788_v51 = vsel %vm660_vm7, %v456_v57, %v724_v63  ;;  %vm697_vm10 = vcmp.gt.f32.partialorder %v605_v59, 0.0  ;;  %v2828_v8 = vunpack.c.h.bf16 %v2304_v13 }
 0x119   :  { %v1721_v60 = vpack.c.bf16 %v982_v37, %v981_v42  ;;  %v820_v6 = vsel %vm692_vm8, %v584_v49, %v756_v53  ;;  %v761_v29 = vmul.f32 0.1, %v605_v59  ;;  %v2642_v42 = vpop.f32.mrb[29].mxu1  ;;  %v2829_v40 = vunpack.c.h.bf16 %v2309_v14  ;;  %v2666_v49 = vpop.f32.mrb[31].mxu0 }
 0x11a   :  { %v1801_v52 = vpack.c.bf16 %v1014_v45, %v1013_v39  ;;  %v980_v55 = vadd.f32 %v2828_v8, %v788_v51  ;;  %v793_v58 = vsel %vm665_vm9, %v477_v12, %v729_v1  ;;  %v469_v39 = vadd.f32 %v2370_v24, %v2551_v17  ;;  %v2656_v44 = vpop.f32.mrb[30].mxu1 }
 0x11b   :  { %1872 = vst [vmem:[%s2799_s4 + $0x48] sm:$0xff] %v1721_v60   ;;  %v1012_v33 = vadd.f32 %v2829_v40, %v820_v6  ;;  %v597_v13 = vadd.f32 %v2370_v24, %v2553_v61  ;;  %v2830_v14 = vunpack.c.l.bf16 %v2318_v19  ;;  %v480_v57 = vadd.f32 %v2557_v9, %v2370_v24  ;;  %v2668_v61 = vpop.f32.mrb[31].mxu1 }
 0x11c   :  { %1888 = vst [vmem:[%s2799_s4 + $0xc8] sm:$0xff] %v1801_v52   ;;  %v1716_v56 = vpack.c.bf16 %v980_v55, %v979_v48  ;;  %v1667_v17 = vunpack.c.l.bf16 %v2636_v7  ;;  %v825_v4 = vsel %vm697_vm10, %v605_v59, %v761_v29  ;;  %vm663_vm11 = vcmp.gt.f32.partialorder %v469_v39, 0.0 }
 0x11d   :  { %v985_v16 = vadd.f32 %v2830_v14, %v793_v58  ;;  %v1796_v27 = vpack.c.bf16 %v1012_v33, %v1011_v34  ;;  %v727_v12 = vmul.f32 0.1, %v469_v39  ;;  %vm695_vm12 = vcmp.gt.f32.partialorder %v597_v13, 0.0 }
 0x11e   :  { %1871 = vst [vmem:[%s2799_s4 + $0x40] sm:$0xff] %v1716_v56   ;;  %v759_v48 = vmul.f32 0.1, %v597_v13  ;;  %vm666_vm13 = vcmp.gt.f32.partialorder %v480_v57, 0.0  ;;  %v730_v0 = vmul.f32 0.1, %v480_v57  ;;  %v608_v34 = vadd.f32 %v2559_v3, %v2370_v24 }
 0x11f   :  { %1887 = vst [vmem:[%s2799_s4 + $0xc0] sm:$0xff] %v1796_v27   ;;  %v791_v9 = vsel %vm663_vm11, %v469_v39, %v727_v12  ;;  %v472_v59 = vadd.f32 %v2370_v24, %v2564_v38  ;;  %v600_v37 = vadd.f32 %v2370_v24, %v2566_v11  ;;  %v2831_v50 = vunpack.c.l.bf16 %v2323_v20 }
 0x120   :  { %v2832_v62 = vunpack.c.l.bf16 %v2332_v25  ;;  %v794_v53 = vsel %vm666_vm13, %v480_v57, %v730_v0  ;;  %v493_v60 = vadd.f32 %v2579_v21, %v2370_v24  ;;  %v823_v51 = vsel %vm695_vm12, %v597_v13, %v759_v48 }
 0x121   :  { %v1017_v63 = vadd.f32 %v2831_v50, %v825_v4  ;;  %v2833_v1 = vunpack.c.h.bf16 %v2318_v19  ;;  %vm698_vm14 = vcmp.gt.f32.partialorder %v608_v34, 0.0  ;;  %v762_v52 = vmul.f32 0.1, %v608_v34 }
 0x122   :  { %v983_v45 = vadd.f32 %v2832_v62, %v791_v9  ;;  %vm664_vm15 = vcmp.gt.f32.partialorder %v472_v59, 0.0  ;;  %v728_v38 = vmul.f32 0.1, %v472_v59  ;;  %vm696_vm0 = vcmp.gt.f32.partialorder %v600_v37, 0.0 }
 0x123   :  { %v986_v3 = vadd.f32 %v2833_v1, %v794_v53  ;;  %v760_v11 = vmul.f32 0.1, %v600_v37  ;;  %v826_v55 = vsel %vm698_vm14, %v608_v34, %v762_v52  ;;  %vm669_vm1 = vcmp.gt.f32.partialorder %v493_v60, 0.0 }
 0x124   :  { %v733_v6 = vmul.f32 0.1, %v493_v60  ;;  %v2834_v29 = vunpack.c.h.bf16 %v2323_v20  ;;  %v792_v33 = vsel %vm664_vm15, %v472_v59, %v728_v38  ;;  %v621_v21 = vadd.f32 %v2581_v2, %v2370_v24 }
 0x125   :  { %v1731_v8 = vpack.c.bf16 %v986_v3, %v985_v16  ;;  %v824_v58 = vsel %vm696_vm0, %v600_v37, %v760_v11  ;;  %v2835_v19 = vunpack.c.l.bf16 %v2337_v26  ;;  %v2836_v13 = vunpack.c.h.bf16 %v2332_v25 }
 0x126   :  { %v1018_v40 = vadd.f32 %v2834_v29, %v826_v55  ;;  %v2837_v14 = vunpack.c.h.bf16 %v2337_v26  ;;  %v485_v20 = vadd.f32 %v2370_v24, %v2595_v10  ;;  %v797_v27 = vsel %vm669_vm1, %v493_v60, %v733_v6 }
 0x127   :  { %v1015_v39 = vadd.f32 %v2835_v19, %v823_v51  ;;  %1874 = vst [vmem:[%s2799_s4 + $0x58] sm:$0xff] %v1731_v8   ;;  %v984_v56 = vadd.f32 %v2836_v13, %v792_v33  ;;  %vm701_vm2 = vcmp.gt.f32.partialorder %v621_v21, 0.0  ;;  %v765_v2 = vmul.f32 0.1, %v621_v21 }
 0x128   :  { %v1016_v16 = vadd.f32 %v2837_v14, %v824_v58  ;;  %v1811_v57 = vpack.c.bf16 %v1018_v40, %v1017_v63  ;;  %vm667_vm3 = vcmp.gt.f32.partialorder %v485_v20, 0.0  ;;  %v731_v48 = vmul.f32 0.1, %v485_v20 }
 0x129   :  { %v1726_v4 = vpack.c.bf16 %v984_v56, %v983_v45  ;;  %v613_v25 = vadd.f32 %v2370_v24, %v2597_v41  ;;  %v496_v26 = vadd.f32 %v2605_v5, %v2370_v24  ;;  %v624_v10 = vadd.f32 %v2607_v46, %v2370_v24 }
 0x12a   :  { %v1806_v12 = vpack.c.bf16 %v1016_v16, %v1015_v39  ;;  %1890 = vst [vmem:[%s2799_s4 + $0xd8] sm:$0xff] %v1811_v57   ;;  %v1608_v0 = vunpack.c.h.bf16 %v2383_v15  ;;  %v2838_v9 = vunpack.c.l.bf16 %v2346_v31  ;;  %v829_v41 = vsel %vm701_vm2, %v621_v21, %v765_v2 }
 0x12b   :  { %1873 = vst [vmem:[%s2799_s4 + $0x50] sm:$0xff] %v1726_v4   ;;  %v488_v5 = vadd.f32 %v2370_v24, %v2611_v35  ;;  %v616_v46 = vadd.f32 %v2370_v24, %v2613_v54  ;;  %v795_v59 = vsel %vm667_vm3, %v485_v20, %v731_v48  ;;  %vm699_vm4 = vcmp.gt.f32.partialorder %v613_v25, 0.0 }
 0x12c   :  { %1889 = vst [vmem:[%s2799_s4 + $0xd0] sm:$0xff] %v1806_v12   ;;  %v989_v34 = vadd.f32 %v2838_v9, %v797_v27  ;;  %v763_v37 = vmul.f32 0.1, %v613_v25  ;;  %vm670_vm5 = vcmp.gt.f32.partialorder %v496_v26, 0.0  ;;  %v734_v50 = vmul.f32 0.1, %v496_v26 }
 0x12d   :  { %vm702_vm6 = vcmp.gt.f32.partialorder %v624_v10, 0.0  ;;  %v766_v63 = vmul.f32 0.1, %v624_v10  ;;  %vm668_vm7 = vcmp.gt.f32.partialorder %v488_v5, 0.0  ;;  %v732_v45 = vmul.f32 0.1, %v488_v5 }
 0x12e   :  { %v827_v62 = vsel %vm699_vm4, %v613_v25, %v763_v37  ;;  %vm700_vm8 = vcmp.gt.f32.partialorder %v616_v46, 0.0  ;;  %v764_v53 = vmul.f32 0.1, %v616_v46  ;;  %v2839_v60 = vunpack.c.l.bf16 %v2351_v32 }
 0x12f   :  { %v798_v1 = vsel %vm670_vm5, %v496_v26, %v734_v50  ;;  %v830_v35 = vsel %vm702_vm6, %v624_v10, %v766_v63  ;;  %v509_v54 = vadd.f32 %v2629_v43, %v2370_v24  ;;  %v2840_v3 = vunpack.c.h.bf16 %v2346_v31 }
 0x130   :  { %v1021_v51 = vadd.f32 %v2839_v60, %v829_v41  ;;  %v2841_v38 = vunpack.c.h.bf16 %v2351_v32  ;;  %v796_v8 = vsel %vm668_vm7, %v488_v5, %v732_v45  ;;  %v828_v55 = vsel %vm700_vm8, %v616_v46, %v764_v53 }
 0x131   :  { %v990_v52 = vadd.f32 %v2840_v3, %v798_v1  ;;  %v2842_v6 = vunpack.c.l.bf16 %v2360_v30  ;;  %v2843_v40 = vunpack.c.l.bf16 %v2365_v23  ;;  %v2844_v58 = vunpack.c.h.bf16 %v2360_v30 }
 0x132   :  { %v1022_v11 = vadd.f32 %v2841_v38, %v830_v35  ;;  %v2845_v19 = vunpack.c.h.bf16 %v2365_v23  ;;  %v637_v32 = vadd.f32 %v2631_v18, %v2370_v24  ;;  %v501_v13 = vadd.f32 %v2370_v24, %v2640_v36 }
 0x133   :  { %v987_v29 = vadd.f32 %v2842_v6, %v795_v59  ;;  %v1019_v33 = vadd.f32 %v2843_v40, %v827_v62  ;;  %v988_v21 = vadd.f32 %v2844_v58, %v796_v8  ;;  %v1741_v39 = vpack.c.bf16 %v990_v52, %v989_v34 }
 0x134   :  { %v1020_v43 = vadd.f32 %v2845_v19, %v828_v55  ;;  %v1821_v31 = vpack.c.bf16 %v1022_v11, %v1021_v51  ;;  %v737_v16 = vmul.f32 0.1, %v509_v54  ;;  %v629_v20 = vadd.f32 %v2370_v24, %v2642_v42 }
 0x135   :  { %v1736_v56 = vpack.c.bf16 %v988_v21, %v987_v29  ;;  %1876 = vst [vmem:[%s2799_s4 + $0x68] sm:$0xff] %v1741_v39   ;;  %vm673_vm9 = vcmp.gt.f32.partialorder %v509_v54, 0.0  ;;  %v769_v23 = vmul.f32 0.1, %v637_v32  ;;  %v1672_v30 = vunpack.c.h.bf16 %v2388_v28 }
 0x136   :  { %v1816_v14 = vpack.c.bf16 %v1020_v43, %v1019_v33  ;;  %1892 = vst [vmem:[%s2799_s4 + $0xe8] sm:$0xff] %v1821_v31   ;;  %v1604_v18 = vunpack.c.h.bf16 %v2405_v22  ;;  %vm705_vm10 = vcmp.gt.f32.partialorder %v637_v32, 0.0  ;;  %vm671_vm11 = vcmp.gt.f32.partialorder %v501_v13, 0.0 }
 0x137   :  { %1875 = vst [vmem:[%s2799_s4 + $0x60] sm:$0xff] %v1736_v56   ;;  %v735_v36 = vmul.f32 0.1, %v501_v13  ;;  %v512_v42 = vadd.f32 %v2654_v47, %v2370_v24  ;;  %v767_v57 = vmul.f32 0.1, %v629_v20  ;;  %v640_v27 = vadd.f32 %v2656_v44, %v2370_v24 }
 0x138   :  { %1891 = vst [vmem:[%s2799_s4 + $0xe0] sm:$0xff] %v1816_v14   ;;  %v504_v2 = vadd.f32 %v2370_v24, %v2666_v49  ;;  %v632_v4 = vadd.f32 %v2370_v24, %v2668_v61  ;;  %v801_v12 = vsel %vm673_vm9, %v509_v54, %v737_v16  ;;  %vm703_vm12 = vcmp.gt.f32.partialorder %v629_v20, 0.0 }
 0x139   :  { %vm674_vm13 = vcmp.gt.f32.partialorder %v512_v42, 0.0  ;;  %v1668_v48 = vunpack.c.h.bf16 %v2636_v7  ;;  %v833_v25 = vsel %vm705_vm10, %v637_v32, %v769_v23  ;;  %v799_v26 = vsel %vm671_vm11, %v501_v13, %v735_v36 }
 0x13a   :  { %v738_v10 = vmul.f32 0.1, %v512_v42  ;;  %vm706_vm14 = vcmp.gt.f32.partialorder %v640_v27, 0.0  ;;  %v770_v47 = vmul.f32 0.1, %v640_v27  ;;  %vm672_vm15 = vcmp.gt.f32.partialorder %v504_v2, 0.0 }
 0x13b   :  { %v736_v9 = vmul.f32 0.1, %v504_v2  ;;  %vm704_vm0 = vcmp.gt.f32.partialorder %v632_v4, 0.0  ;;  %v2846_v44 = vunpack.c.l.bf16 %v2383_v15  ;;  %v831_v49 = vsel %vm703_vm12, %v629_v20, %v767_v57 }
 0x13c   :  { %v802_v41 = vsel %vm674_vm13, %v512_v42, %v738_v10  ;;  %v768_v5 = vmul.f32 0.1, %v632_v4  ;;  %v2847_v24 = vunpack.c.l.bf16 %v2388_v28  ;;  %v834_v59 = vsel %vm706_vm14, %v640_v27, %v770_v47 }
 0x13d   :  { %v993_v34 = vadd.f32 %v2846_v44, %v801_v12  ;;  %v994_v46 = vadd.f32 %v1608_v0, %v802_v41  ;;  %v800_v37 = vsel %vm672_vm15, %v504_v2, %v736_v9  ;;  %v2848_v50 = vunpack.c.l.bf16 %v2405_v22 }
 0x13e   :  { %v1025_v61 = vadd.f32 %v2847_v24, %v833_v25  ;;  %v1026_v62 = vadd.f32 %v1672_v30, %v834_v59  ;;  %v992_v45 = vadd.f32 %v1604_v18, %v800_v37  ;;  %v832_v53 = vsel %vm704_vm0, %v632_v4, %v768_v5 }
 0x13f   :  { %v991_v63 = vadd.f32 %v2848_v50, %v799_v26  ;;  %v1023_v60 = vadd.f32 %v1667_v17, %v831_v49  ;;  %v1751_v51 = vpack.c.bf16 %v994_v46, %v993_v34  ;;  %v1024_v1 = vadd.f32 %v1668_v48, %v832_v53 }
 0x140   :  { %v1831_v35 = vpack.c.bf16 %v1026_v62, %v1025_v61 }
 0x141   :  { %v1746_v54 = vpack.c.bf16 %v992_v45, %v991_v63  ;;  %1878 = vst [vmem:[%s2799_s4 + $0x78] sm:$0xff] %v1751_v51   ;;  %v1826_v15 = vpack.c.bf16 %v1024_v1, %v1023_v60 }
 0x142   :  { %1894 = vst [vmem:[%s2799_s4 + $0xf8] sm:$0xff] %v1831_v35  }
 0x143   :  { %1877 = vst [vmem:[%s2799_s4 + $0x70] sm:$0xff] %v1746_v54   ;;  %1893 = vst [vmem:[%s2799_s4 + $0xf0] sm:$0xff] %v1826_v15  }

// kernel: _lambda_.13
= control target key start
LH: loop header
LB: loop body
LE: loop exit
PB: predicated region body
PF: predicated region fallthrough
CT: control target
= control target key end

     0   :  { %v601_v0 = vmov 0   ;;  %vm182_vm0 = vcmask 130048   ;;  %s750_s1 = inlined_call_operand.vmem [shape: bf16[144,128], index: 1, kind: input, shape index: {}]   ;;  %s751_s0 = inlined_call_operand.vmem [shape: bf16[128,144], index: 0, kind: input, shape index: {}]   ;;  %s752_s2 = inlined_call_operand.vmem [shape: f32[1,128], index: 2, kind: input, shape index: {}]   ;;  %s753_s3 = inlined_call_operand.vmem [shape: bf16[128,128], index: 3, kind: output, shape index: {}]  }
   0x1   :  { %207 = vmatprep.subr.bf16.mxu0 %v601_v0  ;;  %549 = vmatprep.subr.bf16.mxu1 %v601_v0  ;;  %v568_v1 = vld [vmem:[%s750_s1] sm:$0xff]   ;;  %v569_v2 = vld [vmem:[%s750_s1 + $0x8] sm:$0xff]   ;;  %v570_v3 = vld [vmem:[%s750_s1 + $0x10] sm:$0xff]  }
   0x2   :  { %208 = vmatpush1.bf16.msra.mxu0 %v568_v1  ;;  %558 = vmatpush1.bf16.msra.mxu1 %v568_v1  ;;  %v571_v4 = vld [vmem:[%s750_s1 + $0x18] sm:$0xff]   ;;  %v579_v5 = vld [vmem:[%s751_s0 + $0x4] ss:$8 sps:$4 sm:$0xff]   ;;  %v574_v9 = vld [vmem:[%s750_s1 + $0x30] sm:$0xff]  }
   0x3   :  { %209 = vmatprep.subr.bf16.mxu0 %v601_v0  ;;  %550 = vmatprep.subr.bf16.mxu1 %v601_v0  ;;  %v582_v6 = vld [vmem:[%s751_s0 + $0x44] ss:$8 sps:$4 sm:$0xff]   ;;  %v575_v10 = vld [vmem:[%s750_s1 + $0x38] sm:$0xff]   ;;  %v577_v12 = vld [vmem:[%s751_s0] ss:$8 sps:$4 sm:$0xff]  }
   0x4   :  { %462 = vmatprep.mubr.msk.bf16.mxu0 %vm182_vm0, %v579_v5  ;;  %466 = vmatprep.mubr.msk.bf16.mxu1 %vm182_vm0, %v582_v6  ;;  %v572_v7 = vld [vmem:[%s750_s1 + $0x20] sm:$0xff]   ;;  %v573_v8 = vld [vmem:[%s750_s1 + $0x28] sm:$0xff]   ;;  %v583_v14 = vld [vmem:[%s751_s0 + $0x14] ss:$8 sps:$4 sm:$0xff]  }
   0x5   :  { %v576_v11 = vld [vmem:[%s750_s1 + $0x40] sm:$0xff]   ;;  %v585_v15 = vld [vmem:[%s751_s0 + $0x54] ss:$8 sps:$4 sm:$0xff]   ;;  %v587_v16 = vld [vmem:[%s751_s0 + $0x10] ss:$8 sps:$4 sm:$0xff]  }
   0x6   :  { %210 = vmatpush1.bf16.msra.mxu0 %v569_v2  ;;  %559 = vmatpush1.bf16.msra.mxu1 %v569_v2  ;;  %v580_v13 = vld [vmem:[%s751_s0 + $0x40] ss:$8 sps:$4 sm:$0xff]   ;;  %v588_v17 = vld [vmem:[%s751_s0 + $0x50] ss:$8 sps:$4 sm:$0xff]   ;;  %v589_v18 = vld [vmem:[%s751_s0 + $0x24] ss:$8 sps:$4 sm:$0xff]  }
   0x7   :  { %211 = vmatprep.subr.bf16.mxu0 %v601_v0  ;;  %551 = vmatprep.subr.bf16.mxu1 %v601_v0  ;;  %v591_v19 = vld [vmem:[%s751_s0 + $0x64] ss:$8 sps:$4 sm:$0xff]   ;;  %v593_v20 = vld [vmem:[%s751_s0 + $0x20] ss:$8 sps:$4 sm:$0xff]   ;;  %v595_v22 = vld [vmem:[%s751_s0 + $0x34] ss:$8 sps:$4 sm:$0xff]  }
   0x8   :  { %v594_v21 = vld [vmem:[%s751_s0 + $0x60] ss:$8 sps:$4 sm:$0xff]   ;;  %v597_v23 = vld [vmem:[%s751_s0 + $0x74] ss:$8 sps:$4 sm:$0xff]   ;;  %v599_v24 = vld [vmem:[%s751_s0 + $0x30] ss:$8 sps:$4 sm:$0xff]  }
   0x9   :  { %v600_v25 = vld [vmem:[%s751_s0 + $0x70] ss:$8 sps:$4 sm:$0xff]   ;;  %v708_v26 = vld [vmem:[%s752_s2] ss:$0 sm:$0xff] }
   0xa   :  { %212 = vmatpush1.bf16.msra.mxu0 %v570_v3  ;;  %560 = vmatpush1.bf16.msra.mxu1 %v570_v3 }
   0xb   :  { %213 = vmatprep.subr.bf16.mxu0 %v601_v0  ;;  %552 = vmatprep.subr.bf16.mxu1 %v601_v0 }
   0xe   :  { %214 = vmatpush1.bf16.msra.mxu0 %v571_v4  ;;  %561 = vmatpush1.bf16.msra.mxu1 %v571_v4 }
   0xf   :  { %215 = vmatprep.subr.bf16.mxu0 %v601_v0  ;;  %553 = vmatprep.subr.bf16.mxu1 %v601_v0 }
  0x12   :  { %216 = vmatpush1.bf16.msra.mxu0 %v572_v7  ;;  %562 = vmatpush1.bf16.msra.mxu1 %v572_v7 }
  0x13   :  { %217 = vmatprep.subr.bf16.mxu0 %v601_v0  ;;  %554 = vmatprep.subr.bf16.mxu1 %v601_v0 }
  0x16   :  { %218 = vmatpush1.bf16.msra.mxu0 %v573_v8  ;;  %563 = vmatpush1.bf16.msra.mxu1 %v573_v8 }
  0x17   :  { %219 = vmatprep.subr.bf16.mxu0 %v601_v0  ;;  %555 = vmatprep.subr.bf16.mxu1 %v601_v0 }
  0x1a   :  { %220 = vmatpush1.bf16.msra.mxu0 %v574_v9  ;;  %564 = vmatpush1.bf16.msra.mxu1 %v574_v9 }
  0x1b   :  { %221 = vmatprep.subr.bf16.mxu0 %v601_v0  ;;  %556 = vmatprep.subr.bf16.mxu1 %v601_v0 }
  0x1e   :  { %222 = vmatpush1.bf16.msra.mxu0 %v575_v10  ;;  %565 = vmatpush1.bf16.msra.mxu1 %v575_v10 }
  0x1f   :  { %223 = vmatprep.subr.bf16.mxu0 %v601_v0  ;;  %557 = vmatprep.subr.bf16.mxu1 %v601_v0 }
  0x22   :  { %224 = vmatpush1.bf16.msra.mxu0 %v576_v11  ;;  %566 = vmatpush1.bf16.msra.mxu1 %v576_v11 }
  0x25   :  { %240 = vmatmul.mubr.bf16.vlgmr.msra.gmra.mrb[0].mxu0 %v577_v12  ;;  %272 = vmatmul.mubr.bf16.vlgmr.msra.gmra.mrb[0].mxu1 %v580_v13 }
  0x26   :  { %463 = vmatprep.mubr.msk.bf16.mxu0 %vm182_vm0, %v583_v14  ;;  %467 = vmatprep.mubr.msk.bf16.mxu1 %vm182_vm0, %v585_v15 }
  0x2d   :  { %248 = vmatmul.mubr.bf16.gmra.mrb[4].mxu0 %v587_v16  ;;  %280 = vmatmul.mubr.bf16.gmra.mrb[4].mxu1 %v588_v17 }
  0x2e   :  { %464 = vmatprep.mubr.msk.bf16.mxu0 %vm182_vm0, %v589_v18  ;;  %468 = vmatprep.mubr.msk.bf16.mxu1 %vm182_vm0, %v591_v19 }
  0x35   :  { %256 = vmatmul.mubr.bf16.gmra.mrb[8].mxu0 %v593_v20  ;;  %288 = vmatmul.mubr.bf16.gmra.mrb[8].mxu1 %v594_v21 }
  0x36   :  { %465 = vmatprep.mubr.msk.bf16.mxu0 %vm182_vm0, %v595_v22  ;;  %469 = vmatprep.mubr.msk.bf16.mxu1 %vm182_vm0, %v597_v23 }
  0x3d   :  { %264 = vmatmul.mubr.bf16.gmra.mrb[12].mxu0 %v599_v24  ;;  %296 = vmatmul.mubr.bf16.gmra.mrb[12].mxu1 %v600_v25 }
  0xf8   :  { %v241_v27 = vpop.f32.mrb[0].mxu0  ;;  %v273_v28 = vpop.f32.mrb[0].mxu1 }
  0xf9   :  { %v242_v29 = vadd.f32 %v708_v26, %v241_v27  ;;  %v274_v30 = vadd.f32 %v708_v26, %v273_v28  ;;  %v243_v31 = vpop.f32.mrb[1].mxu0  ;;  %v275_v32 = vpop.f32.mrb[1].mxu1 }
  0xfa   :  { %v244_v33 = vpop.f32.mrb[2].mxu0  ;;  %v276_v34 = vpop.f32.mrb[2].mxu1 }
  0xfb   :  { %v320_v35 = vmul.f32 0.1, %v242_v29  ;;  %v328_v36 = vmul.f32 0.1, %v274_v30  ;;  %v245_v37 = vadd.f32 %v708_v26, %v244_v33  ;;  %v277_v38 = vadd.f32 %v708_v26, %v276_v34  ;;  %v246_v39 = vpop.f32.mrb[3].mxu0  ;;  %v278_v40 = vpop.f32.mrb[3].mxu1 }
  0xfc   :  { %vm304_vm1 = vcmp.gt.f32.partialorder %v242_v29, 0.0  ;;  %vm312_vm2 = vcmp.gt.f32.partialorder %v274_v30, 0.0 }
  0xfd   :  { %vm305_vm3 = vcmp.gt.f32.partialorder %v245_v37, 0.0  ;;  %v321_v41 = vmul.f32 0.1, %v245_v37  ;;  %vm313_vm4 = vcmp.gt.f32.partialorder %v277_v38, 0.0  ;;  %v329_v42 = vmul.f32 0.1, %v277_v38 }
  0xfe   :  { %v336_v43 = vsel %vm304_vm1, %v242_v29, %v320_v35  ;;  %v344_v44 = vsel %vm312_vm2, %v274_v30, %v328_v36 }
  0xff   :  { %v337_v45 = vsel %vm305_vm3, %v245_v37, %v321_v41  ;;  %v345_v46 = vsel %vm313_vm4, %v277_v38, %v329_v42 }
 0x100   :  { %v249_v47 = vpop.f32.mrb[4].mxu0  ;;  %v281_v48 = vpop.f32.mrb[4].mxu1  ;;  %v505_v49 = vpack.c.bf16 %v337_v45, %v336_v43  ;;  %v525_v50 = vpack.c.bf16 %v345_v46, %v344_v44 }
 0x101   :  { %v250_v51 = vadd.f32 %v708_v26, %v249_v47  ;;  %v282_v52 = vadd.f32 %v708_v26, %v281_v48  ;;  %v251_v53 = vpop.f32.mrb[5].mxu0  ;;  %v283_v54 = vpop.f32.mrb[5].mxu1 }
 0x102   :  { %v252_v55 = vpop.f32.mrb[6].mxu0  ;;  %v284_v56 = vpop.f32.mrb[6].mxu1  ;;  %506 = vst [vmem:[%s753_s3] sm:$0xff] %v505_v49   ;;  %545 = vst [vmem:[%s753_s3 + $0x20] sm:$0xff] %v525_v50  }
 0x103   :  { %v322_v57 = vmul.f32 0.1, %v250_v51  ;;  %v330_v58 = vmul.f32 0.1, %v282_v52  ;;  %v253_v59 = vadd.f32 %v708_v26, %v252_v55  ;;  %v285_v60 = vadd.f32 %v708_v26, %v284_v56  ;;  %v254_v61 = vpop.f32.mrb[7].mxu0  ;;  %v286_v62 = vpop.f32.mrb[7].mxu1 }
 0x104   :  { %vm306_vm5 = vcmp.gt.f32.partialorder %v250_v51, 0.0  ;;  %vm314_vm6 = vcmp.gt.f32.partialorder %v282_v52, 0.0 }
 0x105   :  { %vm307_vm7 = vcmp.gt.f32.partialorder %v253_v59, 0.0  ;;  %v323_v63 = vmul.f32 0.1, %v253_v59  ;;  %vm315_vm8 = vcmp.gt.f32.partialorder %v285_v60, 0.0  ;;  %v331_v0 = vmul.f32 0.1, %v285_v60 }
 0x106   :  { %v338_v1 = vsel %vm306_vm5, %v250_v51, %v322_v57  ;;  %v346_v2 = vsel %vm314_vm6, %v282_v52, %v330_v58 }
 0x107   :  { %v339_v3 = vsel %vm307_vm7, %v253_v59, %v323_v63  ;;  %v347_v4 = vsel %vm315_vm8, %v285_v60, %v331_v0 }
 0x108   :  { %v257_v5 = vpop.f32.mrb[8].mxu0  ;;  %v289_v6 = vpop.f32.mrb[8].mxu1  ;;  %v510_v7 = vpack.c.bf16 %v339_v3, %v338_v1  ;;  %v530_v8 = vpack.c.bf16 %v347_v4, %v346_v2 }
 0x109   :  { %v258_v9 = vadd.f32 %v708_v26, %v257_v5  ;;  %v290_v10 = vadd.f32 %v708_v26, %v289_v6  ;;  %v259_v11 = vpop.f32.mrb[9].mxu0  ;;  %v291_v12 = vpop.f32.mrb[9].mxu1 }
 0x10a   :  { %v260_v13 = vpop.f32.mrb[10].mxu0  ;;  %v292_v14 = vpop.f32.mrb[10].mxu1  ;;  %542 = vst [vmem:[%s753_s3 + $0x8] sm:$0xff] %v510_v7   ;;  %546 = vst [vmem:[%s753_s3 + $0x28] sm:$0xff] %v530_v8  }
 0x10b   :  { %v324_v15 = vmul.f32 0.1, %v258_v9  ;;  %v332_v16 = vmul.f32 0.1, %v290_v10  ;;  %v261_v17 = vadd.f32 %v708_v26, %v260_v13  ;;  %v293_v18 = vadd.f32 %v708_v26, %v292_v14  ;;  %v262_v19 = vpop.f32.mrb[11].mxu0  ;;  %v294_v20 = vpop.f32.mrb[11].mxu1 }
 0x10c   :  { %vm308_vm9 = vcmp.gt.f32.partialorder %v258_v9, 0.0  ;;  %vm316_vm10 = vcmp.gt.f32.partialorder %v290_v10, 0.0 }
 0x10d   :  { %vm309_vm11 = vcmp.gt.f32.partialorder %v261_v17, 0.0  ;;  %v325_v21 = vmul.f32 0.1, %v261_v17  ;;  %vm317_vm12 = vcmp.gt.f32.partialorder %v293_v18, 0.0  ;;  %v333_v22 = vmul.f32 0.1, %v293_v18 }
 0x10e   :  { %v340_v23 = vsel %vm308_vm9, %v258_v9, %v324_v15  ;;  %v348_v24 = vsel %vm316_vm10, %v290_v10, %v332_v16 }
 0x10f   :  { %v341_v25 = vsel %vm309_vm11, %v261_v17, %v325_v21  ;;  %v349_v27 = vsel %vm317_vm12, %v293_v18, %v333_v22 }
 0x110   :  { %v265_v28 = vpop.f32.mrb[12].mxu0  ;;  %v297_v29 = vpop.f32.mrb[12].mxu1  ;;  %v515_v30 = vpack.c.bf16 %v341_v25, %v340_v23  ;;  %v535_v31 = vpack.c.bf16 %v349_v27, %v348_v24 }
 0x111   :  { %v266_v32 = vadd.f32 %v708_v26, %v265_v28  ;;  %v298_v33 = vadd.f32 %v708_v26, %v297_v29  ;;  %v267_v34 = vpop.f32.mrb[13].mxu0  ;;  %v299_v35 = vpop.f32.mrb[13].mxu1 }
 0x112   :  { %v268_v36 = vpop.f32.mrb[14].mxu0  ;;  %v300_v37 = vpop.f32.mrb[14].mxu1  ;;  %543 = vst [vmem:[%s753_s3 + $0x10] sm:$0xff] %v515_v30   ;;  %547 = vst [vmem:[%s753_s3 + $0x30] sm:$0xff] %v535_v31  }
 0x113   :  { %v326_v38 = vmul.f32 0.1, %v266_v32  ;;  %v334_v39 = vmul.f32 0.1, %v298_v33  ;;  %v269_v40 = vadd.f32 %v708_v26, %v268_v36  ;;  %v301_v41 = vadd.f32 %v708_v26, %v300_v37  ;;  %v270_v42 = vpop.f32.mrb[15].mxu0  ;;  %v302_v43 = vpop.f32.mrb[15].mxu1 }
 0x114   :  { %vm310_vm13 = vcmp.gt.f32.partialorder %v266_v32, 0.0  ;;  %vm318_vm14 = vcmp.gt.f32.partialorder %v298_v33, 0.0 }
 0x115   :  { %vm311_vm15 = vcmp.gt.f32.partialorder %v269_v40, 0.0  ;;  %v327_v44 = vmul.f32 0.1, %v269_v40  ;;  %vm319_vm0 = vcmp.gt.f32.partialorder %v301_v41, 0.0  ;;  %v335_v45 = vmul.f32 0.1, %v301_v41 }
 0x116   :  { %v342_v46 = vsel %vm310_vm13, %v266_v32, %v326_v38  ;;  %v350_v47 = vsel %vm318_vm14, %v298_v33, %v334_v39 }
 0x117   :  { %v343_v48 = vsel %vm311_vm15, %v269_v40, %v327_v44  ;;  %v351_v49 = vsel %vm319_vm0, %v301_v41, %v335_v45 }
 0x118   :  { %v520_v50 = vpack.c.bf16 %v343_v48, %v342_v46  ;;  %v540_v51 = vpack.c.bf16 %v351_v49, %v350_v47 }
 0x11a   :  { %544 = vst [vmem:[%s753_s3 + $0x18] sm:$0xff] %v520_v50   ;;  %548 = vst [vmem:[%s753_s3 + $0x38] sm:$0xff] %v540_v51  }

// kernel: _lambda_.14
= control target key start
LH: loop header
LB: loop body
LE: loop exit
PB: predicated region body
PF: predicated region fallthrough
CT: control target
= control target key end

     0   :  { %vm204_vm0 = vcmask 261120   ;;  %s558_s1 = inlined_call_operand.vmem [shape: bf16[288,128], index: 1, kind: input, shape index: {}]   ;;  %s559_s0 = inlined_call_operand.vmem [shape: bf16[32,288], index: 0, kind: input, shape index: {}]   ;;  %s560_s2 = inlined_call_operand.vmem [shape: f32[1,128], index: 2, kind: input, shape index: {}]   ;;  %s561_s3 = inlined_call_operand.vmem [shape: bf16[32,128], index: 3, kind: output, shape index: {}]  }
   0x1   :  { %v431_v0 = vld [vmem:[%s558_s1 + $0x40] sm:$0xff]   ;;  %v433_v2 = vld [vmem:[%s558_s1 + $0x48] sm:$0xff]   ;;  %v435_v4 = vld [vmem:[%s558_s1 + $0x50] sm:$0xff]  }
   0x2   :  { %v432_v1 = vld [vmem:[%s558_s1] sm:$0xff]   ;;  %391 = vmatprep.subr.bf16.mxu0 %v431_v0  ;;  %v434_v3 = vld [vmem:[%s558_s1 + $0x8] sm:$0xff]   ;;  %v436_v5 = vld [vmem:[%s558_s1 + $0x10] sm:$0xff]  }
   0x3   :  { %392 = vmatpush3.bf16.msra.mxu0 %v432_v1  ;;  %v437_v6 = vld [vmem:[%s558_s1 + $0x58] sm:$0xff]   ;;  %v439_v8 = vld [vmem:[%s558_s1 + $0x60] sm:$0xff]   ;;  %v441_v11 = vld [vmem:[%s558_s1 + $0x68] sm:$0xff]  }
   0x4   :  { %393 = vmatprep.subr.bf16.mxu0 %v433_v2  ;;  %v438_v7 = vld [vmem:[%s558_s1 + $0x18] sm:$0xff]   ;;  %v440_v9 = vld [vmem:[%s558_s1 + $0x20] sm:$0xff]   ;;  %v442_v12 = vld [vmem:[%s558_s1 + $0x28] sm:$0xff]  }
   0x5   :  { %v446_v10 = vld [vmem:[%s558_s1 + $0x80] sm:$0xff]   ;;  %v443_v13 = vld [vmem:[%s558_s1 + $0x70] sm:$0xff]   ;;  %v451_v15 = vld [vmem:[%s558_s1 + $0x88] sm:$0xff]  }
   0x6   :  { %423 = vmatprep.subr.bf16.mxu1 %v446_v10  ;;  %v450_v14 = vld [vmem:[%s559_s0 + $0x4] ss:$12 sps:$4 sm:$0xff]   ;;  %v452_v16 = vld [vmem:[%s559_s0 + $0x8] ss:$12 sps:$4 sm:$0xff]   ;;  %v453_v17 = vld [vmem:[%s559_s0 + $0x20] ss:$12 sps:$4 sm:$0xff]  }
   0x7   :  { %394 = vmatpush3.bf16.msra.mxu0 %v434_v3  ;;  %424 = vmatpush3.bf16.msra.mxu1 %v446_v10  ;;  %v444_v18 = vld [vmem:[%s558_s1 + $0x30] sm:$0xff]   ;;  %v445_v19 = vld [vmem:[%s558_s1 + $0x78] sm:$0xff]   ;;  %v448_v21 = vld [vmem:[%s559_s0] ss:$12 sps:$4 sm:$0xff]  }
   0x8   :  { %395 = vmatprep.subr.bf16.mxu0 %v435_v4  ;;  %243 = vmatprep.mubr.bf16.mxu0 %v450_v14  ;;  %v447_v20 = vld [vmem:[%s558_s1 + $0x38] sm:$0xff]   ;;  %v345_v30 = vld [vmem:[%s560_s2] ss:$0 sm:$0xff] }
   0x9   :  { %425 = vmatprep.subr.bf16.mxu1 %v451_v15  ;;  %427 = vmatprep.mubr.msk.bf16.mxu1 %vm204_vm0, %v452_v16  ;;  %v454_v22 = vld [vmem:[%s559_s0 + $0x1c] ss:$12 sps:$4 sm:$0xff]   ;;  %v456_v23 = vld [vmem:[%s559_s0 + $0x18] ss:$12 sps:$4 sm:$0xff]  }
   0xb   :  { %396 = vmatpush3.bf16.msra.mxu0 %v436_v5  ;;  %426 = vmatpush3.bf16.msra.mxu1 %v451_v15 }
   0xc   :  { %397 = vmatprep.subr.bf16.mxu0 %v437_v6 }
   0xe   :  { %428 = vmatmul.mubr.msk.bf16.vlgmr.msra.gmra.mrb[0].mxu1 %vm204_vm0, %v453_v17 }
   0xf   :  { %398 = vmatpush3.bf16.msra.mxu0 %v438_v7 }
  0x10   :  { %399 = vmatprep.subr.bf16.mxu0 %v439_v8 }
  0x13   :  { %400 = vmatpush3.bf16.msra.mxu0 %v440_v9 }
  0x14   :  { %401 = vmatprep.subr.bf16.mxu0 %v441_v11 }
  0x17   :  { %402 = vmatpush3.bf16.msra.mxu0 %v442_v12 }
  0x18   :  { %403 = vmatprep.subr.bf16.mxu0 %v443_v13 }
  0x1b   :  { %404 = vmatpush3.bf16.msra.mxu0 %v444_v18 }
  0x1c   :  { %405 = vmatprep.subr.bf16.mxu0 %v445_v19 }
  0x1f   :  { %406 = vmatpush3.bf16.msra.mxu0 %v447_v20 }
  0x22   :  { %244 = vmatmul.mubr.bf16.vlgmr.msra.gmra.mrb[0].mxu0 %v448_v21 }
  0x23   :  { %251 = vmatprep.mubr.bf16.mxu0 %v454_v22 }
  0x2a   :  { %252 = vmatmul.mubr.bf16.gmra.mrb[4].mxu0 %v456_v23 }
  0xe1   :  { %v429_v24 = vpop.f32.mrb[0].mxu1 }
  0xe2   :  { %v294_v25 = vpop.f32.mrb[1].mxu1 }
  0xe3   :  { %v430_v26 = vpop.f32.mrb[2].mxu1 }
  0xe4   :  { %v297_v27 = vpop.f32.mrb[3].mxu1 }
  0xf5   :  { %v407_v28 = vpop.f32.mrb[0].mxu0 }
  0xf6   :  { %v408_v29 = vpop.f32.mrb[1].mxu0 }
  0xf7   :  { %v409_v31 = vadd.f32 %v408_v29, %v407_v28  ;;  %v410_v32 = vpop.f32.mrb[2].mxu0 }
  0xf8   :  { %v411_v33 = vpop.f32.mrb[3].mxu0 }
  0xf9   :  { %v412_v34 = vadd.f32 %v411_v33, %v410_v32  ;;  %v246_v35 = vadd.f32 %v409_v31, %v345_v30 }
  0xfb   :  { %v295_v36 = vadd.f32 %v294_v25, %v246_v35  ;;  %v249_v37 = vadd.f32 %v412_v34, %v345_v30 }
  0xfd   :  { %v313_v38 = vmul.f32 0.1, %v295_v36  ;;  %v298_v39 = vadd.f32 %v297_v27, %v249_v37  ;;  %v413_v40 = vpop.f32.mrb[4].mxu0  ;;  %vm309_vm1 = vcmp.gt.f32.partialorder %v295_v36, 0.0 }
  0xfe   :  { %v414_v41 = vpop.f32.mrb[5].mxu0 }
  0xff   :  { %vm310_vm2 = vcmp.gt.f32.partialorder %v298_v39, 0.0  ;;  %v314_v42 = vmul.f32 0.1, %v298_v39  ;;  %v415_v43 = vadd.f32 %v414_v41, %v413_v40  ;;  %v416_v44 = vpop.f32.mrb[6].mxu0  ;;  %v317_v46 = vsel %vm309_vm1, %v295_v36, %v313_v38 }
 0x100   :  { %v417_v45 = vpop.f32.mrb[7].mxu0 }
 0x101   :  { %v318_v47 = vsel %vm310_vm2, %v298_v39, %v314_v42  ;;  %v254_v48 = vadd.f32 %v415_v43, %v345_v30  ;;  %v418_v49 = vadd.f32 %v417_v45, %v416_v44 }
 0x102   :  { %v383_v50 = vpack.c.bf16 %v318_v47, %v317_v46 }
 0x103   :  { %v303_v51 = vadd.f32 %v429_v24, %v254_v48  ;;  %v257_v52 = vadd.f32 %v418_v49, %v345_v30 }
 0x104   :  { %384 = vst [vmem:[%s561_s3] sm:$0xff] %v383_v50  }
 0x105   :  { %v315_v53 = vmul.f32 0.1, %v303_v51  ;;  %v306_v54 = vadd.f32 %v430_v26, %v257_v52  ;;  %vm311_vm3 = vcmp.gt.f32.partialorder %v303_v51, 0.0 }
 0x107   :  { %vm312_vm4 = vcmp.gt.f32.partialorder %v306_v54, 0.0  ;;  %v316_v55 = vmul.f32 0.1, %v306_v54  ;;  %v319_v56 = vsel %vm311_vm3, %v303_v51, %v315_v53 }
 0x109   :  { %v320_v57 = vsel %vm312_vm4, %v306_v54, %v316_v55 }
 0x10a   :  { %v388_v58 = vpack.c.bf16 %v320_v57, %v319_v56 }
 0x10c   :  { %390 = vst [vmem:[%s561_s3 + $0x8] sm:$0xff] %v388_v58  }

// kernel: _lambda_.17
= control target key start
LH: loop header
LB: loop body
LE: loop exit
PB: predicated region body
PF: predicated region fallthrough
CT: control target
= control target key end

     0   :  { %v27_v0 = vlaneseq  ;;  %v152_v1 = vmov 1983009808   ;;  %s153_s14 = smov 32   ;;  %vm96_vm0 = vcmask 261120   ;;  %vm129_vm1 = vcmask 517120   ;;  %s260_s0 = inlined_call_operand.vmem [shape: bf16[2,4,4,32], index: 0, kind: input, shape index: {}]   ;;  %s261_s1 = inlined_call_operand.vmem [shape: bf16[2,8,4,64], index: 1, kind: output, shape index: {}]  }
   0x1   :  { %v25_v2 = vunpack.c.l.s4 %v152_v1  ;;  %v10_v5 = vld [vmem:[%s260_s0 + $0x4] sm:$0x3]  ;;  %v8_v6 = vld [vmem:[%s260_s0] sm:$0x3]  ;;  %v11_v8 = vld [vmem:[%s260_s0 + $0x6] sm:$0x3] }
   0x2   :  { %v28_v3 = vshrl.u32 %v27_v0, 7  ;;  %v9_v9 = vld [vmem:[%s260_s0 + $0x2] sm:$0x3]  ;;  %v13_v14 = vld [vmem:[%s260_s0 + $0xa] sm:$0x3] }
   0x3   :  { %v26_v4 = vunpack.c.0.s8 %v25_v2  ;;  %v12_v15 = vld [vmem:[%s260_s0 + $0x8] sm:$0x3]  ;;  %v15_v18 = vld [vmem:[%s260_s0 + $0xe] sm:$0x3]  ;;  %v14_v19 = vld [vmem:[%s260_s0 + $0xc] sm:$0x3] }
   0x5   :  { %v29_v7 = vsub.s32 %v26_v4, %v28_v3 }
   0x7   :  { %v44_v10 = vrot.slane %v10_v5, %v29_v7  ;;  %v30_v11 = vrot.slane %v8_v6, %v29_v7  ;;  %v51_v12 = vrot.slane %v11_v8, %v29_v7  ;;  %v37_v13 = vrot.slane %v9_v9, %v29_v7 }
   0x8   :  { %v65_v16 = vrot.slane %v13_v14, %v29_v7  ;;  %v58_v17 = vrot.slane %v12_v15, %v29_v7  ;;  %v79_v20 = vrot.slane %v15_v18, %v29_v7  ;;  %v72_v21 = vrot.slane %v14_v19, %v29_v7 }
   0x9   :  { %84 = vrot.lane.b32.xlu1 %v44_v10, %s153_s14  ;;  %80 = vrot.lane.b32.xlu0 %v30_v11, %s153_s14 }
   0xd   :  { %86 = vrot.lane.b32.xlu1 %v51_v12, %s153_s14  ;;  %82 = vrot.lane.b32.xlu0 %v37_v13, %s153_s14 }
  0x11   :  { %90 = vrot.lane.b32.xlu1 %v65_v16, %s153_s14  ;;  %88 = vrot.lane.b32.xlu0 %v58_v17, %s153_s14 }
  0x15   :  { %94 = vrot.lane.b32.xlu1 %v79_v20, %s153_s14  ;;  %92 = vrot.lane.b32.xlu0 %v72_v21, %s153_s14 }
  0x7b   :  { %v85_v22 = vpop.permute.xlu1 %84  ;;  %v81_v23 = vpop.permute.xlu0 %80 }
  0x7c   :  { %v107_v24 = vsel %vm96_vm0, %v10_v5, %v85_v22  ;;  %v99_v25 = vsel %vm96_vm0, %v8_v6, %v81_v23 }
  0x7d   :  { %134 = vst.msk [vmem:[%s261_s1 + $0x8] sm:$0x3] %vm129_vm1, %v107_v24  ;;  %135 = vst.msk [vmem:[%s261_s1 + $0xa] sm:$0x3] %vm129_vm1, %v107_v24 }
  0x7e   :  { %130 = vst.msk [vmem:[%s261_s1] sm:$0x3] %vm129_vm1, %v99_v25  ;;  %131 = vst.msk [vmem:[%s261_s1 + $0x2] sm:$0x3] %vm129_vm1, %v99_v25 }
  0x7f   :  { %v87_v26 = vpop.permute.xlu1 %86  ;;  %v83_v27 = vpop.permute.xlu0 %82 }
  0x80   :  { %v111_v28 = vsel %vm96_vm0, %v11_v8, %v87_v26  ;;  %v103_v29 = vsel %vm96_vm0, %v9_v9, %v83_v27 }
  0x81   :  { %136 = vst.msk [vmem:[%s261_s1 + $0xc] sm:$0x3] %vm129_vm1, %v111_v28  ;;  %137 = vst.msk [vmem:[%s261_s1 + $0xe] sm:$0x3] %vm129_vm1, %v111_v28 }
  0x82   :  { %132 = vst.msk [vmem:[%s261_s1 + $0x4] sm:$0x3] %vm129_vm1, %v103_v29  ;;  %133 = vst.msk [vmem:[%s261_s1 + $0x6] sm:$0x3] %vm129_vm1, %v103_v29 }
  0x83   :  { %v91_v30 = vpop.permute.xlu1 %90  ;;  %v89_v31 = vpop.permute.xlu0 %88 }
  0x84   :  { %v119_v32 = vsel %vm96_vm0, %v13_v14, %v91_v30  ;;  %v115_v33 = vsel %vm96_vm0, %v12_v15, %v89_v31 }
  0x85   :  { %140 = vst.msk [vmem:[%s261_s1 + $0x14] sm:$0x3] %vm129_vm1, %v119_v32  ;;  %141 = vst.msk [vmem:[%s261_s1 + $0x16] sm:$0x3] %vm129_vm1, %v119_v32 }
  0x86   :  { %138 = vst.msk [vmem:[%s261_s1 + $0x10] sm:$0x3] %vm129_vm1, %v115_v33  ;;  %139 = vst.msk [vmem:[%s261_s1 + $0x12] sm:$0x3] %vm129_vm1, %v115_v33 }
  0x87   :  { %v95_v34 = vpop.permute.xlu1 %94  ;;  %v93_v35 = vpop.permute.xlu0 %92 }
  0x88   :  { %v127_v36 = vsel %vm96_vm0, %v15_v18, %v95_v34  ;;  %v123_v37 = vsel %vm96_vm0, %v14_v19, %v93_v35 }
  0x89   :  { %144 = vst.msk [vmem:[%s261_s1 + $0x1c] sm:$0x3] %vm129_vm1, %v127_v36  ;;  %145 = vst.msk [vmem:[%s261_s1 + $0x1e] sm:$0x3] %vm129_vm1, %v127_v36 }
  0x8a   :  { %142 = vst.msk [vmem:[%s261_s1 + $0x18] sm:$0x3] %vm129_vm1, %v123_v37  ;;  %143 = vst.msk [vmem:[%s261_s1 + $0x1a] sm:$0x3] %vm129_vm1, %v123_v37 }

// kernel: _lambda_.18
= control target key start
LH: loop header
LB: loop body
LE: loop exit
PB: predicated region body
PF: predicated region fallthrough
CT: control target
= control target key end

     0   :  { %vm110_vm0 = vcmask 523264   ;;  %s444_s1 = inlined_call_operand.vmem [shape: bf16[64,128], index: 1, kind: input, shape index: {}]   ;;  %s445_s0 = inlined_call_operand.vmem [shape: bf16[128,64], index: 0, kind: input, shape index: {}]   ;;  %s446_s2 = inlined_call_operand.vmem [shape: f32[1,128], index: 2, kind: input, shape index: {}]   ;;  %s447_s3 = inlined_call_operand.vmem [shape: f32[128,128], index: 3, kind: output, shape index: {}]  }
   0x1   :  { %v317_v0 = vld [vmem:[%s444_s1] sm:$0xff]   ;;  %v318_v1 = vld [vmem:[%s444_s1 + $0x8] sm:$0xff]   ;;  %v319_v2 = vld [vmem:[%s444_s1 + $0x10] sm:$0xff]  }
   0x2   :  { %285 = vmatprep.subr.bf16.mxu0 %v317_v0  ;;  %309 = vmatprep.subr.bf16.mxu1 %v317_v0  ;;  %v321_v3 = vld [vmem:[%s445_s0] sm:$0xff]   ;;  %v320_v5 = vld [vmem:[%s444_s1 + $0x18] sm:$0xff]   ;;  %v323_v6 = vld [vmem:[%s445_s0 + $0x8] sm:$0xff]  }
   0x3   :  { %286 = vmatpush3.bf16.msra.mxu0 %v317_v0  ;;  %313 = vmatpush3.bf16.msra.mxu1 %v317_v0  ;;  %v322_v4 = vld [vmem:[%s445_s0 + $0x20] sm:$0xff]   ;;  %v324_v7 = vld [vmem:[%s445_s0 + $0x28] sm:$0xff]   ;;  %v325_v8 = vld [vmem:[%s445_s0 + $0x10] sm:$0xff]  }
   0x4   :  { %287 = vmatprep.subr.bf16.mxu0 %v318_v1  ;;  %310 = vmatprep.subr.bf16.mxu1 %v318_v1  ;;  %v326_v9 = vld [vmem:[%s445_s0 + $0x30] sm:$0xff]   ;;  %v327_v10 = vld [vmem:[%s445_s0 + $0x18] sm:$0xff]   ;;  %v252_v12 = vld [vmem:[%s446_s2] ss:$0 sm:$0xff] }
   0x5   :  { %293 = vmatprep.mubr.msk.bf16.mxu0 %vm110_vm0, %v321_v3  ;;  %301 = vmatprep.mubr.msk.bf16.mxu1 %vm110_vm0, %v322_v4  ;;  %v328_v11 = vld [vmem:[%s445_s0 + $0x38] sm:$0xff]  }
   0x7   :  { %288 = vmatpush3.bf16.msra.mxu0 %v318_v1  ;;  %314 = vmatpush3.bf16.msra.mxu1 %v318_v1 }
   0x8   :  { %289 = vmatprep.subr.bf16.mxu0 %v319_v2  ;;  %311 = vmatprep.subr.bf16.mxu1 %v319_v2 }
   0xb   :  { %290 = vmatpush3.bf16.msra.mxu0 %v319_v2  ;;  %315 = vmatpush3.bf16.msra.mxu1 %v319_v2 }
   0xc   :  { %291 = vmatprep.subr.bf16.mxu0 %v320_v5  ;;  %312 = vmatprep.subr.bf16.mxu1 %v320_v5 }
   0xf   :  { %292 = vmatpush3.bf16.msra.mxu0 %v320_v5  ;;  %316 = vmatpush3.bf16.msra.mxu1 %v320_v5 }
  0x12   :  { %294 = vmatmul.mubr.msk.bf16.vlgmr.msra.gmra.mrb[0].mxu0 %vm110_vm0, %v323_v6  ;;  %302 = vmatmul.mubr.msk.bf16.vlgmr.msra.gmra.mrb[0].mxu1 %vm110_vm0, %v324_v7 }
  0x13   :  { %297 = vmatprep.mubr.msk.bf16.mxu0 %vm110_vm0, %v325_v8  ;;  %305 = vmatprep.mubr.msk.bf16.mxu1 %vm110_vm0, %v326_v9 }
  0x1a   :  { %298 = vmatmul.mubr.msk.bf16.gmra.mrb[4].mxu0 %vm110_vm0, %v327_v10  ;;  %306 = vmatmul.mubr.msk.bf16.gmra.mrb[4].mxu1 %vm110_vm0, %v328_v11 }
  0xe5   :  { %v295_v13 = vpop.f32.mrb[0].mxu0  ;;  %v303_v14 = vpop.f32.mrb[0].mxu1 }
  0xe6   :  { %v178_v15 = vadd.f32 %v295_v13, %v252_v12  ;;  %v210_v16 = vadd.f32 %v303_v14, %v252_v12  ;;  %v169_v17 = vpop.f32.mrb[1].mxu0  ;;  %v201_v18 = vpop.f32.mrb[1].mxu1 }
  0xe7   :  { %v170_v19 = vadd.f32 %v252_v12, %v169_v17  ;;  %v202_v20 = vadd.f32 %v252_v12, %v201_v18  ;;  %v296_v21 = vpop.f32.mrb[2].mxu0  ;;  %v304_v22 = vpop.f32.mrb[2].mxu1 }
  0xe8   :  { %234 = vst [vmem:[%s447_s3 + $0x10] sm:$0xff] %v178_v15  ;;  %242 = vst [vmem:[%s447_s3 + $0x50] sm:$0xff] %v210_v16  ;;  %v181_v23 = vadd.f32 %v296_v21, %v252_v12  ;;  %v213_v24 = vadd.f32 %v304_v22, %v252_v12  ;;  %v172_v25 = vpop.f32.mrb[3].mxu0  ;;  %v204_v26 = vpop.f32.mrb[3].mxu1 }
  0xe9   :  { %232 = vst [vmem:[%s447_s3] sm:$0xff] %v170_v19  ;;  %240 = vst [vmem:[%s447_s3 + $0x40] sm:$0xff] %v202_v20  ;;  %v173_v27 = vadd.f32 %v252_v12, %v172_v25  ;;  %v205_v28 = vadd.f32 %v252_v12, %v204_v26 }
  0xea   :  { %235 = vst [vmem:[%s447_s3 + $0x18] sm:$0xff] %v181_v23  ;;  %243 = vst [vmem:[%s447_s3 + $0x58] sm:$0xff] %v213_v24 }
  0xeb   :  { %233 = vst [vmem:[%s447_s3 + $0x8] sm:$0xff] %v173_v27  ;;  %241 = vst [vmem:[%s447_s3 + $0x48] sm:$0xff] %v205_v28 }
  0xed   :  { %v299_v29 = vpop.f32.mrb[4].mxu0  ;;  %v307_v30 = vpop.f32.mrb[4].mxu1 }
  0xee   :  { %v194_v31 = vadd.f32 %v299_v29, %v252_v12  ;;  %v226_v32 = vadd.f32 %v307_v30, %v252_v12  ;;  %v185_v33 = vpop.f32.mrb[5].mxu0  ;;  %v217_v34 = vpop.f32.mrb[5].mxu1 }
  0xef   :  { %v186_v35 = vadd.f32 %v252_v12, %v185_v33  ;;  %v218_v36 = vadd.f32 %v252_v12, %v217_v34  ;;  %v300_v37 = vpop.f32.mrb[6].mxu0  ;;  %v308_v38 = vpop.f32.mrb[6].mxu1 }
  0xf0   :  { %238 = vst [vmem:[%s447_s3 + $0x30] sm:$0xff] %v194_v31  ;;  %246 = vst [vmem:[%s447_s3 + $0x70] sm:$0xff] %v226_v32  ;;  %v197_v39 = vadd.f32 %v300_v37, %v252_v12  ;;  %v229_v40 = vadd.f32 %v308_v38, %v252_v12  ;;  %v188_v41 = vpop.f32.mrb[7].mxu0  ;;  %v220_v42 = vpop.f32.mrb[7].mxu1 }
  0xf1   :  { %236 = vst [vmem:[%s447_s3 + $0x20] sm:$0xff] %v186_v35  ;;  %244 = vst [vmem:[%s447_s3 + $0x60] sm:$0xff] %v218_v36  ;;  %v189_v43 = vadd.f32 %v252_v12, %v188_v41  ;;  %v221_v44 = vadd.f32 %v252_v12, %v220_v42 }
  0xf2   :  { %239 = vst [vmem:[%s447_s3 + $0x38] sm:$0xff] %v197_v39  ;;  %247 = vst [vmem:[%s447_s3 + $0x78] sm:$0xff] %v229_v40 }
  0xf3   :  { %237 = vst [vmem:[%s447_s3 + $0x28] sm:$0xff] %v189_v43  ;;  %245 = vst [vmem:[%s447_s3 + $0x68] sm:$0xff] %v221_v44 }

// kernel: _lambda_.19
= control target key start
LH: loop header
LB: loop body
LE: loop exit
PB: predicated region body
PF: predicated region fallthrough
CT: control target
= control target key end

     0   :  { %v17_v18 = vlaneseq  ;;  %s178_s0 = inlined_call_operand.vmem [shape: f32[11,384], index: 0, kind: input, shape index: {}]   ;;  %s179_s1 = inlined_call_operand.vmem [shape: f32[11,384], index: 1, kind: input, shape index: {}]   ;;  %s180_s2 = inlined_call_operand.vmem [shape: f32[11,384], index: 2, kind: output, shape index: {}]  }
   0x1   :  { %v11_v0 = vld [vmem:[%s178_s0] sm:$0xff]  ;;  %v12_v2 = vld [vmem:[%s178_s0 + $0x8] sm:$0xff]  ;;  %v13_v5 = vld [vmem:[%s178_s0 + $0x10] sm:$0xff] }
   0x2   :  { %v20_v1 = vld [vmem:[%s179_s1] sm:$0xff]  ;;  %v21_v4 = vld [vmem:[%s179_s1 + $0x8] sm:$0xff]  ;;  %v22_v6 = vld [vmem:[%s179_s1 + $0x10] sm:$0xff]  ;;  %v18_v24 = vshrl.u32 %v17_v18, 7 }
   0x3   :  { %v26_v3 = vadd.f32 %v20_v1, %v11_v0  ;;  %v27_v7 = vadd.f32 %v21_v4, %v12_v2  ;;  %v28_v8 = vadd.f32 %v22_v6, %v13_v5  ;;  %v14_v9 = vld [vmem:[%s178_s0 + $0x18] sm:$0x7]  ;;  %v15_v10 = vld [vmem:[%s178_s0 + $0x20] sm:$0x7]  ;;  %v16_v11 = vld [vmem:[%s178_s0 + $0x28] sm:$0x7] }
   0x4   :  { %v103_v13 = vmul.f32 -1.442695, %v14_v9  ;;  %v104_v14 = vmul.f32 -1.442695, %v15_v10  ;;  %v105_v17 = vmul.f32 -1.442695, %v16_v11 }
   0x5   :  { %v32_v12 = vmul.f32 8.0, %v26_v3  ;;  %v33_v15 = vmul.f32 8.0, %v27_v7  ;;  %v34_v16 = vmul.f32 8.0, %v28_v8  ;;  %v19_v26 = vadd.s32 8, %v18_v24 }
   0x6   :  { %106 = vpow2.f32 %v103_v13 }
   0x7   :  { %90 = vst [vmem:[%s180_s2] sm:$0xff] %v32_v12  ;;  %91 = vst [vmem:[%s180_s2 + $0x8] sm:$0xff] %v33_v15  ;;  %108 = vpow2.f32 %v104_v14  ;;  %vm41_vm0 = vcmp.eq.s32.totalorder %v19_v26, 8 }
   0x8   :  { %92 = vst [vmem:[%s180_s2 + $0x10] sm:$0xff] %v34_v16  ;;  %110 = vpow2.f32 %v105_v17 }
  0x10   :  { %v107_v19 = vpop.eup %106 }
  0x11   :  { %v109_v20 = vpop.eup %108  ;;  %v63_v21 = vadd.f32 1.0, %v107_v19 }
  0x12   :  { %v111_v22 = vpop.eup %110  ;;  %v64_v23 = vadd.f32 1.0, %v109_v20 }
  0x13   :  { %112 = vrcp.f32 %v63_v21  ;;  %v65_v25 = vadd.f32 1.0, %v111_v22 }
  0x14   :  { %114 = vrcp.f32 %v64_v23 }
  0x15   :  { %116 = vrcp.f32 %v65_v25 }
  0x1d   :  { %v113_v27 = vpop.eup %112 }
  0x1e   :  { %v115_v28 = vpop.eup %114  ;;  %v81_v29 = vsel %vm41_vm0, %v113_v27, %v14_v9 }
  0x1f   :  { %v117_v30 = vpop.eup %116  ;;  %93 = vst [vmem:[%s180_s2 + $0x18] sm:$0x7] %v81_v29  ;;  %v82_v31 = vsel %vm41_vm0, %v115_v28, %v15_v10 }
  0x20   :  { %94 = vst [vmem:[%s180_s2 + $0x20] sm:$0x7] %v82_v31  ;;  %v83_v32 = vsel %vm41_vm0, %v117_v30, %v16_v11 }
  0x21   :  { %95 = vst [vmem:[%s180_s2 + $0x28] sm:$0x7] %v83_v32 }

// kernel: _lambda_.15
= control target key start
LH: loop header
LB: loop body
LE: loop exit
PB: predicated region body
PF: predicated region fallthrough
CT: control target
= control target key end

     0   :  { %vm52_vm0 = vcmask 261120   ;;  %s186_s1 = inlined_call_operand.vmem [shape: bf16[32,128], index: 1, kind: input, shape index: {}]   ;;  %s187_s0 = inlined_call_operand.vmem [shape: bf16[32,32], index: 0, kind: input, shape index: {}]   ;;  %s188_s2 = inlined_call_operand.vmem [shape: f32[1,128], index: 2, kind: input, shape index: {}]   ;;  %s189_s3 = inlined_call_operand.vmem [shape: f32[32,128], index: 3, kind: output, shape index: {}]  }
   0x1   :  { %v135_v0 = vld [vmem:[%s186_s1] sm:$0xff]   ;;  %v136_v1 = vld [vmem:[%s186_s1 + $0x8] sm:$0xff]  }
   0x2   :  { %127 = vmatprep.subr.bf16.mxu0 %v135_v0  ;;  %v137_v2 = vld [vmem:[%s187_s0] sm:$0xff]   ;;  %v138_v3 = vld [vmem:[%s187_s0 + $0x8] sm:$0xff]  }
   0x3   :  { %128 = vmatpush3.bf16.msra.mxu0 %v135_v0  ;;  %131 = vmatprep.mubr.msk.bf16.mxu0 %vm52_vm0, %v137_v2  ;;  %v116_v4 = vld [vmem:[%s188_s2] ss:$0 sm:$0xff] }
   0x4   :  { %129 = vmatprep.subr.bf16.mxu0 %v136_v1 }
   0x7   :  { %130 = vmatpush3.bf16.msra.mxu0 %v136_v1 }
   0xa   :  { %132 = vmatmul.mubr.msk.bf16.vlgmr.msra.gmra.mrb[0].mxu0 %vm52_vm0, %v138_v3 }
  0xdd   :  { %v133_v5 = vpop.f32.mrb[0].mxu0 }
  0xde   :  { %v102_v6 = vadd.f32 %v133_v5, %v116_v4  ;;  %v93_v7 = vpop.f32.mrb[1].mxu0 }
  0xdf   :  { %v94_v8 = vadd.f32 %v116_v4, %v93_v7  ;;  %v134_v9 = vpop.f32.mrb[2].mxu0 }
  0xe0   :  { %110 = vst [vmem:[%s189_s3 + $0x10] sm:$0xff] %v102_v6  ;;  %v105_v10 = vadd.f32 %v134_v9, %v116_v4  ;;  %v96_v11 = vpop.f32.mrb[3].mxu0 }
  0xe1   :  { %108 = vst [vmem:[%s189_s3] sm:$0xff] %v94_v8  ;;  %v97_v12 = vadd.f32 %v116_v4, %v96_v11 }
  0xe2   :  { %111 = vst [vmem:[%s189_s3 + $0x18] sm:$0xff] %v105_v10 }
  0xe3   :  { %109 = vst [vmem:[%s189_s3 + $0x8] sm:$0xff] %v97_v12 }

// kernel: _lambda_.16
= control target key start
LH: loop header
LB: loop body
LE: loop exit
PB: predicated region body
PF: predicated region fallthrough
CT: control target
= control target key end

     0   :  { %vm42_vm0 = vcmask 785408   ;;  %v13_v6 = vlaneseq  ;;  %vm44_vm2 = vcmask 780288   ;;  %s86_s0 = inlined_call_operand.vmem [shape: f32[11,96], index: 0, kind: input, shape index: {}]   ;;  %s87_s1 = inlined_call_operand.vmem [shape: f32[11,96], index: 1, kind: input, shape index: {}]   ;;  %s88_s2 = inlined_call_operand.vmem [shape: f32[11,96], index: 2, kind: output, shape index: {}]  }
   0x1   :  { %v11_v0 = vld [vmem:[%s86_s0] sm:$0xff]  ;;  %v12_v2 = vld [vmem:[%s86_s0 + $0x8] sm:$0x7] }
   0x2   :  { %v16_v1 = vld [vmem:[%s87_s1] sm:$0xff]  ;;  %v51_v4 = vmul.f32 -1.442695, %v12_v2  ;;  %v14_v9 = vshrl.u32 %v13_v6, 7 }
   0x3   :  { %v18_v3 = vadd.f32 %v16_v1, %v11_v0 }
   0x4   :  { %52 = vpow2.f32 %v51_v4  ;;  %v15_v10 = vadd.s32 8, %v14_v9 }
   0x5   :  { %v20_v5 = vmul.f32 16.0, %v18_v3 }
   0x6   :  { %vm25_vm1 = vcmp.eq.s32.totalorder %v15_v10, 8 }
   0x7   :  { %43 = vst.msk [vmem:[%s88_s2] sm:$0xff] %vm42_vm0, %v20_v5 }
   0xe   :  { %v53_v7 = vpop.eup %52 }
   0xf   :  { %v33_v8 = vadd.f32 1.0, %v53_v7 }
  0x11   :  { %54 = vrcp.f32 %v33_v8 }
  0x1b   :  { %v55_v11 = vpop.eup %54 }
  0x1c   :  { %v39_v12 = vsel %vm25_vm1, %v55_v11, %v12_v2 }
  0x1d   :  { %45 = vst.msk [vmem:[%s88_s2 + $0x8] sm:$0x7] %vm44_vm2, %v39_v12 }

</bundles_post_ra>
